<compile_context>
chip_gen: v7x
topology: tpu7x:2x2x1
jax: 0.10.0
libtpu: 0.0.40
codegen_flags: <defaults>
</compile_context>

<pallas_src>
import functools

import jax
import jax.numpy as jnp
import numpy as np
from jax import lax
from jax.experimental import pallas as pl
from jax.experimental.pallas import tpu as pltpu

_EPS = 1e-10


def _srl32(x, k):
    """Logical right shift for int32 (arithmetic shift + mask of sign-extended bits)."""
    mask = jnp.int32((1 << (32 - k)) - 1)
    return jnp.bitwise_and(jnp.right_shift(x, k), mask)


def _gumbel_softmax_tile_kernel(seed_ref,                         # scalar prefetch (SMEM)
                                logits_ref, dT_ref, grp_ref,      # per-tile inputs
                                y_ref, ycht_ref, s_ref, l_ref, cnt_ref):  # outputs / accumulators
    c = pl.program_id(0)            # "core" (parallel) axis
    r = pl.program_id(1)            # row-tile (sequential) axis
    nrpc = pl.num_programs(1)
    TR, N = logits_ref.shape

    # ---- Uniform(0,1) noise from a counter-based int32 hash of the global element
    # index (splitmix/murmur-style mix).  Pure int32 VPU ops -> lowers on TPU and in
    # interpret mode, unlike pltpu.prng_*.
    # TODO(synk): not bit-reproducible vs. torch.Tensor.uniform_().
    row0 = (c * nrpc + r) * TR
    ri = lax.broadcasted_iota(jnp.int32, (TR, N), 0) + row0
    ci = lax.broadcasted_iota(jnp.int32, (TR, N), 1)
    h = ri * jnp.int32(N) + ci
    h = h * jnp.int32(-1640531527) + seed_ref[0]          # 0x9E3779B9 (wrapping mul)
    h = h ^ _srl32(h, 16)
    h = h * jnp.int32(-2048144789)                        # 0x85EBCA6B
    h = h ^ _srl32(h, 13)
    h = h * jnp.int32(-1028477387)                        # 0xC2B2AE35
    h = h ^ _srl32(h, 16)
    u = (h & jnp.int32(0x007FFFFF)).astype(jnp.float32) * jnp.float32(1.0 / 8388608.0)

    eps = jnp.float32(_EPS)
    g = -jnp.log(eps - jnp.log(u + eps))                  # Gumbel(0,1), as in the reference

    # ---- softmax((logits + gumbel) / 1.0, axis=-1) with an exact divide ----
    z = logits_ref[...].astype(jnp.float32) + g
    z = z - jnp.max(z, axis=-1, keepdims=True)
    e = jnp.exp(z)
    y = e / jnp.sum(e, axis=-1, keepdims=True)
    y_ref[...] = y

    # ---- per-(row, CH) mass, written lane-dense along rows: (CH, TR) = G @ y^T ----
    ycht_ref[...] = jnp.dot(grp_ref[...], y.T, preferred_element_type=jnp.float32)

    # ---- per-core resident accumulators ----
    @pl.when(r == 0)
    def _():
        s_ref[...] = jnp.zeros_like(s_ref)
        l_ref[...] = jnp.zeros_like(l_ref)
        cnt_ref[...] = jnp.zeros_like(cnt_ref)

    dT = dT_ref[...]                                       # (CP, TR), values in {0,1}
    # S = D^T @ y : subsumes nnz_ch_ba and x.sum(dim=[0,3])          (MXU)
    s_ref[...] += jnp.dot(dT, y, preferred_element_type=jnp.float32)
    # L = D^T @ log(1-y) : log-space column product (exact for D in {0,1})  (MXU)
    lg = jnp.log(jnp.maximum(1.0 - y, jnp.float32(1e-30)))  # clamp avoids -inf*0 -> NaN
    l_ref[...] += jnp.dot(dT, lg, preferred_element_type=jnp.float32)
    # rows with max(y) > 0.98  ==  elements of y > 0.98 (each softmax row sums to 1)
    sel = (y > jnp.float32(0.98)).astype(jnp.float32)
    cnt_ref[0:1, :] += jnp.sum(sel, axis=0, keepdims=True)


def _pick_row_tile(R, max_tr=512):
    """Largest power-of-two divisor of R, capped at max_tr."""
    tr = 1
    while tr * 2 <= min(R, max_tr) and R % (tr * 2) == 0:
        tr *= 2
    return tr


@functools.partial(jax.jit, static_argnames=("CH", "BA"))
def grad_row_hard_forward(Y, D, i, *, CH, BA, seed=0):
    """Forward pass of grad_row_hard_model. Returns the same 10-tuple as the reference."""
    R, N = Y.shape
    C = D.shape[1]
    assert N == CH * BA
    # The reference computes temp = 1000 - 999/9999*i, but GumbelSoftmax.forward always
    # uses temperature=1, so `i` has no effect on the output.
    del i

    TR = _pick_row_tile(R)
    assert TR == R or TR % 8 == 0, "row tile must divide R and be a multiple of 8"
    n_tiles = R // TR
    # v7x megacore: split the row axis across the two TensorCores via a leading
    # "parallel" grid axis with per-core partial accumulators. Harmless (serial outer
    # loop) on single-core v5e/v6e.
    n_cores = 2 if (n_tiles % 2 == 0 and n_tiles >= 2) else 1
    nrpc = n_tiles // n_cores

    # TODO(synk): the log-space column product / D^T matmuls assume D is a {0,1}
    # connectivity matrix (how grad_row_hard_model uses it); binarize defensively.
    d_bin = (D != 0).astype(jnp.float32)                              # (R, C)
    CP = ((C + 7) // 8) * 8
    dT = jnp.zeros((CP, R), jnp.float32).at[:C, :].set(d_bin.T)       # lane-dense (CP, R)

    # BA-group one-hot matrix: grp[ch, n] = 1 iff n // BA == ch
    grp = (jnp.arange(N, dtype=jnp.int32) // BA ==
           jnp.arange(CH, dtype=jnp.int32)[:, None]).astype(jnp.float32)  # (CH, N)

    seed_arr = jnp.asarray(seed, dtype=jnp.int32).reshape(1)

    grid_spec = pltpu.PrefetchScalarGridSpec(
        num_scalar_prefetch=1,
        grid=(n_cores, nrpc),
        in_specs=[
            pl.BlockSpec((TR, N), lambda c, r, s: (c * nrpc + r, 0)),    # logits (Y)
            pl.BlockSpec((CP, TR), lambda c, r, s: (0, c * nrpc + r)),   # D^T (lane dense)
            pl.BlockSpec((CH, N), lambda c, r, s: (0, 0)),               # BA-group matrix
        ],
        out_specs=[
            pl.BlockSpec((TR, N), lambda c, r, s: (c * nrpc + r, 0)),    # y tile
            pl.BlockSpec((CH, TR), lambda c, r, s: (0, c * nrpc + r)),   # y_ch^T tile
            pl.BlockSpec((CP, N), lambda c, r, s: (c, 0)),               # S partial (per core)
            pl.BlockSpec((CP, N), lambda c, r, s: (c, 0)),               # L partial (per core)
            pl.BlockSpec((8, N), lambda c, r, s: (c, 0)),                # >0.98 count partial
        ],
    )

    y_flat, y_chT, s_part, l_part, cnt_part = pl.pallas_call(
        _gumbel_softmax_tile_kernel,
        grid_spec=grid_spec,
        out_shape=(
            jax.ShapeDtypeStruct((R, N), jnp.float32),
            jax.ShapeDtypeStruct((CH, R), jnp.float32),
            jax.ShapeDtypeStruct((n_cores * CP, N), jnp.float32),
            jax.ShapeDtypeStruct((n_cores * CP, N), jnp.float32),
            jax.ShapeDtypeStruct((n_cores * 8, N), jnp.float32),
        ),
        compiler_params=pltpu.CompilerParams(
            dimension_semantics=("parallel", "arbitrary"),
        ),
    )(seed_arr, Y, dT, grp)

    # ---- tiny epilogue reductions on (C,N)/(CH,R)-sized arrays (plain XLA) ----
    S = jnp.sum(s_part.reshape(n_cores, CP, N), axis=0)[:C]           # (C, N) = D^T @ y
    L = jnp.sum(l_part.reshape(n_cores, CP, N), axis=0)[:C]           # (C, N) = D^T @ log(1-y)

    y = y_flat.reshape(R, CH, BA)
    y_ch = y_chT.T                                                    # (R, CH)

    nnz_ch_ba = jnp.sum(S, axis=0).reshape(CH, BA)                    # (CH, BA)
    max_nnz_ch = jnp.max(nnz_ch_ba, axis=1)                           # (CH,)

    col_ch = 1.0 - jnp.exp(jnp.sum(L.reshape(C, CH, BA), axis=2))     # (C, CH)
    num_col_ch = jnp.sum(col_ch, axis=0)                              # (CH,)

    row_ch = jnp.sum(y_chT, axis=1)                                   # (CH,)

    sum_x_03 = jnp.sum(S.reshape(C, CH, BA), axis=2)                  # (C, CH) = x.sum([0,3])
    col_freq = sum_x_03 / row_ch
    col_freq_ch = jnp.sum(col_freq * (1.0 - col_freq))                # scalar

    centroid = sum_x_03 / row_ch                                      # (C, CH)
    centroid_diff = centroid[None, :, :] - d_bin[:, :, None] * y_ch[:, None, :]  # (R, C, CH)

    # Reference returns a Python float via .item(); here it is a 0-d array.
    num_row_sel = jnp.sum(cnt_part)

    real_ch = max_nnz_ch + num_col_ch + row_ch                        # (CH,)
    max_cmd = jnp.max(real_ch)                                        # scalar

    return (y, nnz_ch_ba, max_cmd, real_ch, max_nnz_ch, num_col_ch, row_ch,
            col_freq_ch, centroid_diff, num_row_sel)


if __name__ == "__main__":
    # Small but representative shapes: N = CH*BA = 128 (one full lane width).
    R, C = 2048, 16
    CH, BA = 4, 32
    N = CH * BA

    key = jax.random.PRNGKey(0)
    k_d, k_y = jax.random.split(key)

    # D: synthetic 0/1 connectivity matrix (as in the reference usage)
    D = (jax.random.uniform(k_d, (R, C)) > 0.5).astype(jnp.float32)
    # Y parameter: kaiming_uniform_ -> U(-sqrt(6/fan_in), sqrt(6/fan_in)), fan_in = N
    bound = (6.0 / N) ** 0.5
    Y = jax.random.uniform(k_y, (R, N), minval=-bound, maxval=bound, dtype=jnp.float32)

    outs = grad_row_hard_forward(Y, D, 0, CH=CH, BA=BA, seed=0)
    outs = jax.block_until_ready(outs)
    (y, nnz_ch_ba, max_cmd, real_ch, max_nnz_ch, num_col_ch, row_ch,
     col_freq_ch, centroid_diff, num_row_sel) = outs

    # shape checks
    assert y.shape == (R, CH, BA)
    assert nnz_ch_ba.shape == (CH, BA)
    assert max_nnz_ch.shape == (CH,) and num_col_ch.shape == (CH,)
    assert row_ch.shape == (CH,) and real_ch.shape == (CH,)
    assert centroid_diff.shape == (R, C, CH)
    assert max_cmd.shape == () and col_freq_ch.shape == () and num_row_sel.shape == ()

    # consistency check: recompute the reference (PyTorch-style) formulas in float64
    # from the kernel's own y sample and compare against the fused/matmul outputs.
    y_np = np.asarray(y, dtype=np.float64)
    d_np = np.asarray(D, dtype=np.float64)
    assert np.all(np.isfinite(y_np))
    assert np.allclose(y_np.reshape(R, -1).sum(-1), 1.0, atol=1e-4)

    x_np = y_np.reshape(R, 1, CH, BA) * d_np.reshape(R, C, 1, 1)
    nnz_ref = x_np.sum(axis=(0, 1))
    col_ch_ref = 1.0 - np.prod(np.prod(1.0 - x_np, axis=0), axis=2)
    row_ch_ref = y_np.sum(axis=(0, 2))
    sum_x_03_ref = x_np.sum(axis=(0, 3))
    cf = sum_x_03_ref / row_ch_ref
    col_freq_ch_ref = np.sum(cf * (1.0 - cf))
    centroid_diff_ref = (sum_x_03_ref / row_ch_ref)[None] - x_np.sum(axis=3)
    num_row_sel_ref = float(np.sum(y_np.reshape(R, -1).max(axis=1) > 0.98))
    real_ch_ref = nnz_ref.max(axis=1) + col_ch_ref.sum(axis=0) + row_ch_ref

    tol = dict(rtol=2e-2, atol=2e-2)   # loose: MXU f32 matmuls may use bf16 passes
    assert np.allclose(np.asarray(nnz_ch_ba), nnz_ref, **tol)
    assert np.allclose(np.asarray(num_col_ch), col_ch_ref.sum(axis=0), **tol)
    assert np.allclose(np.asarray(row_ch), row_ch_ref, **tol)
    assert np.allclose(float(col_freq_ch), col_freq_ch_ref, **tol)
    assert np.allclose(np.asarray(centroid_diff), centroid_diff_ref, **tol)
    assert np.allclose(np.asarray(real_ch), real_ch_ref, **tol)
    assert np.allclose(float(max_cmd), real_ch_ref.max(), **tol)
    assert abs(float(num_row_sel) - num_row_sel_ref) < 0.5

    print("KERNEL_OK")
</pallas_src>

<mosaic_0001>
module attributes {stable_mosaic.version = 11 : i64} {
  func.func @_gumbel_softmax_tile_kernel(%arg0: i32, %arg1: i32, %arg2: memref<1xi32, #tpu.memory_space<smem>>, %arg3: memref<512x128xf32, #tpu.memory_space<vmem>>, %arg4: memref<16x512xf32, #tpu.memory_space<vmem>>, %arg5: memref<4x128xf32, #tpu.memory_space<vmem>>, %arg6: memref<512x128xf32, #tpu.memory_space<vmem>>, %arg7: memref<4x512xf32, #tpu.memory_space<vmem>>, %arg8: memref<16x128xf32, #tpu.memory_space<vmem>>, %arg9: memref<16x128xf32, #tpu.memory_space<vmem>>, %arg10: memref<8x128xf32, #tpu.memory_space<vmem>>) attributes {dimension_semantics = [#tpu.dimension_semantics<parallel>, #tpu.dimension_semantics<arbitrary>], iteration_bounds = array<i64: 2, 2>, scalar_prefetch = 1 : i64, scratch_operands = 0 : i64, tpu.core_type = #tpu.core_type<tc>, window_params = [{transform_indices = @transform_0, window_bounds = array<i64: 512, 128>}, {transform_indices = @transform_1, window_bounds = array<i64: 16, 512>}, {pipeline_mode = #tpu.pipeline_mode<synchronous>, transform_indices = @transform_2, window_bounds = array<i64: 4, 128>}, {transform_indices = @transform_3, window_bounds = array<i64: 512, 128>}, {transform_indices = @transform_4, window_bounds = array<i64: 4, 512>}, {transform_indices = @transform_5, window_bounds = array<i64: 16, 128>}, {transform_indices = @transform_6, window_bounds = array<i64: 16, 128>}, {transform_indices = @transform_7, window_bounds = array<i64: 8, 128>}]} {
    %c2_i32 = arith.constant 2 : i32
    %0 = arith.muli %arg0, %c2_i32 : i32
    %1 = arith.addi %0, %arg1 : i32
    %c512_i32 = arith.constant 512 : i32
    %2 = arith.muli %1, %c512_i32 : i32
    %3 = tpu.iota {dimensions = array<i32: 0>} : vector<512x128xi32>
    %4 = vector.broadcast %2 : i32 to vector<512x128xi32>
    %5 = arith.addi %3, %4 : vector<512x128xi32>
    %6 = tpu.iota {dimensions = array<i32: 1>} : vector<512x128xi32>
    %c128_i32 = arith.constant 128 : i32
    %7 = vector.broadcast %c128_i32 : i32 to vector<512x128xi32>
    %8 = arith.muli %5, %7 : vector<512x128xi32>
    %9 = arith.addi %8, %6 : vector<512x128xi32>
    %c-1640531527_i32 = arith.constant -1640531527 : i32
    %10 = vector.broadcast %c-1640531527_i32 : i32 to vector<512x128xi32>
    %11 = arith.muli %9, %10 : vector<512x128xi32>
    %c0 = arith.constant 0 : index
    %12 = memref.load %arg2[%c0] : memref<1xi32, #tpu.memory_space<smem>>
    %13 = vector.broadcast %12 : i32 to vector<512x128xi32>
    %14 = arith.addi %11, %13 : vector<512x128xi32>
    %c16_i32 = arith.constant 16 : i32
    %15 = vector.broadcast %c16_i32 : i32 to vector<512x128xi32>
    %16 = arith.shrsi %14, %15 : vector<512x128xi32>
    %c65535_i32 = arith.constant 65535 : i32
    %17 = vector.broadcast %c65535_i32 : i32 to vector<512x128xi32>
    %18 = arith.andi %16, %17 : vector<512x128xi32>
    %19 = arith.xori %14, %18 : vector<512x128xi32>
    %c-2048144789_i32 = arith.constant -2048144789 : i32
    %20 = vector.broadcast %c-2048144789_i32 : i32 to vector<512x128xi32>
    %21 = arith.muli %19, %20 : vector<512x128xi32>
    %c13_i32 = arith.constant 13 : i32
    %22 = vector.broadcast %c13_i32 : i32 to vector<512x128xi32>
    %23 = arith.shrsi %21, %22 : vector<512x128xi32>
    %c524287_i32 = arith.constant 524287 : i32
    %24 = vector.broadcast %c524287_i32 : i32 to vector<512x128xi32>
    %25 = arith.andi %23, %24 : vector<512x128xi32>
    %26 = arith.xori %21, %25 : vector<512x128xi32>
    %c-1028477387_i32 = arith.constant -1028477387 : i32
    %27 = vector.broadcast %c-1028477387_i32 : i32 to vector<512x128xi32>
    %28 = arith.muli %26, %27 : vector<512x128xi32>
    %c16_i32_0 = arith.constant 16 : i32
    %29 = vector.broadcast %c16_i32_0 : i32 to vector<512x128xi32>
    %30 = arith.shrsi %28, %29 : vector<512x128xi32>
    %c65535_i32_1 = arith.constant 65535 : i32
    %31 = vector.broadcast %c65535_i32_1 : i32 to vector<512x128xi32>
    %32 = arith.andi %30, %31 : vector<512x128xi32>
    %33 = arith.xori %28, %32 : vector<512x128xi32>
    %c8388607_i32 = arith.constant 8388607 : i32
    %34 = vector.broadcast %c8388607_i32 : i32 to vector<512x128xi32>
    %35 = arith.andi %33, %34 : vector<512x128xi32>
    %36 = arith.sitofp %35 : vector<512x128xi32> to vector<512x128xf32>
    %cst = arith.constant 1.1920929E-7 : f32
    %37 = vector.broadcast %cst : f32 to vector<512x128xf32>
    %38 = arith.mulf %36, %37 : vector<512x128xf32>
    %cst_2 = arith.constant 1.000000e-10 : f32
    %39 = vector.broadcast %cst_2 : f32 to vector<512x128xf32>
    %40 = arith.addf %38, %39 : vector<512x128xf32>
    %41 = math.log %40 : vector<512x128xf32>
    %cst_3 = arith.constant 1.000000e-10 : f32
    %42 = vector.broadcast %cst_3 : f32 to vector<512x128xf32>
    %43 = arith.subf %42, %41 : vector<512x128xf32>
    %44 = math.log %43 : vector<512x128xf32>
    %cst_4 = arith.constant 0.000000e+00 : f32
    %45 = vector.broadcast %cst_4 : f32 to vector<512x128xf32>
    %46 = arith.subf %45, %44 : vector<512x128xf32>
    %c0_5 = arith.constant 0 : index
    %c0_6 = arith.constant 0 : index
    %47 = vector.load %arg3[%c0_5, %c0_6] : memref<512x128xf32, #tpu.memory_space<vmem>>, vector<512x128xf32>
    %48 = arith.addf %47, %46 : vector<512x128xf32>
    %cst_7 = arith.constant dense<0xFF800000> : vector<512xf32>
    %49 = vector.multi_reduction <maximumf>, %48, %cst_7 [1] : vector<512x128xf32> to vector<512xf32>
    %50 = vector.shape_cast %49 : vector<512xf32> to vector<512x1xf32>
    %51 = vector.broadcast %50 : vector<512x1xf32> to vector<512x128xf32>
    %52 = arith.subf %48, %51 : vector<512x128xf32>
    %53 = math.exp %52 : vector<512x128xf32>
    %cst_8 = arith.constant dense<0.000000e+00> : vector<512xf32>
    %54 = vector.multi_reduction <add>, %53, %cst_8 [1] : vector<512x128xf32> to vector<512xf32>
    %55 = vector.shape_cast %54 : vector<512xf32> to vector<512x1xf32>
    %56 = vector.broadcast %55 : vector<512x1xf32> to vector<512x128xf32>
    %57 = arith.divf %53, %56 : vector<512x128xf32>
    %c0_9 = arith.constant 0 : index
    %c0_10 = arith.constant 0 : index
    %58 = vector.load %arg6[%c0_9, %c0_10] : memref<512x128xf32, #tpu.memory_space<vmem>>, vector<512x128xf32>
    tpu.vector_store %arg6[%c0_9, %c0_10], %57 {strides = array<i32>} : memref<512x128xf32, #tpu.memory_space<vmem>>, vector<512x128xf32>,
    %c0_11 = arith.constant 0 : index
    %c0_12 = arith.constant 0 : index
    %59 = vector.load %arg5[%c0_11, %c0_12] : memref<4x128xf32, #tpu.memory_space<vmem>>, vector<4x128xf32>
    %60 = tpu.transpose %57, [1, 0] : vector<512x128xf32> -> vector<128x512xf32>
    %cst_13 = arith.constant dense<0.000000e+00> : vector<4x512xf32>
    %61 = tpu.matmul %59, %60, %cst_13 {dimension_numbers = #tpu.dot_dimension_numbers<[1], [0], [0], [1], [0, 0, 1, 1], [], []>} : vector<4x128xf32>, vector<128x512xf32>, vector<4x512xf32> -> vector<4x512xf32>
    %c0_14 = arith.constant 0 : index
    %c0_15 = arith.constant 0 : index
    %62 = vector.load %arg7[%c0_14, %c0_15] : memref<4x512xf32, #tpu.memory_space<vmem>>, vector<4x512xf32>
    tpu.vector_store %arg7[%c0_14, %c0_15], %61 {strides = array<i32>} : memref<4x512xf32, #tpu.memory_space<vmem>>, vector<4x512xf32>,
    %c0_i32 = arith.constant 0 : i32
    %63 = arith.cmpi eq, %arg1, %c0_i32 : i32
    %64 = arith.extui %63 : i1 to i32
    %c0_i32_16 = arith.constant 0 : i32
    %65 = arith.cmpi ne, %64, %c0_i32_16 : i32
    scf.if %65 {
      %cst_37 = arith.constant 0.000000e+00 : f32
      %89 = vector.broadcast %cst_37 : f32 to vector<16x128xf32>
      %c0_38 = arith.constant 0 : index
      %c0_39 = arith.constant 0 : index
      %90 = vector.load %arg8[%c0_38, %c0_39] : memref<16x128xf32, #tpu.memory_space<vmem>>, vector<16x128xf32>
      tpu.vector_store %arg8[%c0_38, %c0_39], %89 {strides = array<i32>} : memref<16x128xf32, #tpu.memory_space<vmem>>, vector<16x128xf32>,
      %cst_40 = arith.constant 0.000000e+00 : f32
      %91 = vector.broadcast %cst_40 : f32 to vector<16x128xf32>
      %c0_41 = arith.constant 0 : index
      %c0_42 = arith.constant 0 : index
      %92 = vector.load %arg9[%c0_41, %c0_42] : memref<16x128xf32, #tpu.memory_space<vmem>>, vector<16x128xf32>
      tpu.vector_store %arg9[%c0_41, %c0_42], %91 {strides = array<i32>} : memref<16x128xf32, #tpu.memory_space<vmem>>, vector<16x128xf32>,
      %cst_43 = arith.constant 0.000000e+00 : f32
      %93 = vector.broadcast %cst_43 : f32 to vector<8x128xf32>
      %c0_44 = arith.constant 0 : index
      %c0_45 = arith.constant 0 : index
      %94 = vector.load %arg10[%c0_44, %c0_45] : memref<8x128xf32, #tpu.memory_space<vmem>>, vector<8x128xf32>
      tpu.vector_store %arg10[%c0_44, %c0_45], %93 {strides = array<i32>} : memref<8x128xf32, #tpu.memory_space<vmem>>, vector<8x128xf32>,
    } else {
    }
    %c0_17 = arith.constant 0 : index
    %c0_18 = arith.constant 0 : index
    %66 = vector.load %arg4[%c0_17, %c0_18] : memref<16x512xf32, #tpu.memory_space<vmem>>, vector<16x512xf32>
    %c0_19 = arith.constant 0 : index
    %c0_20 = arith.constant 0 : index
    %67 = vector.load %arg8[%c0_19, %c0_20] : memref<16x128xf32, #tpu.memory_space<vmem>>, vector<16x128xf32>
    %cst_21 = arith.constant dense<0.000000e+00> : vector<16x128xf32>
    %68 = tpu.matmul %66, %57, %cst_21 {dimension_numbers = #tpu.dot_dimension_numbers<[1], [0], [0], [1], [0, 0, 1, 1], [], []>} : vector<16x512xf32>, vector<512x128xf32>, vector<16x128xf32> -> vector<16x128xf32>
    %69 = arith.addf %67, %68 : vector<16x128xf32>
    %c0_22 = arith.constant 0 : index
    %c0_23 = arith.constant 0 : index
    %70 = vector.load %arg8[%c0_22, %c0_23] : memref<16x128xf32, #tpu.memory_space<vmem>>, vector<16x128xf32>
    tpu.vector_store %arg8[%c0_22, %c0_23], %69 {strides = array<i32>} : memref<16x128xf32, #tpu.memory_space<vmem>>, vector<16x128xf32>,
    %cst_24 = arith.constant 1.000000e+00 : f32
    %71 = vector.broadcast %cst_24 : f32 to vector<512x128xf32>
    %72 = arith.subf %71, %57 : vector<512x128xf32>
    %cst_25 = arith.constant 1.000000e-30 : f32
    %73 = vector.broadcast %cst_25 : f32 to vector<512x128xf32>
    %74 = arith.maximumf %72, %73 : vector<512x128xf32>
    %75 = math.log %74 : vector<512x128xf32>
    %c0_26 = arith.constant 0 : index
    %c0_27 = arith.constant 0 : index
    %76 = vector.load %arg9[%c0_26, %c0_27] : memref<16x128xf32, #tpu.memory_space<vmem>>, vector<16x128xf32>
    %cst_28 = arith.constant dense<0.000000e+00> : vector<16x128xf32>
    %77 = tpu.matmul %66, %75, %cst_28 {dimension_numbers = #tpu.dot_dimension_numbers<[1], [0], [0], [1], [0, 0, 1, 1], [], []>} : vector<16x512xf32>, vector<512x128xf32>, vector<16x128xf32> -> vector<16x128xf32>
    %78 = arith.addf %76, %77 : vector<16x128xf32>
    %c0_29 = arith.constant 0 : index
    %c0_30 = arith.constant 0 : index
    %79 = vector.load %arg9[%c0_29, %c0_30] : memref<16x128xf32, #tpu.memory_space<vmem>>, vector<16x128xf32>
    tpu.vector_store %arg9[%c0_29, %c0_30], %78 {strides = array<i32>} : memref<16x128xf32, #tpu.memory_space<vmem>>, vector<16x128xf32>,
    %cst_31 = arith.constant 9.800000e-01 : f32
    %80 = vector.broadcast %cst_31 : f32 to vector<512x128xf32>
    %81 = arith.cmpf ogt, %57, %80 : vector<512x128xf32>
    %82 = arith.extui %81 : vector<512x128xi1> to vector<512x128xi32>
    %83 = arith.sitofp %82 : vector<512x128xi32> to vector<512x128xf32>
    %c0_32 = arith.constant 0 : index
    %c0_33 = arith.constant 0 : index
    %84 = vector.load %arg10[%c0_32, %c0_33] : memref<8x128xf32, #tpu.memory_space<vmem>>, vector<1x128xf32>
    %cst_34 = arith.constant dense<0.000000e+00> : vector<128xf32>
    %85 = vector.multi_reduction <add>, %83, %cst_34 [0] : vector<512x128xf32> to vector<128xf32>
    %86 = vector.shape_cast %85 : vector<128xf32> to vector<1x128xf32>
    %87 = arith.addf %84, %86 : vector<1x128xf32>
    %c0_35 = arith.constant 0 : index
    %c0_36 = arith.constant 0 : index
    %88 = vector.load %arg10[%c0_35, %c0_36] : memref<8x128xf32, #tpu.memory_space<vmem>>, vector<1x128xf32>
    tpu.vector_store %arg10[%c0_35, %c0_36], %87 {strides = array<i32>} : memref<8x128xf32, #tpu.memory_space<vmem>>, vector<1x128xf32>,
    return
  }
  func.func @transform_0(%arg0: i32, %arg1: i32, %arg2: memref<1xi32, #tpu.memory_space<smem>>) -> (i32, i32) {
    %c2_i32 = arith.constant 2 : i32
    %0 = arith.muli %arg0, %c2_i32 : i32
    %1 = arith.addi %0, %arg1 : i32
    %c0_i32 = arith.constant 0 : i32
    %c0_i32_0 = arith.constant 0 : i32
    return %1, %c0_i32 : i32, i32
  }
  func.func @transform_1(%arg0: i32, %arg1: i32, %arg2: memref<1xi32, #tpu.memory_space<smem>>) -> (i32, i32) {
    %c2_i32 = arith.constant 2 : i32
    %0 = arith.muli %arg0, %c2_i32 : i32
    %1 = arith.addi %0, %arg1 : i32
    %c0_i32 = arith.constant 0 : i32
    %c0_i32_0 = arith.constant 0 : i32
    return %c0_i32, %1 : i32, i32
  }
  func.func @transform_2(%arg0: i32, %arg1: i32, %arg2: memref<1xi32, #tpu.memory_space<smem>>) -> (i32, i32) {
    %c0_i32 = arith.constant 0 : i32
    %c0_i32_0 = arith.constant 0 : i32
    %c0_i32_1 = arith.constant 0 : i32
    return %c0_i32, %c0_i32_0 : i32, i32
  }
  func.func @transform_3(%arg0: i32, %arg1: i32, %arg2: memref<1xi32, #tpu.memory_space<smem>>) -> (i32, i32) {
    %c2_i32 = arith.constant 2 : i32
    %0 = arith.muli %arg0, %c2_i32 : i32
    %1 = arith.addi %0, %arg1 : i32
    %c0_i32 = arith.constant 0 : i32
    %c0_i32_0 = arith.constant 0 : i32
    return %1, %c0_i32 : i32, i32
  }
  func.func @transform_4(%arg0: i32, %arg1: i32, %arg2: memref<1xi32, #tpu.memory_space<smem>>) -> (i32, i32) {
    %c2_i32 = arith.constant 2 : i32
    %0 = arith.muli %arg0, %c2_i32 : i32
    %1 = arith.addi %0, %arg1 : i32
    %c0_i32 = arith.constant 0 : i32
    %c0_i32_0 = arith.constant 0 : i32
    return %c0_i32, %1 : i32, i32
  }
  func.func @transform_5(%arg0: i32, %arg1: i32, %arg2: memref<1xi32, #tpu.memory_space<smem>>) -> (i32, i32) {
    %c0_i32 = arith.constant 0 : i32
    %c0_i32_0 = arith.constant 0 : i32
    return %arg0, %c0_i32 : i32, i32
  }
  func.func @transform_6(%arg0: i32, %arg1: i32, %arg2: memref<1xi32, #tpu.memory_space<smem>>) -> (i32, i32) {
    %c0_i32 = arith.constant 0 : i32
    %c0_i32_0 = arith.constant 0 : i32
    return %arg0, %c0_i32 : i32, i32
  }
  func.func @transform_7(%arg0: i32, %arg1: i32, %arg2: memref<1xi32, #tpu.memory_space<smem>>) -> (i32, i32) {
    %c0_i32 = arith.constant 0 : i32
    %c0_i32_0 = arith.constant 0 : i32
    return %arg0, %c0_i32 : i32, i32
  }
}

</mosaic_0001>

<bundles_post_ra>
// kernel: grad_row_hard_forward.1
= control target key start
LH: loop header
LB: loop body
LE: loop exit
PB: predicated region body
PF: predicated region fallthrough
CT: control target
= control target key end

     0   :  { %s7711_s0 = inlined_call_operand.<no memory space> [shape: s32[1], index: 0, kind: input, shape index: {}]   ;;  %s7712_s1 = inlined_call_operand.hbm [shape: f32[2048,128], index: 1, kind: input, shape index: {}]   ;;  %s7713_s2 = inlined_call_operand.vmem [shape: f32[16,2048], index: 2, kind: input, shape index: {}]   ;;  %s7714_s3 = inlined_call_operand.vmem [shape: f32[4,128], index: 3, kind: input, shape index: {}]   ;;  %s7715_s4 = inlined_call_operand.vmem [shape: f32[2048,128], index: 4, kind: output, shape index: {0}]   ;;  %s7716_s5 = inlined_call_operand.vmem [shape: f32[4,2048], index: 5, kind: output, shape index: {1}]   ;;  %s7717_s6 = inlined_call_operand.vmem [shape: f32[32,128], index: 6, kind: output, shape index: {2}]   ;;  %s7718_s7 = inlined_call_operand.vmem [shape: f32[32,128], index: 7, kind: output, shape index: {3}]   ;;  %s7719_s8 = inlined_call_operand.vmem [shape: f32[16,128], index: 8, kind: output, shape index: {4}]  }
   0x1   :  { %14 = sst [smem:[#allocation3]] %s7711_s0 }
   0x2   :  { %15 = vsyncpa [#allocation5], 0 }
   0x3   :  { %17 = vsyncpa [#allocation5 + $0x1], 0  ;;  %s5777_s29 = smov 0   ;;  %s5779_s30 = smov 0  }
   0x4   :  { %s5781_s9 = smov 0   ;;  %s5783_s10 = smov 0  }
   0x5   :  { %s5785_s11 = smov 0   ;;  %s5787_s12 = smov 0  }
   0x6   :  { %s5789_s13 = smov 0   ;;  %s5791_s14 = smov 0  }
   0x7 LB: > { %s32_s0 = sadd.s32 1, %s5714_s12  ;;  %s35_s15 = sadd.s32 1, %s5718_s13  ;;  %s5722_s14 = sphi %s5791_s14, %s23_s14   ;;  %s5718_s13 = sphi %s5789_s13, %s8068_s13   ;;  %s5714_s12 = sphi %s5787_s12, %s8067_s12   ;;  %s5710_s11 = sphi %s5785_s11, %s8066_s11   ;;  %s5706_s10 = sphi %s5783_s10, %s8065_s10   ;;  %s5702_s9 = sphi %s5781_s9, %s8064_s9   ;;  %s5698_s30 = sphi %s5779_s30, %s8063_s30   ;;  %s5694_s29 = sphi %s5777_s29, %s8062_s29  }
   0x8   : > { %p33_p0 = scmp.ge.s32.totalorder %s32_s0, 2  ;;  %s4209_s16 = sadd.s32 4294967295, %s5722_s14  }
   0x9   : > { %s4211_s17 = sshll.u32 %s5718_s13, 1  ;;  %p53_p1 = scmp.ne.s32.totalorder %s5702_s9, %s5698_s30 }
   0xa   : > { %s8070_s0 = smov (%p33_p0, %s32_s0), 0  ;;  %s8072_s15 = smov (!%p33_p0, %s35_s15), %s5718_s13 }
   0xb   : > { %7854 = sst [smem:[#allocation8_spill]] %s8070_s0  ;;  %s5823_s18 = sadd.s32 %s5714_s12, %s4211_s17 }
   0xc   : > { %p37_p2 = scmp.ge.s32.totalorder %s8072_s15, 2  ;;  %p54_p3 = scmp.eq.s32.totalorder %s5722_s14, 0 }
   0xd   : > { %p59_p4 = scmp.ne.s32.totalorder %s5698_s30, %s5694_s29  ;;  %p60_p5 = scmp.eq.s32.totalorder %s4209_s16, 0 }
   0xe   : > { %s8074_s15 = smov (%p37_p2, %s8072_s15), 0  ;;  %p5831_p6 = por %p54_p3, %p53_p1 }
   0xf   : > { %7855 = sst [smem:[#allocation9_spill]] %s8074_s15  ;;  %p5835_p7 = por %p60_p5, %p59_p4 }
  0x10   : > { %s4212_s21 = sshll.u32 %s8074_s15, 1  ;;  %s46_s24 = sadd.s32 1, %s5702_s9 }
  0x11   : > { %s42_s22 = sadd.s32 %s4212_s21, %s8070_s0  ;;  %p4220_p9 = scmp.ge.s32.totalorder %s5722_s14, 4 }
  0x12   : > { %s43_s23 = ssub.s32 %s5823_s18, %s42_s22  ;;  %s5848_s26 = sand.u32 (!%p4220_p9), 1, %s5702_s9  }
  0x13   : > { %p44_p8 = scmp.eq.s32.totalorder %s43_s23, 0  ;;  %271 = sbr.rel (%p4220_p9) target bundleno = 55 (0x37), region = 20 }
  0x14   : > { %s4504_s27 = sshll.u32 (!%p4220_p9), %s5823_s18, 13  ;;  %s4221_s28 = sshll.u32 (!%p4220_p9), %s5848_s26, 9 }
  0x15   : > { %s5844_s25 = scalar_select %p44_p8, %s5702_s9, %s46_s24  }
  0x16   : > { %s5855_s17 = scalar_lea.hbm (!%p4220_p9), %s7712_s1, %s4504_s27  ;;  %s279_s21 = scalar_lea.vmem (!%p4220_p9), [#allocation4], %s4221_s28 }
  0x17   : > { %s288_s22 = sshll.u32 (!%p4220_p9), %s279_s21, 4  ;;  %s276_s23 = scalar_lea.sflag (!%p4220_p9), [#allocation5], %s5848_s26  ;;  %s5857_s22 = int_to_ptr.vmem [resolvable:$true] %s288_s22 }
  0x18   : > { %s5628_s24 = scalar_lea.hbm (!%p4220_p9), %s5855_s17, 8192  ;;  %s5632_s29 = scalar_lea.hbm (!%p4220_p9), %s7712_s1, 32768 }
  0x19   : > { %p5629_p10 = scmp.ne.s32.totalorder (!%p4220_p9), %s5855_s17, %s5628_s24  ;;  %p5633_p13 = scmp.lt.u32.totalorder (!%p4220_p9), %s5855_s17, %s7712_s1 }
  0x1a   : > { %p5634_p0 = scmp.lt.u32.totalorder %s5632_s29, %s5628_s24  ;;  %p5636_p2 = scmp.lt.u32.totalorder %s5628_s24, %s5855_s17 }
  0x1b   : > { %p5630_p11 = pnand %p5629_p10, %p5831_p6 }
  0x1c   : > { %p5635_p1 = por %p5634_p0, %p5633_p13 }
  0x1d   : > { %p5631_p12 = pneg %p5630_p11 }
  0x1e   : > { %p5637_p3 = por %p5636_p2, %p5635_p1 }
  0x20   : > { %p5638_p4 = pnand %p5637_p3, %p5631_p12 }
  0x22   : > { %5641 = shalt.err (!%p5638_p4)
}
  0x23   : > { %s5642_s28 = scalar_lea.vmem %s5857_s22, 8192  ;;  %s5724_s0 = smov [#allocation4]  }
  0x24   : > { %p5643_p5 = scmp.ne.s32.totalorder %s5857_s22, %s5642_s28  ;;  %s5646_s15 = sshll.u32 %s5724_s0, 4  ;;  %s5647_s15 = int_to_ptr.vmem [resolvable:$false] %s5646_s15 }
  0x25   : > { %s5648_s21 = scalar_lea.vmem %s5647_s15, 16384  ;;  %p5649_p10 = scmp.lt.s32.totalorder %s5857_s22, %s5647_s15 }
  0x26   : > { %p5644_p8 = pnand %p5643_p5, %p5831_p6  ;;  %p5650_p11 = scmp.lt.s32.totalorder %s5648_s21, %s5642_s28 }
  0x28   : > { %p5645_p9 = pneg %p5644_p8  ;;  %p5651_p13 = por %p5650_p11, %p5649_p10 }
  0x2a   : > { %p5652_p0 = pnand %p5651_p13, %p5645_p9 }
  0x2c   : > { %5655 = shalt.err (!%p5652_p0)
}
  0x2d   : > { %s5725_s24 = smov 128   ;;  %s5726_s29 = smov 8  }
  0x2e   : > { %4918 = dma.hbm_to_vmem [thread:$0]  (%p5831_p6), %s5855_s17, 8192, %s5857_s22, %s276_s23, %s5725_s24, %s5725_s24, %s5726_s29  }
  0x2f   : > { %297 = sbr.rel (!%p5831_p6) target bundleno = 55 (0x37), region = 28  ;;  %s4225_s27 = sshll.u32 (%p5831_p6), %s5848_s26, 6 }
  0x30   : > { %s4505_s16 = sshll.u32 (%p5831_p6), %s5823_s18, 5  ;;  %s301_s21 = scalar_lea.vmem (%p5831_p6), [#allocation6], %s4225_s27 }
  0x31   : > { %s306_s15 = scalar_lea.vmem (%p5831_p6), %s7713_s2, %s4505_s16 }
  0x32   : > { %v319_v0 = vld [vmem:[%s306_s15] sm:$0xff] (%p5831_p6)  ;;  %v321_v1 = vld [vmem:[%s306_s15 + $0x8] sm:$0xff] (%p5831_p6)  ;;  %v323_v2 = vld [vmem:[%s306_s15 + $0x10] sm:$0xff] (%p5831_p6) }
  0x33   : > { %320 = vst [vmem:[%s301_s21] sm:$0xff] (%p5831_p6), %v319_v0  ;;  %322 = vst [vmem:[%s301_s21 + $0x8] sm:$0xff] (%p5831_p6), %v321_v1  ;;  %v325_v3 = vld [vmem:[%s306_s15 + $0x18] sm:$0xff] (%p5831_p6)  ;;  %v327_v4 = vld [vmem:[%s306_s15 + $0x80] sm:$0xff] (%p5831_p6) }
  0x34   : > { %324 = vst [vmem:[%s301_s21 + $0x10] sm:$0xff] (%p5831_p6), %v323_v2  ;;  %v329_v5 = vld [vmem:[%s306_s15 + $0x88] sm:$0xff] (%p5831_p6)  ;;  %326 = vst [vmem:[%s301_s21 + $0x18] sm:$0xff] (%p5831_p6), %v325_v3  ;;  %v331_v6 = vld [vmem:[%s306_s15 + $0x90] sm:$0xff] (%p5831_p6) }
  0x35   : > { %328 = vst [vmem:[%s301_s21 + $0x20] sm:$0xff] (%p5831_p6), %v327_v4  ;;  %330 = vst [vmem:[%s301_s21 + $0x28] sm:$0xff] (%p5831_p6), %v329_v5  ;;  %v333_v7 = vld [vmem:[%s306_s15 + $0x98] sm:$0xff] (%p5831_p6) }
  0x36   : > { %332 = vst [vmem:[%s301_s21 + $0x30] sm:$0xff] %v331_v6  ;;  %334 = vst [vmem:[%s301_s21 + $0x38] sm:$0xff] %v333_v7 }
  0x37 PF: > { %p4229_p6 = scmp.ge.s32.totalorder %s5722_s14, 1  ;;  %p339_p12 = scmp.lt.s32.totalorder %s5722_s14, 5 }
  0x39   : > { %p340_p1 = pnand %p4229_p6, %p339_p12 }
  0x3b   : > { %343 = sbr.rel (%p340_p1) target bundleno = 1366 (0x556), region = 51 }
  0x42   : > { %s5893_s18 = sand.u32 1, %s5698_s30  }
  0x43   : > { %s4230_s19 = sshll.u32 %s5893_s18, 9  ;;  %s346_s26 = scalar_lea.sflag [#allocation5], %s5893_s18 }
  0x44   : > { %s5897_s17 = scalar_lea.vmem [#allocation4], %s4230_s19 }
  0x45   : > { %5689 = dma.done.wait (%p5835_p7), %s346_s26, 8192  }
  0x46   : > { %5691 = vsyncadd (%p5835_p7), %s346_s26, 4294959104  ;;  %s4232_s22 = sshll.u32 %s5710_s11, 1  ;;  %v459_v8 = vlaneseq  ;;  %s783_s29 = sld [smem:[#allocation3]] }
  0x47   : > { %s5905_s23 = sadd.s32 %s5706_s10, %s4232_s22  ;;  %p441_p2 = scmp.lt.s32.totalorder %s4232_s22, 3 }
  0x48   : > { %s4244_s24 = sshll.u32 %s5905_s23, 9  ;;  %v5908_v9 = vshrl.u32 %v459_v8, 7  ;;  %v5912_v11 = vand.u32 127, %v459_v8  ;;  %s4231_s19 = sshll.u32 %s5893_s18, 6 }
  0x49   : > { %s8076_s22 = smov (!%p441_p2, %s4232_s22), 3  ;;  %v5910_v10 = vstv %s4244_s24  ;;  %p452_p7 = scmp.lt.s32.totalorder %s5710_s11, 1 }
  0x4a   : > { %v525_v12 = vadd.s32 %v5910_v10, %v5908_v9  ;;  %v476_v13 = vadd.s32 128, %v5908_v9  ;;  %v508_v14 = vadd.s32 384, %v5908_v9  ;;  %v477_v15 = vadd.s32 136, %v5908_v9  ;;  %s4239_s20 = sshll.u32 %s8076_s22, 3  ;;  %p4437_p5 = scmp.ne.s32.totalorder %s5706_s10, 0 }
  0x4b   : > { %v509_v16 = vadd.s32 392, %v5908_v9  ;;  %v492_v17 = vadd.s32 256, %v5908_v9  ;;  %v461_v18 = vadd.s32 8, %v5908_v9  ;;  %v478_v19 = vadd.s32 144, %v5908_v9  ;;  %s5926_s28 = scalar_lea.vmem %s7717_s6, %s4239_s20  ;;  %s5931_s21 = scalar_lea.vmem %s7718_s7, %s4239_s20 }
  0x4c   : > { %v591_v20 = vmul.u32 128, %v525_v12  ;;  %v541_v21 = vadd.s32 %v5910_v10, %v476_v13  ;;  %v573_v22 = vadd.s32 %v5910_v10, %v508_v14  ;;  %v542_v23 = vadd.s32 %v5910_v10, %v477_v15  ;;  %s8078_s11 = smov (!%p452_p7, %s5710_s11), 1  ;;  %s7345_s20 = scalar_lea.vmem [#allocation6], %s4231_s19 }
  0x4d   : > { %v574_v24 = vadd.s32 %v5910_v10, %v509_v16  ;;  %v557_v25 = vadd.s32 %v5910_v10, %v492_v17  ;;  %v526_v26 = vadd.s32 %v5910_v10, %v461_v18  ;;  %v543_v27 = vadd.s32 %v5910_v10, %v478_v19  ;;  %s4242_s26 = sshll.u32 %s8078_s11, 3  ;;  %s4233_s11 = sshll.u32 %s5905_s23, 6 }
  0x4e   : > { %v655_v28 = vadd.s32 %v591_v20, %v5912_v11  ;;  %v607_v29 = vmul.u32 128, %v541_v21  ;;  %v639_v30 = vmul.u32 128, %v573_v22  ;;  %v5941_v31 = vstv %s783_s29  ;;  %s6691_s24 = scalar_lea.vmem %s7719_s8, %s4242_s26  ;;  %p423_p3 = scmp.lt.s32.totalorder %s4233_s11, 255 }
  0x4f   : > { %v608_v32 = vmul.u32 128, %v542_v23  ;;  %v640_v33 = vmul.u32 128, %v574_v24  ;;  %v5944_v34 = vadd.s32 264, %v5908_v9  ;;  %s4236_s26 = sshll.u32 %s5905_s23, 2 }
  0x50   : > { %v719_v35 = vmul.u32 2654435769, %v655_v28  ;;  %v671_v36 = vadd.s32 %v607_v29, %v5912_v11  ;;  %v703_v37 = vadd.s32 %v639_v30, %v5912_v11  ;;  %v623_v38 = vmul.u32 128, %v557_v25  ;;  %s8080_s11 = smov (!%p423_p3, %s4233_s11), 255  ;;  %p433_p4 = scmp.lt.s32.totalorder %s4236_s26, 15 }
  0x51   : > { %v672_v39 = vadd.s32 %v608_v32, %v5912_v11  ;;  %v704_v40 = vadd.s32 %v640_v33, %v5912_v11  ;;  %v592_v41 = vmul.u32 128, %v526_v26  ;;  %v609_v42 = vmul.u32 128, %v543_v27  ;;  %s4234_s29 = sshll.u32 %s8080_s11, 3 }
  0x52   : > { %v785_v43 = vadd.s32 %v5941_v31, %v719_v35  ;;  %v735_v44 = vmul.u32 2654435769, %v671_v36  ;;  %v767_v45 = vmul.u32 2654435769, %v703_v37  ;;  %v687_v46 = vadd.s32 %v623_v38, %v5912_v11  ;;  %s6841_s16 = scalar_lea.vmem %s7715_s4, %s4234_s29  ;;  %s8082_s26 = smov (!%p433_p4, %s4236_s26), 15 }
  0x53   : > { %v736_v47 = vmul.u32 2654435769, %v672_v39  ;;  %v768_v48 = vmul.u32 2654435769, %v704_v40  ;;  %v656_v49 = vadd.s32 %v592_v41, %v5912_v11  ;;  %v673_v50 = vadd.s32 %v609_v42, %v5912_v11 }
  0x54   : > { %v4245_v51 = vshrl.u32 %v785_v43, 16  ;;  %v801_v52 = vadd.s32 %v5941_v31, %v735_v44  ;;  %v833_v53 = vadd.s32 %v5941_v31, %v767_v45  ;;  %v751_v54 = vmul.u32 2654435769, %v687_v46 }
  0x55   : > { %v802_v55 = vadd.s32 %v5941_v31, %v736_v47  ;;  %v834_v56 = vadd.s32 %v5941_v31, %v768_v48  ;;  %v720_v57 = vmul.u32 2654435769, %v656_v49  ;;  %v737_v58 = vmul.u32 2654435769, %v673_v50 }
  0x56   : > { %v977_v59 = vxor.u32 %v4245_v51, %v785_v43  ;;  %v4261_v60 = vshrl.u32 %v801_v52, 16  ;;  %v4293_v61 = vshrl.u32 %v833_v53, 16  ;;  %v817_v62 = vadd.s32 %v5941_v31, %v751_v54 }
  0x57   : > { %v4262_v63 = vshrl.u32 %v802_v55, 16  ;;  %v4294_v0 = vshrl.u32 %v834_v56, 16  ;;  %v786_v1 = vadd.s32 %v5941_v31, %v720_v57  ;;  %v803_v2 = vadd.s32 %v5941_v31, %v737_v58 }
  0x58   : > { %v1041_v3 = vmul.u32 2246822507, %v977_v59  ;;  %v993_v4 = vxor.u32 %v4261_v60, %v801_v52  ;;  %v1025_v5 = vxor.u32 %v4293_v61, %v833_v53  ;;  %v4277_v6 = vshrl.u32 %v817_v62, 16 }
  0x59   : > { %v994_v7 = vxor.u32 %v4262_v63, %v802_v55  ;;  %v1026_v8 = vxor.u32 %v4294_v0, %v834_v56  ;;  %v4246_v12 = vshrl.u32 %v786_v1, 16  ;;  %v4263_v13 = vshrl.u32 %v803_v2, 16 }
  0x5a   : > { %v4309_v14 = vshrl.u32 %v1041_v3, 13  ;;  %v1057_v15 = vmul.u32 2246822507, %v993_v4  ;;  %v1089_v16 = vmul.u32 2246822507, %v1025_v5  ;;  %v1009_v17 = vxor.u32 %v4277_v6, %v817_v62 }
  0x5b   : > { %v1058_v18 = vmul.u32 2246822507, %v994_v7  ;;  %v1090_v19 = vmul.u32 2246822507, %v1026_v8  ;;  %v978_v20 = vxor.u32 %v4246_v12, %v786_v1  ;;  %v995_v21 = vxor.u32 %v4263_v13, %v803_v2 }
  0x5c   : > { %v1233_v22 = vxor.u32 %v4309_v14, %v1041_v3  ;;  %v4325_v23 = vshrl.u32 %v1057_v15, 13  ;;  %v4357_v24 = vshrl.u32 %v1089_v16, 13  ;;  %v1073_v25 = vmul.u32 2246822507, %v1009_v17 }
  0x5d   : > { %v4326_v26 = vshrl.u32 %v1058_v18, 13  ;;  %v4358_v27 = vshrl.u32 %v1090_v19, 13  ;;  %v1042_v28 = vmul.u32 2246822507, %v978_v20  ;;  %v1059_v29 = vmul.u32 2246822507, %v995_v21 }
  0x5e   : > { %v1297_v30 = vmul.u32 3266489909, %v1233_v22  ;;  %v1249_v32 = vxor.u32 %v4325_v23, %v1057_v15  ;;  %v1281_v33 = vxor.u32 %v4357_v24, %v1089_v16  ;;  %v4341_v35 = vshrl.u32 %v1073_v25, 13 }
  0x5f   : > { %v1250_v36 = vxor.u32 %v4326_v26, %v1058_v18  ;;  %v1282_v37 = vxor.u32 %v4358_v27, %v1090_v19  ;;  %v4310_v38 = vshrl.u32 %v1042_v28, 13  ;;  %v4327_v39 = vshrl.u32 %v1059_v29, 13 }
  0x60   : > { %v4373_v40 = vshrl.u32 %v1297_v30, 16  ;;  %v1313_v41 = vmul.u32 3266489909, %v1249_v32  ;;  %v1345_v42 = vmul.u32 3266489909, %v1281_v33  ;;  %v1265_v43 = vxor.u32 %v4341_v35, %v1073_v25 }
  0x61   : > { %v1314_v44 = vmul.u32 3266489909, %v1250_v36  ;;  %v1346_v45 = vmul.u32 3266489909, %v1282_v37  ;;  %v1234_v46 = vxor.u32 %v4310_v38, %v1042_v28  ;;  %v1251_v47 = vxor.u32 %v4327_v39, %v1059_v29 }
  0x62   : > { %v1489_v48 = vxor.u32 %v4373_v40, %v1297_v30  ;;  %v4389_v49 = vshrl.u32 %v1313_v41, 16  ;;  %v4421_v50 = vshrl.u32 %v1345_v42, 16  ;;  %v1329_v51 = vmul.u32 3266489909, %v1265_v43 }
  0x63   : > { %v4390_v52 = vshrl.u32 %v1314_v44, 16  ;;  %v4422_v53 = vshrl.u32 %v1346_v45, 16  ;;  %v1298_v54 = vmul.u32 3266489909, %v1234_v46  ;;  %v1315_v55 = vmul.u32 3266489909, %v1251_v47 }
  0x64   : > { %v1553_v56 = vand.u32 8388607, %v1489_v48  ;;  %v1505_v57 = vxor.u32 %v4389_v49, %v1313_v41  ;;  %v1537_v58 = vxor.u32 %v4421_v50, %v1345_v42  ;;  %v4405_v59 = vshrl.u32 %v1329_v51, 16 }
  0x65   : > { %v1506_v60 = vxor.u32 %v4390_v52, %v1314_v44  ;;  %v1538_v61 = vxor.u32 %v4422_v53, %v1346_v45  ;;  %v4374_v62 = vshrl.u32 %v1298_v54, 16  ;;  %v4391_v63 = vshrl.u32 %v1315_v55, 16 }
  0x66   : > { %v1617_v0 = vcvt.s32.f32 %v1553_v56  ;;  %v1569_v1 = vand.u32 8388607, %v1505_v57  ;;  %v1601_v2 = vand.u32 8388607, %v1537_v58  ;;  %v1521_v3 = vxor.u32 %v4405_v59, %v1329_v51 }
  0x67   : > { %v1570_v4 = vand.u32 8388607, %v1506_v60  ;;  %v1602_v5 = vand.u32 8388607, %v1538_v61  ;;  %v1490_v6 = vxor.u32 %v4374_v62, %v1298_v54  ;;  %v1507_v7 = vxor.u32 %v4391_v63, %v1315_v55 }
  0x68   : > { %v1681_v8 = vmul.f32 1.1920929e-07, %v1617_v0  ;;  %v1633_v12 = vcvt.s32.f32 %v1569_v1  ;;  %v1665_v13 = vcvt.s32.f32 %v1601_v2  ;;  %v1585_v14 = vand.u32 8388607, %v1521_v3 }
  0x69   : > { %v1634_v15 = vcvt.s32.f32 %v1570_v4  ;;  %v1666_v16 = vcvt.s32.f32 %v1602_v5  ;;  %v1554_v17 = vand.u32 8388607, %v1490_v6  ;;  %v1571_v18 = vand.u32 8388607, %v1507_v7 }
  0x6a   : > { %v1745_v19 = vadd.f32 1e-10, %v1681_v8  ;;  %v1697_v20 = vmul.f32 1.1920929e-07, %v1633_v12  ;;  %v1729_v21 = vmul.f32 1.1920929e-07, %v1665_v13  ;;  %v1649_v22 = vcvt.s32.f32 %v1585_v14 }
  0x6b   : > { %v1698_v23 = vmul.f32 1.1920929e-07, %v1634_v15  ;;  %v1730_v24 = vmul.f32 1.1920929e-07, %v1666_v16  ;;  %v1618_v25 = vcvt.s32.f32 %v1554_v17  ;;  %v1635_v26 = vcvt.s32.f32 %v1571_v18 }
  0x6c   : > { %4988 = vlog2.f32 %v1745_v19  ;;  %v1761_v27 = vadd.f32 1e-10, %v1697_v20  ;;  %v1793_v28 = vadd.f32 1e-10, %v1729_v21  ;;  %v1713_v29 = vmul.f32 1.1920929e-07, %v1649_v22 }
  0x6d   : > { %v1762_v30 = vadd.f32 1e-10, %v1698_v23  ;;  %v1794_v32 = vadd.f32 1e-10, %v1730_v24  ;;  %v1682_v33 = vmul.f32 1.1920929e-07, %v1618_v25  ;;  %v1699_v35 = vmul.f32 1.1920929e-07, %v1635_v26 }
  0x6e   : > { %4990 = vlog2.f32 %v1761_v27  ;;  %v1777_v36 = vadd.f32 1e-10, %v1713_v29  ;;  %v558_v37 = vadd.s32 %v5910_v10, %v5944_v34  ;;  %v510_v38 = vadd.s32 400, %v5908_v9 }
  0x6f   : > { %4992 = vlog2.f32 %v1793_v28  ;;  %v1746_v39 = vadd.f32 1e-10, %v1682_v33  ;;  %v1763_v40 = vadd.f32 1e-10, %v1699_v35  ;;  %v479_v41 = vadd.s32 152, %v5908_v9 }
  0x70   : > { %4994 = vlog2.f32 %v1762_v30  ;;  %v624_v42 = vmul.u32 128, %v558_v37  ;;  %v575_v43 = vadd.s32 %v5910_v10, %v510_v38  ;;  %v462_v44 = vadd.s32 16, %v5908_v9 }
  0x71   : > { %4996 = vlog2.f32 %v1794_v32  ;;  %v544_v45 = vadd.s32 %v5910_v10, %v479_v41  ;;  %v511_v46 = vadd.s32 408, %v5908_v9  ;;  %v494_v34 = vadd.s32 272, %v5908_v9 }
  0x72   : > { %4998 = vlog2.f32 %v1777_v36  ;;  %v688_v47 = vadd.s32 %v624_v42, %v5912_v11  ;;  %v641_v48 = vmul.u32 128, %v575_v43  ;;  %v527_v49 = vadd.s32 %v5910_v10, %v462_v44 }
  0x73   : > { %5000 = vlog2.f32 %v1746_v39  ;;  %v610_v50 = vmul.u32 128, %v544_v45  ;;  %v576_v51 = vadd.s32 %v5910_v10, %v511_v46  ;;  %v559_v52 = vadd.s32 %v5910_v10, %v494_v34 }
  0x74   : > { %5002 = vlog2.f32 %v1763_v40  ;;  %v752_v53 = vmul.u32 2654435769, %v688_v47  ;;  %v705_v54 = vadd.s32 %v641_v48, %v5912_v11  ;;  %v593_v55 = vmul.u32 128, %v527_v49 }
  0x75   : > { %v674_v56 = vadd.s32 %v610_v50, %v5912_v11  ;;  %v642_v57 = vmul.u32 128, %v576_v51  ;;  %v625_v58 = vmul.u32 128, %v559_v52  ;;  %v463_v59 = vadd.s32 24, %v5908_v9 }
  0x76   : > { %v4989_v60 = vpop.eup %4988  ;;  %v818_v61 = vadd.s32 %v5941_v31, %v752_v53  ;;  %v769_v62 = vmul.u32 2654435769, %v705_v54  ;;  %v657_v63 = vadd.s32 %v593_v55, %v5912_v11  ;;  %v5980_v0 = vadd.s32 160, %v5908_v9 }
  0x77   : > { %v1810_v1 = vmul.f32 0.6931472, %v4989_v60  ;;  %v738_v2 = vmul.u32 2654435769, %v674_v56  ;;  %v706_v3 = vadd.s32 %v642_v57, %v5912_v11  ;;  %v5984_v4 = vadd.s32 %v625_v58, %v5912_v11 }
  0x78   : > { %v4991_v5 = vpop.eup %4990  ;;  %v4278_v6 = vshrl.u32 %v818_v61, 16  ;;  %v835_v7 = vadd.s32 %v5941_v31, %v769_v62  ;;  %v721_v8 = vmul.u32 2654435769, %v657_v63  ;;  %v5988_v12 = vadd.s32 %v5910_v10, %v463_v59 }
  0x79   : > { %v4993_v13 = vpop.eup %4992  ;;  %v1937_v14 = vsub.f32 1e-10, %v1810_v1  ;;  %v1842_v15 = vmul.f32 0.6931472, %v4991_v5  ;;  %v804_v16 = vadd.s32 %v5941_v31, %v738_v2  ;;  %v770_v17 = vmul.u32 2654435769, %v706_v3 }
  0x7a   : > { %v4995_v18 = vpop.eup %4994  ;;  %v1906_v19 = vmul.f32 0.6931472, %v4993_v13  ;;  %v1010_v20 = vxor.u32 %v4278_v6, %v818_v61  ;;  %v4295_v21 = vshrl.u32 %v835_v7, 16  ;;  %v787_v22 = vadd.s32 %v5941_v31, %v721_v8 }
  0x7b   : > { %v4997_v23 = vpop.eup %4996  ;;  %5004 = vlog2.f32 %v1937_v14  ;;  %v1953_v24 = vsub.f32 1e-10, %v1842_v15  ;;  %v1844_v25 = vmul.f32 0.6931472, %v4995_v18  ;;  %v4264_v26 = vshrl.u32 %v804_v16, 16 }
  0x7c   : > { %v4999_v27 = vpop.eup %4998  ;;  %v1985_v28 = vsub.f32 1e-10, %v1906_v19  ;;  %v1908_v29 = vmul.f32 0.6931472, %v4997_v23  ;;  %v1074_v30 = vmul.u32 2246822507, %v1010_v20  ;;  %v1027_v32 = vxor.u32 %v4295_v21, %v835_v7 }
  0x7d   : > { %v5001_v33 = vpop.eup %5000  ;;  %5006 = vlog2.f32 %v1953_v24  ;;  %v1954_v35 = vsub.f32 1e-10, %v1844_v25  ;;  %v1874_v36 = vmul.f32 0.6931472, %v4999_v27  ;;  %v996_v37 = vxor.u32 %v4264_v26, %v804_v16  ;;  %v2193_v7 = vld [vmem:[%s5897_s17] sm:$0xff] }
  0x7e   : > { %v5003_v38 = vpop.eup %5002  ;;  %5008 = vlog2.f32 %v1985_v28  ;;  %v1986_v39 = vsub.f32 1e-10, %v1908_v29  ;;  %v1812_v40 = vmul.f32 0.6931472, %v5001_v33  ;;  %v4342_v41 = vshrl.u32 %v1074_v30, 13  ;;  %v2209_v20 = vld [vmem:[%s5897_s17 + $0x80] sm:$0xff] }
  0x7f   : > { %5010 = vlog2.f32 %v1954_v35  ;;  %v1969_v42 = vsub.f32 1e-10, %v1874_v36  ;;  %v1846_v43 = vmul.f32 0.6931472, %v5003_v38  ;;  %v1091_v44 = vmul.u32 2246822507, %v1027_v32 }
  0x80   : > { %5012 = vlog2.f32 %v1986_v39  ;;  %v1938_v45 = vsub.f32 1e-10, %v1812_v40  ;;  %v1266_v46 = vxor.u32 %v4342_v41, %v1074_v30  ;;  %v1060_v34 = vmul.u32 2246822507, %v996_v37  ;;  %v2241_v28 = vld [vmem:[%s5897_s17 + $0x180] sm:$0xff]  ;;  %v2210_v35 = vld [vmem:[%s5897_s17 + $0x88] sm:$0xff] }
  0x81   : > { %5014 = vlog2.f32 %v1969_v42  ;;  %v1955_v47 = vsub.f32 1e-10, %v1846_v43  ;;  %v4359_v48 = vshrl.u32 %v1091_v44, 13  ;;  %v4247_v49 = vshrl.u32 %v787_v22, 16  ;;  %v2242_v42 = vld [vmem:[%s5897_s17 + $0x188] sm:$0xff] }
  0x82   : > { %5016 = vlog2.f32 %v1938_v45  ;;  %v1330_v50 = vmul.u32 3266489909, %v1266_v46  ;;  %v4328_v51 = vshrl.u32 %v1060_v34, 13  ;;  %v836_v52 = vadd.s32 %v5941_v31, %v770_v17 }
  0x83   : > { %5018 = vlog2.f32 %v1955_v47  ;;  %v1283_v53 = vxor.u32 %v4359_v48, %v1091_v44  ;;  %v979_v54 = vxor.u32 %v4247_v49, %v787_v22  ;;  %v753_v55 = vmul.u32 2654435769, %v5984_v4  ;;  %v2225_v47 = vld [vmem:[%s5897_s17 + $0x100] sm:$0xff] }
  0x84   : > { %v4406_v56 = vshrl.u32 %v1330_v50, 16  ;;  %v1252_v57 = vxor.u32 %v4328_v51, %v1060_v34  ;;  %v4296_v58 = vshrl.u32 %v836_v52, 16  ;;  %v594_v59 = vmul.u32 128, %v5988_v12 }
  0x85   : > { %v5005_v60 = vpop.eup %5004  ;;  %v1347_v61 = vmul.u32 3266489909, %v1283_v53  ;;  %v1043_v62 = vmul.u32 2246822507, %v979_v54  ;;  %v5996_v63 = vadd.s32 %v5941_v31, %v753_v55  ;;  %v6000_v1 = vadd.s32 %v5910_v10, %v5980_v0 }
  0x86   : > { %v2002_v2 = vmul.f32 0.6931472, %v5005_v60  ;;  %v1522_v3 = vxor.u32 %v4406_v56, %v1330_v50  ;;  %v1316_v5 = vmul.u32 3266489909, %v1252_v57  ;;  %v6002_v4 = vxor.u32 %v4296_v58, %v836_v52  ;;  %v2194_v52 = vld [vmem:[%s5897_s17 + $0x8] sm:$0xff]  ;;  %v2211_v57 = vld [vmem:[%s5897_s17 + $0x90] sm:$0xff] }
  0x87   : > { %v5007_v6 = vpop.eup %5006  ;;  %v4423_v8 = vshrl.u32 %v1347_v61, 16  ;;  %v4311_v12 = vshrl.u32 %v1043_v62, 13  ;;  %v4279_v13 = vshrl.u32 %v5996_v63, 16  ;;  %v6007_v14 = vadd.s32 %v594_v59, %v5912_v11 }
  0x88   : > { %v5009_v15 = vpop.eup %5008  ;;  %v2129_v16 = vsub.f32 0.0, %v2002_v2  ;;  %v2034_v0 = vmul.f32 0.6931472, %v5007_v6  ;;  %v1586_v17 = vand.u32 8388607, %v1522_v3  ;;  %v4392_v18 = vshrl.u32 %v1316_v5, 16 }
  0x89   : > { %v5011_v19 = vpop.eup %5010  ;;  %v2098_v21 = vmul.f32 0.6931472, %v5009_v15  ;;  %v1539_v22 = vxor.u32 %v4423_v8, %v1347_v61  ;;  %v1235_v23 = vxor.u32 %v4311_v12, %v1043_v62  ;;  %v1092_v24 = vmul.u32 2246822507, %v6002_v4 }
  0x8a   : > { %v5013_v25 = vpop.eup %5012  ;;  %v6011_v26 = vadd.f32 %v2193_v7, %v2129_v16  ;;  %v2145_v27 = vsub.f32 0.0, %v2034_v0  ;;  %v2036_v29 = vmul.f32 0.6931472, %v5011_v19  ;;  %v1650_v30 = vcvt.s32.f32 %v1586_v17 }
  0x8b   : > { %v5015_v32 = vpop.eup %5014  ;;  %v2177_v33 = vsub.f32 0.0, %v2098_v21  ;;  %v2100_v36 = vmul.f32 0.6931472, %v5013_v25  ;;  %v1603_v37 = vand.u32 8388607, %v1539_v22  ;;  %v1508_v38 = vxor.u32 %v4392_v18, %v1316_v5 }
  0x8c   : > { %v5017_v39 = vpop.eup %5016  ;;  %2321 = vmax.xlane.f32.xlu0 %v6011_v26  ;;  %v6016_v40 = vadd.f32 %v2209_v20, %v2145_v27  ;;  %v2146_v41 = vsub.f32 0.0, %v2036_v29  ;;  %v2066_v43 = vmul.f32 0.6931472, %v5015_v32  ;;  %v1714_v44 = vmul.f32 1.1920929e-07, %v1650_v30 }
  0x8d   : > { %v5019_v45 = vpop.eup %5018  ;;  %v6019_v46 = vadd.f32 %v2241_v28, %v2177_v33  ;;  %v2178_v34 = vsub.f32 0.0, %v2100_v36  ;;  %v2004_v48 = vmul.f32 0.6931472, %v5017_v39  ;;  %v1667_v49 = vcvt.s32.f32 %v1603_v37 }
  0x8e   : > { %v6022_v50 = vadd.f32 %v2210_v35, %v2146_v41  ;;  %v2161_v51 = vsub.f32 0.0, %v2066_v43  ;;  %v2038_v53 = vmul.f32 0.6931472, %v5019_v45  ;;  %v1778_v54 = vadd.f32 1e-10, %v1714_v44 }
  0x8f   : > { %2417 = vmax.xlane.f32.xlu1 %v6019_v46  ;;  %v6026_v55 = vadd.f32 %v2242_v42, %v2178_v34  ;;  %v2130_v56 = vsub.f32 0.0, %v2004_v48  ;;  %v1731_v58 = vmul.f32 1.1920929e-07, %v1667_v49  ;;  %v1572_v59 = vand.u32 8388607, %v1508_v38 }
  0x90   : > { %2353 = vmax.xlane.f32.xlu0 %v6016_v40  ;;  %v6030_v60 = vadd.f32 %v2225_v47, %v2161_v51  ;;  %v2147_v61 = vsub.f32 0.0, %v2038_v53  ;;  %5020 = vlog2.f32 %v1778_v54  ;;  %v1299_v62 = vmul.u32 3266489909, %v1235_v23 }
  0x91   : > { %v6032_v2 = vadd.f32 %v2194_v52, %v2130_v56  ;;  %v1795_v3 = vadd.f32 1e-10, %v1731_v58  ;;  %v1636_v5 = vcvt.s32.f32 %v1572_v59  ;;  %v4360_v4 = vshrl.u32 %v1092_v24, 13 }
  0x92   : > { %v6034_v6 = vadd.f32 %v2211_v57, %v2147_v61  ;;  %v4375_v7 = vshrl.u32 %v1299_v62, 16  ;;  %v1011_v8 = vxor.u32 %v4279_v13, %v5996_v63  ;;  %v722_v12 = vmul.u32 2654435769, %v6007_v14 }
  0x93   : > { %2419 = vmax.xlane.f32.xlu1 %v6026_v55  ;;  %5022 = vlog2.f32 %v1795_v3  ;;  %v1700_v15 = vmul.f32 1.1920929e-07, %v1636_v5  ;;  %v1284_v16 = vxor.u32 %v4360_v4, %v1092_v24  ;;  %v611_v0 = vmul.u32 128, %v6000_v1 }
  0x94   : > { %2355 = vmax.xlane.f32.xlu0 %v6022_v50  ;;  %v1491_v17 = vxor.u32 %v4375_v7, %v1299_v62  ;;  %v1075_v18 = vmul.u32 2246822507, %v1011_v8  ;;  %v788_v19 = vadd.s32 %v5941_v31, %v722_v12  ;;  %v495_v20 = vadd.s32 280, %v5908_v9 }
  0x95   : > { %v1764_v21 = vadd.f32 1e-10, %v1700_v15  ;;  %v1348_v22 = vmul.u32 3266489909, %v1284_v16  ;;  %v675_v63 = vadd.s32 %v611_v0, %v5912_v11  ;;  %v512_v13 = vadd.s32 416, %v5908_v9 }
  0x96   : > { %v1555_v14 = vand.u32 8388607, %v1491_v17  ;;  %v4343_v23 = vshrl.u32 %v1075_v18, 13  ;;  %v4248_v25 = vshrl.u32 %v788_v19, 16  ;;  %v560_v24 = vadd.s32 %v5910_v10, %v495_v20 }
  0x97   : > { %2323 = vmax.xlane.f32.xlu1 %v6032_v2  ;;  %5024 = vlog2.f32 %v1764_v21  ;;  %v4424_v1 = vshrl.u32 %v1348_v22, 16  ;;  %v739_v27 = vmul.u32 2654435769, %v675_v63  ;;  %v577_v28 = vadd.s32 %v5910_v10, %v512_v13 }
  0x98   : > { %2385 = vmax.xlane.f32.xlu0 %v6030_v60  ;;  %v1619_v29 = vcvt.s32.f32 %v1555_v14  ;;  %v1267_v30 = vxor.u32 %v4343_v23, %v1075_v18  ;;  %v980_v32 = vxor.u32 %v4248_v25, %v788_v19  ;;  %v626_v33 = vmul.u32 128, %v560_v24 }
  0x99   : > { %v1540_v35 = vxor.u32 %v4424_v1, %v1348_v22  ;;  %v805_v36 = vadd.s32 %v5941_v31, %v739_v27  ;;  %v643_v37 = vmul.u32 128, %v577_v28  ;;  %v481_v38 = vadd.s32 168, %v5908_v9 }
  0x9a   : > { %v5021_v39 = vpop.eup %5020  ;;  %v1683_v41 = vmul.f32 1.1920929e-07, %v1619_v29  ;;  %v1331_v42 = vmul.u32 3266489909, %v1267_v30  ;;  %v1044_v43 = vmul.u32 2246822507, %v980_v32  ;;  %v690_v44 = vadd.s32 %v626_v33, %v5912_v11 }
  0x9b   : > { %v1876_v45 = vmul.f32 0.6931472, %v5021_v39  ;;  %v1604_v34 = vand.u32 8388607, %v1540_v35  ;;  %v4265_v47 = vshrl.u32 %v805_v36, 16  ;;  %v707_v48 = vadd.s32 %v643_v37, %v5912_v11 }
  0x9c   : > { %2357 = vmax.xlane.f32.xlu0 %v6034_v6  ;;  %v1747_v49 = vadd.f32 1e-10, %v1683_v41  ;;  %v4407_v51 = vshrl.u32 %v1331_v42, 16  ;;  %v4312_v52 = vshrl.u32 %v1044_v43, 13  ;;  %v754_v53 = vmul.u32 2654435769, %v690_v44 }
  0x9d   : > { %v5023_v54 = vpop.eup %5022  ;;  %v1970_v56 = vsub.f32 1e-10, %v1876_v45  ;;  %v1668_v57 = vcvt.s32.f32 %v1604_v34  ;;  %v997_v58 = vxor.u32 %v4265_v47, %v805_v36  ;;  %v771_v59 = vmul.u32 2654435769, %v707_v48 }
  0x9e   : > { %v1910_v61 = vmul.f32 0.6931472, %v5023_v54  ;;  %5026 = vlog2.f32 %v1747_v49  ;;  %v1523_v62 = vxor.u32 %v4407_v51, %v1331_v42  ;;  %v1236_v3 = vxor.u32 %v4312_v52, %v1044_v43 }
  0x9f   : > { %5028 = vlog2.f32 %v1970_v56  ;;  %v1732_v5 = vmul.f32 1.1920929e-07, %v1668_v57  ;;  %v1061_v4 = vmul.u32 2246822507, %v997_v58  ;;  %v820_v7 = vadd.s32 %v5941_v31, %v754_v53  ;;  %v2226_v53 = vld [vmem:[%s5897_s17 + $0x108] sm:$0xff] }
  0xa0   : > { %v1987_v8 = vsub.f32 1e-10, %v1910_v61  ;;  %v1587_v12 = vand.u32 8388607, %v1523_v62  ;;  %v1300_v15 = vmul.u32 3266489909, %v1236_v3  ;;  %v837_v16 = vadd.s32 %v5941_v31, %v771_v59 }
  0xa1   : > { %v5025_v0 = vpop.eup %5024  ;;  %v1796_v17 = vadd.f32 1e-10, %v1732_v5  ;;  %v4329_v18 = vshrl.u32 %v1061_v4, 13  ;;  %v4280_v19 = vshrl.u32 %v820_v7, 16  ;;  %v546_v20 = vadd.s32 %v5910_v10, %v481_v38 }
  0xa2   : > { %5030 = vlog2.f32 %v1987_v8  ;;  %v1848_v21 = vmul.f32 0.6931472, %v5025_v0  ;;  %v1651_v22 = vcvt.s32.f32 %v1587_v12  ;;  %v4376_v63 = vshrl.u32 %v1300_v15, 16 }
  0xa3   : > { %5032 = vlog2.f32 %v1796_v17  ;;  %v1253_v13 = vxor.u32 %v4329_v18, %v1061_v4  ;;  %v1012_v14 = vxor.u32 %v4280_v19, %v820_v7  ;;  %v4297_v23 = vshrl.u32 %v837_v16, 16  ;;  %v2243_v18 = vld [vmem:[%s5897_s17 + $0x190] sm:$0xff] }
  0xa4   : > { %v1956_v25 = vsub.f32 1e-10, %v1848_v21  ;;  %v1715_v24 = vmul.f32 1.1920929e-07, %v1651_v22  ;;  %v1492_v1 = vxor.u32 %v4376_v63, %v1300_v15  ;;  %v612_v27 = vmul.u32 128, %v546_v20 }
  0xa5   : > { %v1317_v28 = vmul.u32 3266489909, %v1253_v13  ;;  %v1076_v29 = vmul.u32 2246822507, %v1012_v14  ;;  %v1029_v30 = vxor.u32 %v4297_v23, %v837_v16  ;;  %v464_v32 = vadd.s32 32, %v5908_v9 }
  0xa6   : > { %5034 = vlog2.f32 %v1956_v25  ;;  %v1779_v33 = vadd.f32 1e-10, %v1715_v24  ;;  %v1556_v35 = vand.u32 8388607, %v1492_v1  ;;  %v676_v36 = vadd.s32 %v612_v27, %v5912_v11 }
  0xa7   : > { %v4393_v37 = vshrl.u32 %v1317_v28, 16  ;;  %v4344_v38 = vshrl.u32 %v1076_v29, 13  ;;  %v1093_v39 = vmul.u32 2246822507, %v1029_v30  ;;  %v529_v41 = vadd.s32 %v5910_v10, %v464_v32 }
  0xa8   : > { %v5027_v42 = vpop.eup %5026  ;;  %5036 = vlog2.f32 %v1779_v33  ;;  %v1620_v43 = vcvt.s32.f32 %v1556_v35  ;;  %v740_v44 = vmul.u32 2654435769, %v676_v36  ;;  %v513_v45 = vadd.s32 424, %v5908_v9  ;;  %v2212_v33 = vld [vmem:[%s5897_s17 + $0x98] sm:$0xff] }
  0xa9   : > { %v5029_v34 = vpop.eup %5028  ;;  %v1814_v47 = vmul.f32 0.6931472, %v5027_v42  ;;  %v1509_v48 = vxor.u32 %v4393_v37, %v1317_v28  ;;  %v1268_v49 = vxor.u32 %v4344_v38, %v1076_v29  ;;  %v4361_v51 = vshrl.u32 %v1093_v39, 13 }
  0xaa   : > { %v2068_v52 = vmul.f32 0.6931472, %v5029_v34  ;;  %v1684_v54 = vmul.f32 1.1920929e-07, %v1620_v43  ;;  %v806_v56 = vadd.s32 %v5941_v31, %v740_v44  ;;  %v595_v57 = vmul.u32 128, %v529_v41 }
  0xab   : > { %v1939_v58 = vsub.f32 1e-10, %v1814_v47  ;;  %v1573_v59 = vand.u32 8388607, %v1509_v48  ;;  %v1332_v61 = vmul.u32 3266489909, %v1268_v49  ;;  %v1285_v62 = vxor.u32 %v4361_v51, %v1093_v39 }
  0xac   : > { %v5031_v3 = vpop.eup %5030  ;;  %v2162_v5 = vsub.f32 0.0, %v2068_v52  ;;  %v1748_v4 = vadd.f32 1e-10, %v1684_v54  ;;  %v4266_v7 = vshrl.u32 %v806_v56, 16  ;;  %v659_v8 = vadd.s32 %v595_v57, %v5912_v11  ;;  %v2195_v57 = vld [vmem:[%s5897_s17 + $0x10] sm:$0xff] }
  0xad   : > { %v5033_v12 = vpop.eup %5032  ;;  %v2102_v15 = vmul.f32 0.6931472, %v5031_v3  ;;  %5038 = vlog2.f32 %v1939_v58  ;;  %v1637_v16 = vcvt.s32.f32 %v1573_v59  ;;  %v4408_v0 = vshrl.u32 %v1332_v61, 16 }
  0xae   : > { %v6064_v17 = vadd.f32 %v2226_v53, %v2162_v5  ;;  %v1912_v19 = vmul.f32 0.6931472, %v5033_v12  ;;  %5040 = vlog2.f32 %v1748_v4  ;;  %v1349_v20 = vmul.u32 3266489909, %v1285_v62 }
  0xaf   : > { %v2179_v21 = vsub.f32 0.0, %v2102_v15  ;;  %v1701_v22 = vmul.f32 1.1920929e-07, %v1637_v16  ;;  %v1524_v63 = vxor.u32 %v4408_v0, %v1332_v61  ;;  %v998_v13 = vxor.u32 %v4266_v7, %v806_v56 }
  0xb0   : > { %v5035_v14 = vpop.eup %5034  ;;  %2387 = vmax.xlane.f32.xlu1 %v6064_v17  ;;  %v1988_v23 = vsub.f32 1e-10, %v1912_v19  ;;  %v4425_v25 = vshrl.u32 %v1349_v20, 16  ;;  %v723_v24 = vmul.u32 2654435769, %v659_v8  ;;  %v578_v1 = vadd.s32 %v5910_v10, %v513_v45 }
  0xb1   : > { %v6069_v27 = vadd.f32 %v2243_v18, %v2179_v21  ;;  %v2040_v28 = vmul.f32 0.6931472, %v5035_v14  ;;  %v1765_v29 = vadd.f32 1e-10, %v1701_v22  ;;  %v1588_v30 = vand.u32 8388607, %v1524_v63 }
  0xb2   : > { %v5037_v32 = vpop.eup %5036  ;;  %5042 = vlog2.f32 %v1988_v23  ;;  %v1541_v35 = vxor.u32 %v4425_v25, %v1349_v20  ;;  %v1062_v36 = vmul.u32 2246822507, %v998_v13  ;;  %v789_v37 = vadd.s32 %v5941_v31, %v723_v24 }
  0xb3   : > { %2421 = vmax.xlane.f32.xlu0 %v6069_v27  ;;  %v2148_v38 = vsub.f32 0.0, %v2040_v28  ;;  %v1878_v39 = vmul.f32 0.6931472, %v5037_v32  ;;  %5044 = vlog2.f32 %v1765_v29  ;;  %v1652_v41 = vcvt.s32.f32 %v1588_v30  ;;  %v2244_v28 = vld [vmem:[%s5897_s17 + $0x198] sm:$0xff] }
  0xb4   : > { %v1605_v42 = vand.u32 8388607, %v1541_v35  ;;  %v4330_v43 = vshrl.u32 %v1062_v36, 13  ;;  %v4249_v44 = vshrl.u32 %v789_v37, 16  ;;  %v644_v45 = vmul.u32 128, %v578_v1 }
  0xb5   : > { %v6074_v34 = vadd.f32 %v2212_v33, %v2148_v38  ;;  %v1971_v47 = vsub.f32 1e-10, %v1878_v39  ;;  %v1716_v48 = vmul.f32 1.1920929e-07, %v1652_v41  ;;  %v496_v49 = vadd.s32 288, %v5908_v9 }
  0xb6   : > { %v1669_v51 = vcvt.s32.f32 %v1605_v42  ;;  %v1254_v52 = vxor.u32 %v4330_v43, %v1062_v36  ;;  %v981_v53 = vxor.u32 %v4249_v44, %v789_v37  ;;  %v708_v54 = vadd.s32 %v644_v45, %v5912_v11 }
  0xb7   : > { %v5039_v56 = vpop.eup %5038  ;;  %2359 = vmax.xlane.f32.xlu1 %v6074_v34  ;;  %5046 = vlog2.f32 %v1971_v47  ;;  %v1780_v58 = vadd.f32 1e-10, %v1716_v48  ;;  %v561_v59 = vadd.s32 %v5910_v10, %v496_v49  ;;  %v465_v61 = vadd.s32 40, %v5908_v9 }
  0xb8   : > { %v5041_v62 = vpop.eup %5040  ;;  %v2006_v3 = vmul.f32 0.6931472, %v5039_v56  ;;  %v1733_v5 = vmul.f32 1.1920929e-07, %v1669_v51  ;;  %v1318_v4 = vmul.u32 3266489909, %v1254_v52  ;;  %v482_v7 = vadd.s32 176, %v5908_v9 }
  0xb9   : > { %v1816_v8 = vmul.f32 0.6931472, %v5041_v62  ;;  %5048 = vlog2.f32 %v1780_v58  ;;  %v1045_v12 = vmul.u32 2246822507, %v981_v53  ;;  %v772_v15 = vmul.u32 2654435769, %v708_v54 }
  0xba   : > { %v2131_v16 = vsub.f32 0.0, %v2006_v3  ;;  %v1797_v0 = vadd.f32 1e-10, %v1733_v5  ;;  %v4394_v18 = vshrl.u32 %v1318_v4, 16  ;;  %v627_v19 = vmul.u32 128, %v561_v59  ;;  %v2227_v58 = vld [vmem:[%s5897_s17 + $0x110] sm:$0xff] }
  0xbb   : > { %v1940_v20 = vsub.f32 1e-10, %v1816_v8  ;;  %v4313_v21 = vshrl.u32 %v1045_v12, 13  ;;  %v838_v22 = vadd.s32 %v5941_v31, %v772_v15  ;;  %v530_v63 = vadd.s32 %v5910_v10, %v465_v61 }
  0xbc   : > { %v5043_v13 = vpop.eup %5042  ;;  %v6085_v14 = vadd.f32 %v2195_v57, %v2131_v16  ;;  %5050 = vlog2.f32 %v1797_v0  ;;  %v1510_v23 = vxor.u32 %v4394_v18, %v1318_v4  ;;  %v691_v25 = vadd.s32 %v627_v19, %v5912_v11 }
  0xbd   : > { %v5045_v24 = vpop.eup %5044  ;;  %v2104_v1 = vmul.f32 0.6931472, %v5043_v13  ;;  %5052 = vlog2.f32 %v1940_v20  ;;  %v1237_v29 = vxor.u32 %v4313_v21, %v1045_v12  ;;  %v4298_v30 = vshrl.u32 %v838_v22, 16 }
  0xbe   : > { %2325 = vmax.xlane.f32.xlu0 %v6085_v14  ;;  %v1850_v32 = vmul.f32 0.6931472, %v5045_v24  ;;  %v1574_v33 = vand.u32 8388607, %v1510_v23  ;;  %v755_v35 = vmul.u32 2654435769, %v691_v25  ;;  %v547_v36 = vadd.s32 %v5910_v10, %v482_v7 }
  0xbf   : > { %v2180_v37 = vsub.f32 0.0, %v2104_v1  ;;  %v1301_v38 = vmul.u32 3266489909, %v1237_v29  ;;  %v1030_v39 = vxor.u32 %v4298_v30, %v838_v22  ;;  %v596_v41 = vmul.u32 128, %v530_v63  ;;  %v2196_v29 = vld [vmem:[%s5897_s17 + $0x18] sm:$0xff] }
  0xc0   : > { %v1957_v42 = vsub.f32 1e-10, %v1850_v32  ;;  %v1638_v43 = vcvt.s32.f32 %v1574_v33  ;;  %v821_v44 = vadd.s32 %v5941_v31, %v755_v35  ;;  %v613_v45 = vmul.u32 128, %v547_v36 }
  0xc1   : > { %v5047_v47 = vpop.eup %5046  ;;  %v6092_v48 = vadd.f32 %v2244_v28, %v2180_v37  ;;  %v4377_v49 = vshrl.u32 %v1301_v38, 16  ;;  %v1094_v51 = vmul.u32 2246822507, %v1030_v39  ;;  %v660_v52 = vadd.s32 %v596_v41, %v5912_v11 }
  0xc2   : > { %v2070_v53 = vmul.f32 0.6931472, %v5047_v47  ;;  %5054 = vlog2.f32 %v1957_v42  ;;  %v1702_v54 = vmul.f32 1.1920929e-07, %v1638_v43  ;;  %v4281_v56 = vshrl.u32 %v821_v44, 16 }
  0xc3   : > { %v5049_v57 = vpop.eup %5048  ;;  %2423 = vmax.xlane.f32.xlu1 %v6092_v48  ;;  %v1493_v59 = vxor.u32 %v4377_v49, %v1301_v38  ;;  %v4362_v61 = vshrl.u32 %v1094_v51, 13  ;;  %v724_v62 = vmul.u32 2654435769, %v660_v52  ;;  %v677_v3 = vadd.s32 %v613_v45, %v5912_v11 }
  0xc4   : > { %v2163_v5 = vsub.f32 0.0, %v2070_v53  ;;  %v1880_v4 = vmul.f32 0.6931472, %v5049_v57  ;;  %v1766_v7 = vadd.f32 1e-10, %v1702_v54  ;;  %v1013_v8 = vxor.u32 %v4281_v56, %v821_v44  ;;  %v2213_v56 = vld [vmem:[%s5897_s17 + $0xa0] sm:$0xff] }
  0xc5   : > { %v1557_v12 = vand.u32 8388607, %v1493_v59  ;;  %v1286_v15 = vxor.u32 %v4362_v61, %v1094_v51  ;;  %v790_v16 = vadd.s32 %v5941_v31, %v724_v62  ;;  %v741_v0 = vmul.u32 2654435769, %v677_v3 }
  0xc6   : > { %v5051_v18 = vpop.eup %5050  ;;  %v6099_v19 = vadd.f32 %v2227_v58, %v2163_v5  ;;  %v1972_v20 = vsub.f32 1e-10, %v1880_v4  ;;  %5056 = vlog2.f32 %v1766_v7  ;;  %v1077_v21 = vmul.u32 2246822507, %v1013_v8 }
  0xc7   : > { %v5053_v22 = vpop.eup %5052  ;;  %v1914_v63 = vmul.f32 0.6931472, %v5051_v18  ;;  %v1621_v13 = vcvt.s32.f32 %v1557_v12  ;;  %v1350_v23 = vmul.u32 3266489909, %v1286_v15  ;;  %v4250_v25 = vshrl.u32 %v790_v16, 16 }
  0xc8   : > { %2389 = vmax.xlane.f32.xlu0 %v6099_v19  ;;  %v2008_v24 = vmul.f32 0.6931472, %v5053_v22  ;;  %5058 = vlog2.f32 %v1972_v20  ;;  %v4345_v1 = vshrl.u32 %v1077_v21, 13  ;;  %v807_v28 = vadd.s32 %v5941_v31, %v741_v0 }
  0xc9   : > { %v1989_v30 = vsub.f32 1e-10, %v1914_v63  ;;  %v1685_v32 = vmul.f32 1.1920929e-07, %v1621_v13  ;;  %v4426_v33 = vshrl.u32 %v1350_v23, 16  ;;  %v982_v35 = vxor.u32 %v4250_v25, %v790_v16 }
  0xca   : > { %v2132_v36 = vsub.f32 0.0, %v2008_v24  ;;  %v1269_v37 = vxor.u32 %v4345_v1, %v1077_v21  ;;  %v4267_v38 = vshrl.u32 %v807_v28, 16  ;;  %v497_v39 = vadd.s32 296, %v5908_v9 }
  0xcb   : > { %5060 = vlog2.f32 %v1989_v30  ;;  %v1749_v41 = vadd.f32 1e-10, %v1685_v32  ;;  %v1542_v42 = vxor.u32 %v4426_v33, %v1350_v23  ;;  %v1046_v43 = vmul.u32 2246822507, %v982_v35  ;;  %v2228_v30 = vld [vmem:[%s5897_s17 + $0x118] sm:$0xff] }
  0xcc   : > { %v5055_v44 = vpop.eup %5054  ;;  %v6105_v45 = vadd.f32 %v2196_v29, %v2132_v36  ;;  %v1333_v47 = vmul.u32 3266489909, %v1269_v37  ;;  %v999_v49 = vxor.u32 %v4267_v38, %v807_v28  ;;  %v562_v51 = vadd.s32 %v5910_v10, %v497_v39 }
  0xcd   : > { %v2042_v52 = vmul.f32 0.6931472, %v5055_v44  ;;  %5062 = vlog2.f32 %v1749_v41  ;;  %v1606_v53 = vand.u32 8388607, %v1542_v42  ;;  %v4314_v54 = vshrl.u32 %v1046_v43, 13 }
  0xce   : > { %2327 = vmax.xlane.f32.xlu1 %v6105_v45  ;;  %v4409_v57 = vshrl.u32 %v1333_v47, 16  ;;  %v1063_v58 = vmul.u32 2246822507, %v999_v49  ;;  %v628_v59 = vmul.u32 128, %v562_v51  ;;  %v514_v61 = vadd.s32 432, %v5908_v9  ;;  %v2245_v51 = vld [vmem:[%s5897_s17 + $0x1a0] sm:$0xff] }
  0xcf   : > { %v2149_v62 = vsub.f32 0.0, %v2042_v52  ;;  %v1670_v3 = vcvt.s32.f32 %v1606_v53  ;;  %v1238_v5 = vxor.u32 %v4314_v54, %v1046_v43  ;;  %v483_v4 = vadd.s32 184, %v5908_v9 }
  0xd0   : > { %v5057_v7 = vpop.eup %5056  ;;  %v1525_v8 = vxor.u32 %v4409_v57, %v1333_v47  ;;  %v4331_v12 = vshrl.u32 %v1063_v58, 13  ;;  %v692_v15 = vadd.s32 %v628_v59, %v5912_v11  ;;  %v579_v16 = vadd.s32 %v5910_v10, %v514_v61 }
  0xd1   : > { %v6114_v0 = vadd.f32 %v2213_v56, %v2149_v62  ;;  %v1852_v18 = vmul.f32 0.6931472, %v5057_v7  ;;  %v1734_v20 = vmul.f32 1.1920929e-07, %v1670_v3  ;;  %v1302_v21 = vmul.u32 3266489909, %v1238_v5 }
  0xd2   : > { %v5059_v22 = vpop.eup %5058  ;;  %v1589_v63 = vand.u32 8388607, %v1525_v8  ;;  %v1255_v13 = vxor.u32 %v4331_v12, %v1063_v58  ;;  %v756_v23 = vmul.u32 2654435769, %v692_v15  ;;  %v645_v25 = vmul.u32 128, %v579_v16 }
  0xd3   : > { %2361 = vmax.xlane.f32.xlu0 %v6114_v0  ;;  %v2072_v24 = vmul.f32 0.6931472, %v5059_v22  ;;  %v1958_v1 = vsub.f32 1e-10, %v1852_v18  ;;  %v1798_v28 = vadd.f32 1e-10, %v1734_v20  ;;  %v548_v29 = vadd.s32 %v5910_v10, %v483_v4 }
  0xd4   : > { %v1653_v32 = vcvt.s32.f32 %v1589_v63  ;;  %v4378_v33 = vshrl.u32 %v1302_v21, 16  ;;  %v1319_v35 = vmul.u32 3266489909, %v1255_v13  ;;  %v822_v36 = vadd.s32 %v5941_v31, %v756_v23 }
  0xd5   : > { %v5061_v37 = vpop.eup %5060  ;;  %v2164_v38 = vsub.f32 0.0, %v2072_v24  ;;  %5064 = vlog2.f32 %v1958_v1  ;;  %v709_v39 = vadd.s32 %v645_v25, %v5912_v11  ;;  %v614_v41 = vmul.u32 128, %v548_v29 }
  0xd6   : > { %v2106_v42 = vmul.f32 0.6931472, %v5061_v37  ;;  %5066 = vlog2.f32 %v1798_v28  ;;  %v1717_v43 = vmul.f32 1.1920929e-07, %v1653_v32  ;;  %v1494_v44 = vxor.u32 %v4378_v33, %v1302_v21 }
  0xd7   : > { %v5063_v47 = vpop.eup %5062  ;;  %v6121_v49 = vadd.f32 %v2228_v30, %v2164_v38  ;;  %v4395_v52 = vshrl.u32 %v1319_v35, 16  ;;  %v4282_v53 = vshrl.u32 %v822_v36, 16  ;;  %v773_v54 = vmul.u32 2654435769, %v709_v39  ;;  %v2214_v39 = vld [vmem:[%s5897_s17 + $0xa8] sm:$0xff] }
  0xd8   : > { %v2181_v56 = vsub.f32 0.0, %v2106_v42  ;;  %v1818_v57 = vmul.f32 0.6931472, %v5063_v47  ;;  %v1781_v58 = vadd.f32 1e-10, %v1717_v43  ;;  %v678_v59 = vadd.s32 %v614_v41, %v5912_v11 }
  0xd9   : > { %2391 = vmax.xlane.f32.xlu1 %v6121_v49  ;;  %v1558_v61 = vand.u32 8388607, %v1494_v44  ;;  %v1511_v62 = vxor.u32 %v4395_v52, %v1319_v35  ;;  %v1014_v3 = vxor.u32 %v4282_v53, %v822_v36  ;;  %v839_v5 = vadd.s32 %v5941_v31, %v773_v54 }
  0xda   : > { %v6127_v4 = vadd.f32 %v2245_v51, %v2181_v56  ;;  %v1941_v7 = vsub.f32 1e-10, %v1818_v57  ;;  %5068 = vlog2.f32 %v1781_v58  ;;  %v742_v8 = vmul.u32 2654435769, %v678_v59 }
  0xdb   : > { %v1622_v12 = vcvt.s32.f32 %v1558_v61  ;;  %v1575_v15 = vand.u32 8388607, %v1511_v62  ;;  %v1078_v16 = vmul.u32 2246822507, %v1014_v3  ;;  %v4299_v18 = vshrl.u32 %v839_v5, 16 }
  0xdc   : > { %2425 = vmax.xlane.f32.xlu0 %v6127_v4  ;;  %5070 = vlog2.f32 %v1941_v7  ;;  %v808_v20 = vadd.s32 %v5941_v31, %v742_v8  ;;  %v466_v21 = vadd.s32 48, %v5908_v9  ;;  %v515_v22 = vadd.s32 440, %v5908_v9 }
  0xdd   : > { %v1686_v63 = vmul.f32 1.1920929e-07, %v1622_v12  ;;  %v1639_v13 = vcvt.s32.f32 %v1575_v15  ;;  %v4346_v23 = vshrl.u32 %v1078_v16, 13  ;;  %v1031_v25 = vxor.u32 %v4299_v18, %v839_v5 }
  0xde   : > { %v4268_v24 = vshrl.u32 %v808_v20, 16  ;;  %v531_v1 = vadd.s32 %v5910_v10, %v466_v21  ;;  %v580_v28 = vadd.s32 %v5910_v10, %v515_v22  ;;  %v498_v29 = vadd.s32 304, %v5908_v9 }
  0xdf   : > { %v5065_v30 = vpop.eup %5064  ;;  %v1750_v32 = vadd.f32 1e-10, %v1686_v63  ;;  %v1703_v33 = vmul.f32 1.1920929e-07, %v1639_v13  ;;  %v1270_v35 = vxor.u32 %v4346_v23, %v1078_v16  ;;  %v1095_v36 = vmul.u32 2246822507, %v1031_v25 }
  0xe0   : > { %v5067_v37 = vpop.eup %5066  ;;  %v2044_v38 = vmul.f32 0.6931472, %v5065_v30  ;;  %v1000_v41 = vxor.u32 %v4268_v24, %v808_v20  ;;  %v597_v42 = vmul.u32 128, %v531_v1  ;;  %v646_v43 = vmul.u32 128, %v580_v28  ;;  %v2197_v24 = vld [vmem:[%s5897_s17 + $0x20] sm:$0xff] }
  0xe1   : > { %v1916_v44 = vmul.f32 0.6931472, %v5067_v37  ;;  %5072 = vlog2.f32 %v1750_v32  ;;  %v1767_v47 = vadd.f32 1e-10, %v1703_v33  ;;  %v1334_v51 = vmul.u32 3266489909, %v1270_v35 }
  0xe2   : > { %v2150_v52 = vsub.f32 0.0, %v2044_v38  ;;  %v4363_v53 = vshrl.u32 %v1095_v36, 13  ;;  %v1064_v54 = vmul.u32 2246822507, %v1000_v41  ;;  %v661_v56 = vadd.s32 %v597_v42, %v5912_v11 }
  0xe3   : > { %v1990_v57 = vsub.f32 1e-10, %v1916_v44  ;;  %5074 = vlog2.f32 %v1767_v47  ;;  %v4410_v58 = vshrl.u32 %v1334_v51, 16  ;;  %v710_v59 = vadd.s32 %v646_v43, %v5912_v11 }
  0xe4   : > { %v5069_v61 = vpop.eup %5068  ;;  %v6139_v62 = vadd.f32 %v2214_v39, %v2150_v52  ;;  %v1287_v3 = vxor.u32 %v4363_v53, %v1095_v36  ;;  %v4332_v5 = vshrl.u32 %v1064_v54, 13  ;;  %v725_v7 = vmul.u32 2654435769, %v661_v56 }
  0xe5   : > { %5076 = vlog2.f32 %v1990_v57  ;;  %v1882_v8 = vmul.f32 0.6931472, %v5069_v61  ;;  %v1526_v12 = vxor.u32 %v4410_v58, %v1334_v51  ;;  %v774_v15 = vmul.u32 2654435769, %v710_v59 }
  0xe6   : > { %v5071_v16 = vpop.eup %5070  ;;  %2363 = vmax.xlane.f32.xlu1 %v6139_v62  ;;  %v1351_v18 = vmul.u32 3266489909, %v1287_v3  ;;  %v1256_v20 = vxor.u32 %v4332_v5, %v1064_v54  ;;  %v791_v21 = vadd.s32 %v5941_v31, %v725_v7  ;;  %v563_v22 = vadd.s32 %v5910_v10, %v498_v29 }
  0xe7   : > { %v2010_v63 = vmul.f32 0.6931472, %v5071_v16  ;;  %v1973_v13 = vsub.f32 1e-10, %v1882_v8  ;;  %v1590_v23 = vand.u32 8388607, %v1526_v12  ;;  %v840_v25 = vadd.s32 %v5941_v31, %v774_v15 }
  0xe8   : > { %v4427_v1 = vshrl.u32 %v1351_v18, 16  ;;  %v1320_v28 = vmul.u32 3266489909, %v1256_v20  ;;  %v4251_v30 = vshrl.u32 %v791_v21, 16  ;;  %v629_v32 = vmul.u32 128, %v563_v22 }
  0xe9   : > { %v2133_v33 = vsub.f32 0.0, %v2010_v63  ;;  %5078 = vlog2.f32 %v1973_v13  ;;  %v1654_v35 = vcvt.s32.f32 %v1590_v23  ;;  %v4300_v36 = vshrl.u32 %v840_v25, 16  ;;  %v2246_v63 = vld [vmem:[%s5897_s17 + $0x1a8] sm:$0xff] }
  0xea   : > { %v1543_v37 = vxor.u32 %v4427_v1, %v1351_v18  ;;  %v4396_v38 = vshrl.u32 %v1320_v28, 16  ;;  %v983_v39 = vxor.u32 %v4251_v30, %v791_v21  ;;  %v693_v41 = vadd.s32 %v629_v32, %v5912_v11 }
  0xeb   : > { %v5073_v29 = vpop.eup %5072  ;;  %v6147_v42 = vadd.f32 %v2197_v24, %v2133_v33  ;;  %v1718_v43 = vmul.f32 1.1920929e-07, %v1654_v35  ;;  %v1032_v44 = vxor.u32 %v4300_v36, %v840_v25  ;;  %v467_v47 = vadd.s32 56, %v5908_v9 }
  0xec   : > { %v1820_v51 = vmul.f32 0.6931472, %v5073_v29  ;;  %v1607_v52 = vand.u32 8388607, %v1543_v37  ;;  %v1512_v53 = vxor.u32 %v4396_v38, %v1320_v28  ;;  %v1047_v54 = vmul.u32 2246822507, %v983_v39 }
  0xed   : > { %v5075_v56 = vpop.eup %5074  ;;  %2329 = vmax.xlane.f32.xlu0 %v6147_v42  ;;  %v1782_v57 = vadd.f32 1e-10, %v1718_v43  ;;  %v1096_v58 = vmul.u32 2246822507, %v1032_v44  ;;  %v757_v59 = vmul.u32 2654435769, %v693_v41  ;;  %v532_v61 = vadd.s32 %v5910_v10, %v467_v47 }
  0xee   : > { %v1942_v3 = vsub.f32 1e-10, %v1820_v51  ;;  %v1854_v5 = vmul.f32 0.6931472, %v5075_v56  ;;  %v1671_v7 = vcvt.s32.f32 %v1607_v52  ;;  %v1576_v8 = vand.u32 8388607, %v1512_v53 }
  0xef   : > { %v5077_v12 = vpop.eup %5076  ;;  %5080 = vlog2.f32 %v1782_v57  ;;  %v4315_v15 = vshrl.u32 %v1047_v54, 13  ;;  %v4364_v16 = vshrl.u32 %v1096_v58, 13  ;;  %v823_v18 = vadd.s32 %v5941_v31, %v757_v59  ;;  %v2229_v41 = vld [vmem:[%s5897_s17 + $0x120] sm:$0xff] }
  0xf0   : > { %v2108_v20 = vmul.f32 0.6931472, %v5077_v12  ;;  %5082 = vlog2.f32 %v1942_v3  ;;  %v1959_v21 = vsub.f32 1e-10, %v1854_v5  ;;  %v1735_v22 = vmul.f32 1.1920929e-07, %v1671_v7 }
  0xf1   : > { %v1640_v13 = vcvt.s32.f32 %v1576_v8  ;;  %v1239_v23 = vxor.u32 %v4315_v15, %v1047_v54  ;;  %v1288_v25 = vxor.u32 %v4364_v16, %v1096_v58  ;;  %v4283_v24 = vshrl.u32 %v823_v18, 16 }
  0xf2   : > { %v2182_v1 = vsub.f32 0.0, %v2108_v20  ;;  %5084 = vlog2.f32 %v1959_v21  ;;  %v1799_v28 = vadd.f32 1e-10, %v1735_v22  ;;  %v598_v30 = vmul.u32 128, %v532_v61 }
  0xf3   : > { %v5079_v32 = vpop.eup %5078  ;;  %v1704_v33 = vmul.f32 1.1920929e-07, %v1640_v13  ;;  %v1303_v35 = vmul.u32 3266489909, %v1239_v23  ;;  %v1352_v36 = vmul.u32 3266489909, %v1288_v25  ;;  %v1015_v37 = vxor.u32 %v4283_v24, %v823_v18 }
  0xf4   : > { %v6154_v38 = vadd.f32 %v2246_v63, %v2182_v1  ;;  %v2074_v39 = vmul.f32 0.6931472, %v5079_v32  ;;  %5086 = vlog2.f32 %v1799_v28  ;;  %v662_v29 = vadd.s32 %v598_v30, %v5912_v11  ;;  %v2198_v30 = vld [vmem:[%s5897_s17 + $0x28] sm:$0xff] }
  0xf5   : > { %v1768_v43 = vadd.f32 1e-10, %v1704_v33  ;;  %v4379_v44 = vshrl.u32 %v1303_v35, 16  ;;  %v4428_v47 = vshrl.u32 %v1352_v36, 16  ;;  %v1079_v51 = vmul.u32 2246822507, %v1015_v37 }
  0xf6   : > { %2427 = vmax.xlane.f32.xlu1 %v6154_v38  ;;  %v2165_v52 = vsub.f32 0.0, %v2074_v39  ;;  %v726_v53 = vmul.u32 2654435769, %v662_v29  ;;  %v484_v54 = vadd.s32 192, %v5908_v9  ;;  %v499_v56 = vadd.s32 312, %v5908_v9 }
  0xf7   : > { %5088 = vlog2.f32 %v1768_v43  ;;  %v1495_v57 = vxor.u32 %v4379_v44, %v1303_v35  ;;  %v1544_v58 = vxor.u32 %v4428_v47, %v1352_v36  ;;  %v4347_v59 = vshrl.u32 %v1079_v51, 13  ;;  %v2215_v44 = vld [vmem:[%s5897_s17 + $0xb0] sm:$0xff] }
  0xf8   : > { %v6161_v61 = vadd.f32 %v2229_v41, %v2165_v52  ;;  %v792_v3 = vadd.s32 %v5941_v31, %v726_v53  ;;  %v549_v5 = vadd.s32 %v5910_v10, %v484_v54  ;;  %v564_v7 = vadd.s32 %v5910_v10, %v499_v56 }
  0xf9   : > { %v5081_v8 = vpop.eup %5080  ;;  %v1559_v12 = vand.u32 8388607, %v1495_v57  ;;  %v1608_v15 = vand.u32 8388607, %v1544_v58  ;;  %v1271_v16 = vxor.u32 %v4347_v59, %v1079_v51  ;;  %v516_v18 = vadd.s32 448, %v5908_v9 }
  0xfa   : > { %v5083_v20 = vpop.eup %5082  ;;  %2393 = vmax.xlane.f32.xlu0 %v6161_v61  ;;  %v1884_v21 = vmul.f32 0.6931472, %v5081_v8  ;;  %v4252_v22 = vshrl.u32 %v792_v3, 16  ;;  %v615_v63 = vmul.u32 128, %v549_v5  ;;  %v630_v13 = vmul.u32 128, %v564_v7 }
  0xfb   : > { %v2012_v23 = vmul.f32 0.6931472, %v5083_v20  ;;  %v1623_v25 = vcvt.s32.f32 %v1559_v12  ;;  %v1672_v24 = vcvt.s32.f32 %v1608_v15  ;;  %v1335_v1 = vmul.u32 3266489909, %v1271_v16 }
  0xfc   : > { %v5085_v28 = vpop.eup %5084  ;;  %v1974_v32 = vsub.f32 1e-10, %v1884_v21  ;;  %v984_v33 = vxor.u32 %v4252_v22, %v792_v3  ;;  %v679_v35 = vadd.s32 %v615_v63, %v5912_v11  ;;  %v694_v36 = vadd.s32 %v630_v13, %v5912_v11 }
  0xfd   : > { %v2134_v37 = vsub.f32 0.0, %v2012_v23  ;;  %v2046_v39 = vmul.f32 0.6931472, %v5085_v28  ;;  %v1687_v41 = vmul.f32 1.1920929e-07, %v1623_v25  ;;  %v1736_v29 = vmul.f32 1.1920929e-07, %v1672_v24 }
  0xfe   : > { %v5087_v43 = vpop.eup %5086  ;;  %5090 = vlog2.f32 %v1974_v32  ;;  %v4411_v47 = vshrl.u32 %v1335_v1, 16  ;;  %v1048_v51 = vmul.u32 2246822507, %v984_v33  ;;  %v743_v52 = vmul.u32 2654435769, %v679_v35 }
  0xff   : > { %v6172_v53 = vadd.f32 %v2198_v30, %v2134_v37  ;;  %v2151_v54 = vsub.f32 0.0, %v2046_v39  ;;  %v1918_v56 = vmul.f32 0.6931472, %v5087_v43  ;;  %v1751_v57 = vadd.f32 1e-10, %v1687_v41 }
 0x100   : > { %v1800_v58 = vadd.f32 1e-10, %v1736_v29  ;;  %v1527_v59 = vxor.u32 %v4411_v47, %v1335_v1  ;;  %v4316_v3 = vshrl.u32 %v1048_v51, 13  ;;  %v809_v5 = vadd.s32 %v5941_v31, %v743_v52 }
 0x101   : > { %v5089_v7 = vpop.eup %5088  ;;  %2331 = vmax.xlane.f32.xlu1 %v6172_v53  ;;  %v6176_v8 = vadd.f32 %v2215_v44, %v2151_v54  ;;  %v1991_v12 = vsub.f32 1e-10, %v1918_v56  ;;  %5092 = vlog2.f32 %v1751_v57  ;;  %v758_v15 = vmul.u32 2654435769, %v694_v36 }
 0x102   : > { %v1856_v16 = vmul.f32 0.6931472, %v5089_v7  ;;  %5094 = vlog2.f32 %v1800_v58  ;;  %v1591_v20 = vand.u32 8388607, %v1527_v59  ;;  %v1240_v21 = vxor.u32 %v4316_v3, %v1048_v51  ;;  %v2230_v59 = vld [vmem:[%s5897_s17 + $0x128] sm:$0xff] }
 0x103   : > { %2365 = vmax.xlane.f32.xlu0 %v6176_v8  ;;  %5096 = vlog2.f32 %v1991_v12  ;;  %v4269_v22 = vshrl.u32 %v809_v5, 16  ;;  %v824_v63 = vadd.s32 %v5941_v31, %v758_v15  ;;  %v581_v13 = vadd.s32 %v5910_v10, %v516_v18 }
 0x104   : > { %v1960_v23 = vsub.f32 1e-10, %v1856_v16  ;;  %v1655_v25 = vcvt.s32.f32 %v1591_v20  ;;  %v1304_v24 = vmul.u32 3266489909, %v1240_v21  ;;  %v485_v1 = vadd.s32 200, %v5908_v9 }
 0x105   : > { %v1001_v28 = vxor.u32 %v4269_v22, %v809_v5  ;;  %v4284_v30 = vshrl.u32 %v824_v63, 16  ;;  %v647_v32 = vmul.u32 128, %v581_v13  ;;  %v468_v33 = vadd.s32 64, %v5908_v9 }
 0x106   : > { %5098 = vlog2.f32 %v1960_v23  ;;  %v1719_v35 = vmul.f32 1.1920929e-07, %v1655_v25  ;;  %v4380_v36 = vshrl.u32 %v1304_v24, 16  ;;  %v550_v37 = vadd.s32 %v5910_v10, %v485_v1 }
 0x107   : > { %v1065_v39 = vmul.u32 2246822507, %v1001_v28  ;;  %v1016_v41 = vxor.u32 %v4284_v30, %v824_v63  ;;  %v711_v18 = vadd.s32 %v647_v32, %v5912_v11  ;;  %v533_v29 = vadd.s32 %v5910_v10, %v468_v33 }
 0x108   : > { %v5091_v43 = vpop.eup %5090  ;;  %v1783_v44 = vadd.f32 1e-10, %v1719_v35  ;;  %v1496_v47 = vxor.u32 %v4380_v36, %v1304_v24  ;;  %v616_v51 = vmul.u32 128, %v550_v37  ;;  %v517_v52 = vadd.s32 456, %v5908_v9 }
 0x109   : > { %v2076_v54 = vmul.f32 0.6931472, %v5091_v43  ;;  %v4333_v56 = vshrl.u32 %v1065_v39, 13  ;;  %v1080_v57 = vmul.u32 2246822507, %v1016_v41  ;;  %v599_v58 = vmul.u32 128, %v533_v29 }
 0x10a   : > { %5100 = vlog2.f32 %v1783_v44  ;;  %v1560_v3 = vand.u32 8388607, %v1496_v47  ;;  %v775_v5 = vmul.u32 2654435769, %v711_v18  ;;  %v680_v7 = vadd.s32 %v616_v51, %v5912_v11 }
 0x10b   : > { %v5093_v12 = vpop.eup %5092  ;;  %v2166_v15 = vsub.f32 0.0, %v2076_v54  ;;  %v1257_v16 = vxor.u32 %v4333_v56, %v1065_v39  ;;  %v4348_v20 = vshrl.u32 %v1080_v57, 13  ;;  %v663_v21 = vadd.s32 %v599_v58, %v5912_v11  ;;  %v2247_v39 = vld [vmem:[%s5897_s17 + $0x1b0] sm:$0xff] }
 0x10c   : > { %v5095_v22 = vpop.eup %5094  ;;  %v1822_v63 = vmul.f32 0.6931472, %v5093_v12  ;;  %v1624_v13 = vcvt.s32.f32 %v1560_v3  ;;  %v841_v23 = vadd.s32 %v5941_v31, %v775_v5  ;;  %v744_v25 = vmul.u32 2654435769, %v680_v7  ;;  %v2216_v3 = vld [vmem:[%s5897_s17 + $0xb8] sm:$0xff] }
 0x10d   : > { %v5097_v24 = vpop.eup %5096  ;;  %v6191_v1 = vadd.f32 %v2230_v59, %v2166_v15  ;;  %v1920_v28 = vmul.f32 0.6931472, %v5095_v22  ;;  %v1321_v30 = vmul.u32 3266489909, %v1257_v16  ;;  %v1272_v32 = vxor.u32 %v4348_v20, %v1080_v57 }
 0x10e   : > { %v2110_v33 = vmul.f32 0.6931472, %v5097_v24  ;;  %v1943_v35 = vsub.f32 1e-10, %v1822_v63  ;;  %v1688_v36 = vmul.f32 1.1920929e-07, %v1624_v13  ;;  %v4301_v37 = vshrl.u32 %v841_v23, 16 }
 0x10f   : > { %2395 = vmax.xlane.f32.xlu1 %v6191_v1  ;;  %v1992_v41 = vsub.f32 1e-10, %v1920_v28  ;;  %v4397_v18 = vshrl.u32 %v1321_v30, 16  ;;  %v1336_v29 = vmul.u32 3266489909, %v1272_v32  ;;  %v810_v43 = vadd.s32 %v5941_v31, %v744_v25 }
 0x110   : > { %v5099_v44 = vpop.eup %5098  ;;  %v2183_v47 = vsub.f32 0.0, %v2110_v33  ;;  %5102 = vlog2.f32 %v1943_v35  ;;  %v1752_v51 = vadd.f32 1e-10, %v1688_v36  ;;  %v1033_v54 = vxor.u32 %v4301_v37, %v841_v23 }
 0x111   : > { %v2048_v56 = vmul.f32 0.6931472, %v5099_v44  ;;  %5104 = vlog2.f32 %v1992_v41  ;;  %v1513_v57 = vxor.u32 %v4397_v18, %v1321_v30  ;;  %v4412_v58 = vshrl.u32 %v1336_v29, 16 }
 0x112   : > { %v6196_v59 = vadd.f32 %v2247_v39, %v2183_v47  ;;  %5106 = vlog2.f32 %v1752_v51  ;;  %v1097_v5 = vmul.u32 2246822507, %v1033_v54  ;;  %v4270_v7 = vshrl.u32 %v810_v43, 16 }
 0x113   : > { %v2152_v12 = vsub.f32 0.0, %v2048_v56  ;;  %v1577_v15 = vand.u32 8388607, %v1513_v57  ;;  %v1528_v16 = vxor.u32 %v4412_v58, %v1336_v29  ;;  %v727_v20 = vmul.u32 2654435769, %v663_v21 }
 0x114   : > { %v5101_v22 = vpop.eup %5100  ;;  %2429 = vmax.xlane.f32.xlu0 %v6196_v59  ;;  %v4365_v63 = vshrl.u32 %v1097_v5, 13  ;;  %v1002_v13 = vxor.u32 %v4270_v7, %v810_v43  ;;  %v582_v23 = vadd.s32 %v5910_v10, %v517_v52  ;;  %v500_v25 = vadd.s32 320, %v5908_v9 }
 0x115   : > { %v6202_v24 = vadd.f32 %v2216_v3, %v2152_v12  ;;  %v1886_v28 = vmul.f32 0.6931472, %v5101_v22  ;;  %v1641_v30 = vcvt.s32.f32 %v1577_v15  ;;  %v1592_v32 = vand.u32 8388607, %v1528_v16  ;;  %v2199_v15 = vld [vmem:[%s5897_s17 + $0x30] sm:$0xff] }
 0x116   : > { %v1289_v33 = vxor.u32 %v4365_v63, %v1097_v5  ;;  %v1066_v35 = vmul.u32 2246822507, %v1002_v13  ;;  %v793_v36 = vadd.s32 %v5941_v31, %v727_v20  ;;  %v648_v37 = vmul.u32 128, %v582_v23 }
 0x117   : > { %2367 = vmax.xlane.f32.xlu1 %v6202_v24  ;;  %v1975_v21 = vsub.f32 1e-10, %v1886_v28  ;;  %v1705_v39 = vmul.f32 1.1920929e-07, %v1641_v30  ;;  %v1656_v41 = vcvt.s32.f32 %v1592_v32  ;;  %v565_v18 = vadd.s32 %v5910_v10, %v500_v25  ;;  %v2248_v30 = vld [vmem:[%s5897_s17 + $0x1b8] sm:$0xff] }
 0x118   : > { %v1353_v52 = vmul.u32 3266489909, %v1289_v33  ;;  %v4334_v29 = vshrl.u32 %v1066_v35, 13  ;;  %v4253_v43 = vshrl.u32 %v793_v36, 16  ;;  %v712_v44 = vadd.s32 %v648_v37, %v5912_v11 }
 0x119   : > { %5108 = vlog2.f32 %v1975_v21  ;;  %v1769_v47 = vadd.f32 1e-10, %v1705_v39  ;;  %v1720_v51 = vmul.f32 1.1920929e-07, %v1656_v41  ;;  %v631_v54 = vmul.u32 128, %v565_v18 }
 0x11a   : > { %v5103_v56 = vpop.eup %5102  ;;  %v4429_v57 = vshrl.u32 %v1353_v52, 16  ;;  %v1258_v58 = vxor.u32 %v4334_v29, %v1066_v35  ;;  %v985_v3 = vxor.u32 %v4253_v43, %v793_v36  ;;  %v776_v5 = vmul.u32 2654435769, %v712_v44 }
 0x11b   : > { %v5105_v7 = vpop.eup %5104  ;;  %v2014_v12 = vmul.f32 0.6931472, %v5103_v56  ;;  %5110 = vlog2.f32 %v1769_v47  ;;  %v1784_v16 = vadd.f32 1e-10, %v1720_v51  ;;  %v695_v20 = vadd.s32 %v631_v54, %v5912_v11 }
 0x11c   : > { %v5107_v22 = vpop.eup %5106  ;;  %v2112_v63 = vmul.f32 0.6931472, %v5105_v7  ;;  %v1545_v13 = vxor.u32 %v4429_v57, %v1353_v52  ;;  %v1322_v23 = vmul.u32 3266489909, %v1258_v58  ;;  %v1049_v25 = vmul.u32 2246822507, %v985_v3 }
 0x11d   : > { %v2135_v28 = vsub.f32 0.0, %v2014_v12  ;;  %v1824_v32 = vmul.f32 0.6931472, %v5107_v22  ;;  %5112 = vlog2.f32 %v1784_v16  ;;  %v842_v33 = vadd.s32 %v5941_v31, %v776_v5 }
 0x11e   : > { %v2184_v35 = vsub.f32 0.0, %v2112_v63  ;;  %v1609_v36 = vand.u32 8388607, %v1545_v13  ;;  %v4398_v37 = vshrl.u32 %v1322_v23, 16  ;;  %v4317_v21 = vshrl.u32 %v1049_v25, 13 }
 0x11f   : > { %v6212_v39 = vadd.f32 %v2199_v15, %v2135_v28  ;;  %v1944_v41 = vsub.f32 1e-10, %v1824_v32  ;;  %v4302_v18 = vshrl.u32 %v842_v33, 16  ;;  %v759_v29 = vmul.u32 2654435769, %v695_v20  ;;  %v2231_v28 = vld [vmem:[%s5897_s17 + $0x130] sm:$0xff] }
 0x120   : > { %v6214_v43 = vadd.f32 %v2248_v30, %v2184_v35  ;;  %v1673_v52 = vcvt.s32.f32 %v1609_v36  ;;  %v1514_v44 = vxor.u32 %v4398_v37, %v1322_v23  ;;  %v1241_v47 = vxor.u32 %v4317_v21, %v1049_v25 }
 0x121   : > { %2333 = vmax.xlane.f32.xlu0 %v6212_v39  ;;  %5114 = vlog2.f32 %v1944_v41  ;;  %v1034_v51 = vxor.u32 %v4302_v18, %v842_v33  ;;  %v825_v54 = vadd.s32 %v5941_v31, %v759_v29  ;;  %v469_v56 = vadd.s32 72, %v5908_v9 }
 0x122   : > { %7858 = vst [vmem:[#allocation10_spill] sm:$0xff] %v6214_v43  ;;  %2431 = vmax.xlane.f32.xlu1 %v6214_v43  ;;  %v1737_v57 = vmul.f32 1.1920929e-07, %v1673_v52  ;;  %v1578_v58 = vand.u32 8388607, %v1514_v44  ;;  %v1305_v3 = vmul.u32 3266489909, %v1241_v47 }
 0x123   : > { %v486_v5 = vadd.s32 208, %v5908_v9  ;;  %v5109_v7 = vpop.eup %5108  ;;  %v1098_v12 = vmul.u32 2246822507, %v1034_v51  ;;  %v4285_v15 = vshrl.u32 %v825_v54, 16  ;;  %v534_v16 = vadd.s32 %v5910_v10, %v469_v56 }
 0x124   : > { %v501_v20 = vadd.s32 328, %v5908_v9  ;;  %v2078_v22 = vmul.f32 0.6931472, %v5109_v7  ;;  %v1801_v63 = vadd.f32 1e-10, %v1737_v57  ;;  %v1642_v13 = vcvt.s32.f32 %v1578_v58 }
 0x125   : > { %v4381_v23 = vshrl.u32 %v1305_v3, 16  ;;  %v5111_v25 = vpop.eup %5110  ;;  %v4366_v30 = vshrl.u32 %v1098_v12, 13  ;;  %v1017_v32 = vxor.u32 %v4285_v15, %v825_v54  ;;  %v600_v33 = vmul.u32 128, %v534_v16 }
 0x126   : > { %v551_v35 = vadd.s32 %v5910_v10, %v486_v5  ;;  %v2167_v36 = vsub.f32 0.0, %v2078_v22  ;;  %v1858_v37 = vmul.f32 0.6931472, %v5111_v25  ;;  %5116 = vlog2.f32 %v1801_v63 }
 0x127   : > { %v1706_v21 = vmul.f32 1.1920929e-07, %v1642_v13  ;;  %v5113_v41 = vpop.eup %5112  ;;  %v1497_v18 = vxor.u32 %v4381_v23, %v1305_v3  ;;  %v1290_v29 = vxor.u32 %v4366_v30, %v1098_v12  ;;  %v1081_v52 = vmul.u32 2246822507, %v1017_v32  ;;  %v2200_v30 = vld [vmem:[%s5897_s17 + $0x38] sm:$0xff] }
 0x128   : > { %v664_v44 = vadd.s32 %v600_v33, %v5912_v11  ;;  %v6226_v47 = vadd.f32 %v2231_v28, %v2167_v36  ;;  %v1961_v51 = vsub.f32 1e-10, %v1858_v37  ;;  %v1888_v56 = vmul.f32 0.6931472, %v5113_v41 }
 0x129   : > { %v1770_v57 = vadd.f32 1e-10, %v1706_v21  ;;  %v1561_v58 = vand.u32 8388607, %v1497_v18  ;;  %v1354_v54 = vmul.u32 3266489909, %v1290_v29  ;;  %v566_v3 = vadd.s32 %v5910_v10, %v501_v20 }
 0x12a   : > { %v4349_v7 = vshrl.u32 %v1081_v52, 13  ;;  %v617_v5 = vmul.u32 128, %v551_v35  ;;  %2397 = vmax.xlane.f32.xlu0 %v6226_v47  ;;  %5118 = vlog2.f32 %v1961_v51  ;;  %v1976_v15 = vsub.f32 1e-10, %v1888_v56 }
 0x12b   : > { %v728_v16 = vmul.u32 2654435769, %v664_v44  ;;  %v5115_v12 = vpop.eup %5114  ;;  %5120 = vlog2.f32 %v1770_v57  ;;  %v1625_v22 = vcvt.s32.f32 %v1561_v58  ;;  %v4430_v63 = vshrl.u32 %v1354_v54, 16 }
 0x12c   : > { %v1273_v13 = vxor.u32 %v4349_v7, %v1081_v52  ;;  %v2016_v23 = vmul.f32 0.6931472, %v5115_v12  ;;  %5122 = vlog2.f32 %v1976_v15  ;;  %v681_v28 = vadd.s32 %v617_v5, %v5912_v11 }
 0x12d   : > { %v794_v25 = vadd.s32 %v5941_v31, %v728_v16  ;;  %v1689_v32 = vmul.f32 1.1920929e-07, %v1625_v22  ;;  %v1546_v33 = vxor.u32 %v4430_v63, %v1354_v54  ;;  %v632_v36 = vmul.u32 128, %v566_v3 }
 0x12e   : > { %v1337_v35 = vmul.u32 3266489909, %v1273_v13  ;;  %v2136_v37 = vsub.f32 0.0, %v2016_v23  ;;  %v745_v41 = vmul.u32 2654435769, %v681_v28  ;;  %v518_v20 = vadd.s32 464, %v5908_v9 }
 0x12f   : > { %v4254_v21 = vshrl.u32 %v794_v25, 16  ;;  %v1753_v18 = vadd.f32 1e-10, %v1689_v32  ;;  %v1610_v29 = vand.u32 8388607, %v1546_v33  ;;  %v696_v52 = vadd.s32 %v632_v36, %v5912_v11 }
 0x130   : > { %v4413_v44 = vshrl.u32 %v1337_v35, 16  ;;  %v5117_v51 = vpop.eup %5116  ;;  %v6235_v56 = vadd.f32 %v2200_v30, %v2136_v37  ;;  %v811_v58 = vadd.s32 %v5941_v31, %v745_v41  ;;  %v583_v54 = vadd.s32 %v5910_v10, %v518_v20 }
 0x131   : > { %v986_v57 = vxor.u32 %v4254_v21, %v794_v25  ;;  %v1922_v7 = vmul.f32 0.6931472, %v5117_v51  ;;  %5124 = vlog2.f32 %v1753_v18  ;;  %v1674_v5 = vcvt.s32.f32 %v1610_v29  ;;  %v2217_v18 = vld [vmem:[%s5897_s17 + $0xc0] sm:$0xff] }
 0x132   : > { %7859 = vst [vmem:[#allocation11_spill] sm:$0xff] %v6235_v56  ;;  %v1529_v15 = vxor.u32 %v4413_v44, %v1337_v35  ;;  %2335 = vmax.xlane.f32.xlu1 %v6235_v56  ;;  %v4271_v3 = vshrl.u32 %v811_v58, 16  ;;  %v760_v12 = vmul.u32 2654435769, %v696_v52  ;;  %v487_v22 = vadd.s32 216, %v5908_v9 }
 0x133   : > { %v1050_v16 = vmul.u32 2246822507, %v986_v57  ;;  %v1993_v63 = vsub.f32 1e-10, %v1922_v7  ;;  %v1738_v13 = vmul.f32 1.1920929e-07, %v1674_v5  ;;  %v649_v25 = vmul.u32 128, %v583_v54 }
 0x134   : > { %v1593_v23 = vand.u32 8388607, %v1529_v15  ;;  %v5119_v28 = vpop.eup %5118  ;;  %v1003_v32 = vxor.u32 %v4271_v3, %v811_v58  ;;  %v826_v33 = vadd.s32 %v5941_v31, %v760_v12  ;;  %v552_v36 = vadd.s32 %v5910_v10, %v487_v22  ;;  %v2232_v7 = vld [vmem:[%s5897_s17 + $0x138] sm:$0xff] }
 0x135   : > { %v4318_v30 = vshrl.u32 %v1050_v16, 13  ;;  %v5121_v35 = vpop.eup %5120  ;;  %v2050_v37 = vmul.f32 0.6931472, %v5119_v28  ;;  %5126 = vlog2.f32 %v1993_v63  ;;  %v1802_v21 = vadd.f32 1e-10, %v1738_v13 }
 0x136   : > { %v1657_v41 = vcvt.s32.f32 %v1593_v23  ;;  %v5123_v20 = vpop.eup %5122  ;;  %v1860_v29 = vmul.f32 0.6931472, %v5121_v35  ;;  %v1067_v52 = vmul.u32 2246822507, %v1003_v32  ;;  %v4286_v51 = vshrl.u32 %v826_v33, 16 }
 0x137   : > { %v1242_v44 = vxor.u32 %v4318_v30, %v1050_v16  ;;  %v2153_v57 = vsub.f32 0.0, %v2050_v37  ;;  %v2080_v54 = vmul.f32 0.6931472, %v5123_v20  ;;  %5128 = vlog2.f32 %v1802_v21 }
 0x138   : > { %v1721_v58 = vmul.f32 1.1920929e-07, %v1657_v41  ;;  %v1962_v5 = vsub.f32 1e-10, %v1860_v29  ;;  %v4335_v3 = vshrl.u32 %v1067_v52, 13  ;;  %v1018_v12 = vxor.u32 %v4286_v51, %v826_v33 }
 0x139   : > { %v1306_v15 = vmul.u32 3266489909, %v1242_v44  ;;  %v6245_v22 = vadd.f32 %v2217_v18, %v2153_v57  ;;  %v2168_v63 = vsub.f32 0.0, %v2080_v54  ;;  %v713_v23 = vadd.s32 %v649_v25, %v5912_v11 }
 0x13a   : > { %v1785_v13 = vadd.f32 1e-10, %v1721_v58  ;;  %5130 = vlog2.f32 %v1962_v5  ;;  %v1259_v16 = vxor.u32 %v4335_v3, %v1067_v52  ;;  %v1082_v30 = vmul.u32 2246822507, %v1018_v12 }
 0x13b   : > { %7860 = vst [vmem:[#allocation12_spill] sm:$0xff] %v6245_v22  ;;  %v4382_v28 = vshrl.u32 %v1306_v15, 16  ;;  %v5125_v32 = vpop.eup %5124  ;;  %2369 = vmax.xlane.f32.xlu0 %v6245_v22  ;;  %v6249_v35 = vadd.f32 %v2232_v7, %v2168_v63  ;;  %v777_v37 = vmul.u32 2654435769, %v713_v23  ;;  %v618_v21 = vmul.u32 128, %v552_v36 }
 0x13c   : > { %5132 = vlog2.f32 %v1785_v13  ;;  %v1826_v41 = vmul.f32 0.6931472, %v5125_v32  ;;  %v1323_v20 = vmul.u32 3266489909, %v1259_v16  ;;  %v4350_v18 = vshrl.u32 %v1082_v30, 13 }
 0x13d   : > { %7861 = vst [vmem:[#allocation13_spill] sm:$0xff] %v6249_v35  ;;  %v1498_v33 = vxor.u32 %v4382_v28, %v1306_v15  ;;  %2399 = vmax.xlane.f32.xlu1 %v6249_v35  ;;  %v843_v25 = vadd.s32 %v5941_v31, %v777_v37  ;;  %v682_v29 = vadd.s32 %v618_v21, %v5912_v11  ;;  %v470_v44 = vadd.s32 80, %v5908_v9  ;;  %v2249_v28 = vld [vmem:[%s5897_s17 + $0x1c0] sm:$0xff] }
 0x13e   : > { %v519_v52 = vadd.s32 472, %v5908_v9  ;;  %v1945_v51 = vsub.f32 1e-10, %v1826_v41  ;;  %v4399_v54 = vshrl.u32 %v1323_v20, 16  ;;  %v1274_v58 = vxor.u32 %v4350_v18, %v1082_v30 }
 0x13f   : > { %v1562_v57 = vand.u32 8388607, %v1498_v33  ;;  %v5127_v36 = vpop.eup %5126  ;;  %v4303_v7 = vshrl.u32 %v843_v25, 16  ;;  %v746_v5 = vmul.u32 2654435769, %v682_v29  ;;  %v535_v15 = vadd.s32 %v5910_v10, %v470_v44 }
 0x140   : > { %v584_v3 = vadd.s32 %v5910_v10, %v519_v52  ;;  %v2114_v12 = vmul.f32 0.6931472, %v5127_v36  ;;  %5134 = vlog2.f32 %v1945_v51  ;;  %v1515_v13 = vxor.u32 %v4399_v54, %v1323_v20 }
 0x141   : > { %v1626_v63 = vcvt.s32.f32 %v1562_v57  ;;  %v5129_v23 = vpop.eup %5128  ;;  %v1338_v16 = vmul.u32 3266489909, %v1274_v58  ;;  %v1035_v32 = vxor.u32 %v4303_v7, %v843_v25  ;;  %v812_v37 = vadd.s32 %v5941_v31, %v746_v5 }
 0x142   : > { %v601_v21 = vmul.u32 128, %v535_v15  ;;  %v2185_v41 = vsub.f32 0.0, %v2114_v12  ;;  %v1924_v30 = vmul.f32 0.6931472, %v5129_v23  ;;  %v1579_v18 = vand.u32 8388607, %v1515_v13 }
 0x143   : > { %v1690_v33 = vmul.f32 1.1920929e-07, %v1626_v63  ;;  %v4414_v29 = vshrl.u32 %v1338_v16, 16  ;;  %v1099_v44 = vmul.u32 2246822507, %v1035_v32  ;;  %v4272_v35 = vshrl.u32 %v812_v37, 16  ;;  %v2218_v12 = vld [vmem:[%s5897_s17 + $0xc8] sm:$0xff] }
 0x144   : > { %v665_v52 = vadd.s32 %v601_v21, %v5912_v11  ;;  %v5131_v51 = vpop.eup %5130  ;;  %v6261_v57 = vadd.f32 %v2249_v28, %v2185_v41  ;;  %v1994_v20 = vsub.f32 1e-10, %v1924_v30  ;;  %v1643_v58 = vcvt.s32.f32 %v1579_v18 }
 0x145   : > { %v1754_v54 = vadd.f32 1e-10, %v1690_v33  ;;  %v2052_v36 = vmul.f32 0.6931472, %v5131_v51  ;;  %v1530_v7 = vxor.u32 %v4414_v29, %v1338_v16  ;;  %v4367_v5 = vshrl.u32 %v1099_v44, 13 }
 0x146   : > { %7862 = vst [vmem:[#allocation14_spill] sm:$0xff] %v6261_v57  ;;  %v5133_v25 = vpop.eup %5132  ;;  %v1004_v15 = vxor.u32 %v4272_v35, %v812_v37  ;;  %2433 = vmax.xlane.f32.xlu0 %v6261_v57  ;;  %5136 = vlog2.f32 %v1994_v20  ;;  %v1707_v13 = vmul.f32 1.1920929e-07, %v1643_v58  ;;  %v729_v23 = vmul.u32 2654435769, %v665_v52 }
 0x147   : > { %v1890_v63 = vmul.f32 0.6931472, %v5133_v25  ;;  %v2154_v32 = vsub.f32 0.0, %v2052_v36  ;;  %5138 = vlog2.f32 %v1754_v54  ;;  %v1594_v21 = vand.u32 8388607, %v1530_v7  ;;  %v2201_v36 = vld [vmem:[%s5897_s17 + $0x40] sm:$0xff] }
 0x148   : > { %v1291_v28 = vxor.u32 %v4367_v5, %v1099_v44  ;;  %v1771_v30 = vadd.f32 1e-10, %v1707_v13  ;;  %v1068_v33 = vmul.u32 2246822507, %v1004_v15  ;;  %v795_v18 = vadd.s32 %v5941_v31, %v729_v23 }
 0x149   : > { %v1977_v41 = vsub.f32 1e-10, %v1890_v63  ;;  %v6266_v16 = vadd.f32 %v2218_v12, %v2154_v32  ;;  %v1658_v35 = vcvt.s32.f32 %v1594_v21  ;;  %v650_v29 = vmul.u32 128, %v584_v3 }
 0x14a   : > { %v1355_v37 = vmul.u32 3266489909, %v1291_v28  ;;  %v5135_v51 = vpop.eup %5134  ;;  %v4336_v20 = vshrl.u32 %v1068_v33, 13  ;;  %v4255_v58 = vshrl.u32 %v795_v18, 16  ;;  %v502_v52 = vadd.s32 336, %v5908_v9 }
 0x14b   : > { %7863 = vst [vmem:[#allocation15_spill] sm:$0xff] %v6266_v16  ;;  %5140 = vlog2.f32 %v1977_v41  ;;  %2371 = vmax.xlane.f32.xlu1 %v6266_v16  ;;  %v2018_v44 = vmul.f32 0.6931472, %v5135_v51  ;;  %v1722_v54 = vmul.f32 1.1920929e-07, %v1658_v35  ;;  %v714_v15 = vadd.s32 %v650_v29, %v5912_v11 }
 0x14c   : > { %5142 = vlog2.f32 %v1771_v30  ;;  %v4431_v25 = vshrl.u32 %v1355_v37, 16  ;;  %v1260_v7 = vxor.u32 %v4336_v20, %v1068_v33  ;;  %v987_v5 = vxor.u32 %v4255_v58, %v795_v18 }
 0x14d   : > { %v567_v12 = vadd.s32 %v5910_v10, %v502_v52  ;;  %v2137_v3 = vsub.f32 0.0, %v2018_v44  ;;  %v1786_v63 = vadd.f32 1e-10, %v1722_v54  ;;  %v471_v23 = vadd.s32 88, %v5908_v9 }
 0x14e   : > { %v1547_v13 = vxor.u32 %v4431_v25, %v1355_v37  ;;  %v1324_v32 = vmul.u32 3266489909, %v1260_v7  ;;  %v1051_v21 = vmul.u32 2246822507, %v987_v5  ;;  %v488_v28 = vadd.s32 224, %v5908_v9 }
 0x14f   : > { %v503_v41 = vadd.s32 344, %v5908_v9  ;;  %v6276_v30 = vadd.f32 %v2201_v36, %v2137_v3  ;;  %5144 = vlog2.f32 %v1786_v63  ;;  %v778_v18 = vmul.u32 2654435769, %v714_v15  ;;  %v2250_v36 = vld [vmem:[%s5897_s17 + $0x1c8] sm:$0xff] }
 0x150   : > { %v1611_v33 = vand.u32 8388607, %v1547_v13  ;;  %v5137_v35 = vpop.eup %5136  ;;  %v4400_v29 = vshrl.u32 %v1324_v32, 16  ;;  %v4319_v51 = vshrl.u32 %v1051_v21, 13  ;;  %v633_v20 = vmul.u32 128, %v567_v12 }
 0x151   : > { %7864 = vst [vmem:[#allocation16_spill] sm:$0xff] %v6276_v30  ;;  %v536_v37 = vadd.s32 %v5910_v10, %v471_v23  ;;  %v5139_v58 = vpop.eup %5138  ;;  %2337 = vmax.xlane.f32.xlu0 %v6276_v30  ;;  %v2116_v52 = vmul.f32 0.6931472, %v5137_v35  ;;  %v844_v54 = vadd.s32 %v5941_v31, %v778_v18  ;;  %v553_v25 = vadd.s32 %v5910_v10, %v488_v28 }
 0x152   : > { %v1675_v44 = vcvt.s32.f32 %v1611_v33  ;;  %v1828_v7 = vmul.f32 0.6931472, %v5139_v58  ;;  %v1516_v5 = vxor.u32 %v4400_v29, %v1324_v32  ;;  %v1243_v3 = vxor.u32 %v4319_v51, %v1051_v21  ;;  %v2233_v21 = vld [vmem:[%s5897_s17 + $0x140] sm:$0xff] }
 0x153   : > { %v697_v15 = vadd.s32 %v633_v20, %v5912_v11  ;;  %v2186_v63 = vsub.f32 0.0, %v2116_v52  ;;  %v4304_v13 = vshrl.u32 %v844_v54, 16  ;;  %v602_v23 = vmul.u32 128, %v536_v37 }
 0x154   : > { %v1739_v12 = vmul.f32 1.1920929e-07, %v1675_v44  ;;  %v1946_v56 = vsub.f32 1e-10, %v1828_v7  ;;  %v1580_v30 = vand.u32 8388607, %v1516_v5  ;;  %v568_v33 = vadd.s32 %v5910_v10, %v503_v41 }
 0x155   : > { %v5141_v16 = vpop.eup %5140  ;;  %v1307_v35 = vmul.u32 3266489909, %v1243_v3  ;;  %v6285_v57 = vadd.f32 %v2250_v36, %v2186_v63  ;;  %v1036_v32 = vxor.u32 %v4304_v13, %v844_v54  ;;  %v761_v44 = vmul.u32 2654435769, %v697_v15 }
 0x156   : > { %v5143_v18 = vpop.eup %5142  ;;  %v2082_v28 = vmul.f32 0.6931472, %v5141_v16  ;;  %v1803_v58 = vadd.f32 1e-10, %v1739_v12  ;;  %5146 = vlog2.f32 %v1946_v56  ;;  %v1644_v51 = vcvt.s32.f32 %v1580_v30 }
 0x157   : > { %7865 = vst [vmem:[#allocation17_spill] sm:$0xff] %v6285_v57  ;;  %v1862_v29 = vmul.f32 0.6931472, %v5143_v18  ;;  %v4383_v20 = vshrl.u32 %v1307_v35, 16  ;;  %2435 = vmax.xlane.f32.xlu1 %v6285_v57  ;;  %v1100_v52 = vmul.u32 2246822507, %v1036_v32  ;;  %v666_v36 = vadd.s32 %v602_v23, %v5912_v11 }
 0x158   : > { %v2169_v37 = vsub.f32 0.0, %v2082_v28  ;;  %5148 = vlog2.f32 %v1803_v58  ;;  %v1708_v5 = vmul.f32 1.1920929e-07, %v1644_v51  ;;  %v827_v56 = vadd.s32 %v5941_v31, %v761_v44 }
 0x159   : > { %v1963_v7 = vsub.f32 1e-10, %v1862_v29  ;;  %v1499_v41 = vxor.u32 %v4383_v20, %v1307_v35  ;;  %v5145_v3 = vpop.eup %5144  ;;  %v4368_v54 = vshrl.u32 %v1100_v52, 13  ;;  %v619_v63 = vmul.u32 128, %v553_v25 }
 0x15a   : > { %v6290_v16 = vadd.f32 %v2233_v21, %v2169_v37  ;;  %v1892_v30 = vmul.f32 0.6931472, %v5145_v3  ;;  %v1772_v12 = vadd.f32 1e-10, %v1708_v5  ;;  %v4287_v15 = vshrl.u32 %v827_v56, 16 }
 0x15b   : > { %5150 = vlog2.f32 %v1963_v7  ;;  %v1563_v13 = vand.u32 8388607, %v1499_v41  ;;  %v1292_v18 = vxor.u32 %v4368_v54, %v1100_v52  ;;  %v730_v28 = vmul.u32 2654435769, %v666_v36 }
 0x15c   : > { %7866 = vst [vmem:[#allocation18_spill] sm:$0xff] %v6290_v16  ;;  %2401 = vmax.xlane.f32.xlu0 %v6290_v16  ;;  %v683_v35 = vadd.s32 %v619_v63, %v5912_v11  ;;  %v1978_v58 = vsub.f32 1e-10, %v1892_v30  ;;  %5152 = vlog2.f32 %v1772_v12  ;;  %v634_v32 = vmul.u32 128, %v568_v33 }
 0x15d   : > { %v1627_v23 = vcvt.s32.f32 %v1563_v13  ;;  %v1356_v21 = vmul.u32 3266489909, %v1292_v18  ;;  %v1019_v29 = vxor.u32 %v4287_v15, %v827_v56  ;;  %v796_v51 = vadd.s32 %v5941_v31, %v730_v28  ;;  %v2202_v15 = vld [vmem:[%s5897_s17 + $0x48] sm:$0xff] }
 0x15e   : > { %v747_v25 = vmul.u32 2654435769, %v683_v35  ;;  %5154 = vlog2.f32 %v1978_v58  ;;  %v698_v37 = vadd.s32 %v634_v32, %v5912_v11  ;;  %v520_v52 = vadd.s32 480, %v5908_v9 }
 0x15f   : > { %v1691_v20 = vmul.f32 1.1920929e-07, %v1627_v23  ;;  %v4432_v44 = vshrl.u32 %v1356_v21, 16  ;;  %v1083_v7 = vmul.u32 2246822507, %v1019_v29  ;;  %v4256_v5 = vshrl.u32 %v796_v51, 16 }
 0x160   : > { %v813_v41 = vadd.s32 %v5941_v31, %v747_v25  ;;  %v5147_v36 = vpop.eup %5146  ;;  %v762_v33 = vmul.u32 2654435769, %v698_v37  ;;  %v585_v54 = vadd.s32 %v5910_v10, %v520_v52  ;;  %v489_v56 = vadd.s32 232, %v5908_v9 }
 0x161   : > { %v1755_v3 = vadd.f32 1e-10, %v1691_v20  ;;  %v2020_v30 = vmul.f32 0.6931472, %v5147_v36  ;;  %v1548_v12 = vxor.u32 %v4432_v44, %v1356_v21  ;;  %v4351_v13 = vshrl.u32 %v1083_v7, 13 }
 0x162   : > { %v5149_v63 = vpop.eup %5148  ;;  %v988_v18 = vxor.u32 %v4256_v5, %v796_v51  ;;  %v4273_v35 = vshrl.u32 %v813_v41, 16  ;;  %v828_v58 = vadd.s32 %v5941_v31, %v762_v33  ;;  %v651_v16 = vmul.u32 128, %v585_v54 }
 0x163   : > { %v1926_v28 = vmul.f32 0.6931472, %v5149_v63  ;;  %5156 = vlog2.f32 %v1755_v3  ;;  %v2138_v23 = vsub.f32 0.0, %v2020_v30  ;;  %v1612_v32 = vand.u32 8388607, %v1548_v12  ;;  %v2219_v3 = vld [vmem:[%s5897_s17 + $0xd0] sm:$0xff] }
 0x164   : > { %v1275_v29 = vxor.u32 %v4351_v13, %v1083_v7  ;;  %v1052_v25 = vmul.u32 2246822507, %v988_v18  ;;  %v1005_v52 = vxor.u32 %v4273_v35, %v813_v41  ;;  %v4288_v57 = vshrl.u32 %v828_v58, 16 }
 0x165   : > { %v5151_v20 = vpop.eup %5150  ;;  %v1995_v37 = vsub.f32 1e-10, %v1926_v28  ;;  %v6303_v36 = vadd.f32 %v2202_v15, %v2138_v23  ;;  %v1676_v51 = vcvt.s32.f32 %v1612_v32  ;;  %v715_v28 = vadd.s32 %v651_v16, %v5912_v11 }
 0x166   : > { %v2054_v21 = vmul.f32 0.6931472, %v5151_v20  ;;  %v1339_v44 = vmul.u32 3266489909, %v1275_v29  ;;  %v5153_v5 = vpop.eup %5152  ;;  %v4320_v63 = vshrl.u32 %v1052_v25, 13  ;;  %v1020_v33 = vxor.u32 %v4288_v57, %v828_v58  ;;  %v2234_v20 = vld [vmem:[%s5897_s17 + $0x148] sm:$0xff] }
 0x167   : > { %7867 = vst [vmem:[#allocation19_spill] sm:$0xff] %v6303_v36  ;;  %5158 = vlog2.f32 %v1995_v37  ;;  %v1069_v43 = vmul.u32 2246822507, %v1005_v52  ;;  %2339 = vmax.xlane.f32.xlu1 %v6303_v36  ;;  %v1864_v30 = vmul.f32 0.6931472, %v5153_v5  ;;  %v1740_v12 = vmul.f32 1.1920929e-07, %v1676_v51 }
 0x168   : > { %v2155_v7 = vsub.f32 0.0, %v2054_v21  ;;  %v4415_v41 = vshrl.u32 %v1339_v44, 16  ;;  %v5155_v13 = vpop.eup %5154  ;;  %v1244_v54 = vxor.u32 %v4320_v63, %v1052_v25  ;;  %v1084_v15 = vmul.u32 2246822507, %v1020_v33 }
 0x169   : > { %v4337_v18 = vshrl.u32 %v1069_v43, 13  ;;  %v2084_v23 = vmul.f32 0.6931472, %v5155_v13  ;;  %v1964_v32 = vsub.f32 1e-10, %v1864_v30  ;;  %v554_v25 = vadd.s32 %v5910_v10, %v489_v56 }
 0x16a   : > { %v6308_v35 = vadd.f32 %v2219_v3, %v2155_v7  ;;  %v1804_v29 = vadd.f32 1e-10, %v1740_v12  ;;  %v1531_v37 = vxor.u32 %v4415_v41, %v1339_v44  ;;  %v1308_v57 = vmul.u32 3266489909, %v1244_v54 }
 0x16b   : > { %v1261_v58 = vxor.u32 %v4337_v18, %v1069_v43  ;;  %v4352_v52 = vshrl.u32 %v1084_v15, 13  ;;  %v2170_v21 = vsub.f32 0.0, %v2084_v23  ;;  %5160 = vlog2.f32 %v1964_v32 }
 0x16c   : > { %7868 = vst [vmem:[#allocation20_spill] sm:$0xff] %v6308_v35  ;;  %2373 = vmax.xlane.f32.xlu0 %v6308_v35  ;;  %v779_v51 = vmul.u32 2654435769, %v715_v28  ;;  %5162 = vlog2.f32 %v1804_v29  ;;  %v1595_v16 = vand.u32 8388607, %v1531_v37  ;;  %v4384_v3 = vshrl.u32 %v1308_v57, 16 }
 0x16d   : > { %v5157_v5 = vpop.eup %5156  ;;  %v1325_v63 = vmul.u32 3266489909, %v1261_v58  ;;  %v6313_v33 = vadd.f32 %v2234_v20, %v2170_v21  ;;  %v1276_v30 = vxor.u32 %v4352_v52, %v1084_v15  ;;  %v620_v13 = vmul.u32 128, %v554_v25  ;;  %v2251_v58 = vld [vmem:[%s5897_s17 + $0x1d0] sm:$0xff] }
 0x16e   : > { %v1830_v7 = vmul.f32 0.6931472, %v5157_v5  ;;  %v845_v44 = vadd.s32 %v5941_v31, %v779_v51  ;;  %v1659_v43 = vcvt.s32.f32 %v1595_v16  ;;  %v1500_v12 = vxor.u32 %v4384_v3, %v1308_v57 }
 0x16f   : > { %7869 = vst [vmem:[#allocation21_spill] sm:$0xff] %v6313_v33  ;;  %v4401_v41 = vshrl.u32 %v1325_v63, 16  ;;  %2403 = vmax.xlane.f32.xlu1 %v6313_v33  ;;  %v1340_v56 = vmul.u32 3266489909, %v1276_v30  ;;  %v472_v28 = vadd.s32 96, %v5908_v9  ;;  %v684_v15 = vadd.s32 %v620_v13, %v5912_v11  ;;  %v2252_v33 = vld [vmem:[%s5897_s17 + $0x1d8] sm:$0xff] }
 0x170   : > { %v1947_v54 = vsub.f32 1e-10, %v1830_v7  ;;  %v4305_v18 = vshrl.u32 %v845_v44, 16  ;;  %v1723_v32 = vmul.f32 1.1920929e-07, %v1659_v43  ;;  %v1564_v29 = vand.u32 8388607, %v1500_v12 }
 0x171   : > { %v5159_v23 = vpop.eup %5158  ;;  %v1517_v20 = vxor.u32 %v4401_v41, %v1325_v63  ;;  %v4416_v52 = vshrl.u32 %v1340_v56, 16  ;;  %v748_v5 = vmul.u32 2654435769, %v684_v15  ;;  %v537_v30 = vadd.s32 %v5910_v10, %v472_v28  ;;  %v2220_v28 = vld [vmem:[%s5897_s17 + $0xd8] sm:$0xff] }
 0x172   : > { %v2118_v37 = vmul.f32 0.6931472, %v5159_v23  ;;  %5164 = vlog2.f32 %v1947_v54  ;;  %v1037_v57 = vxor.u32 %v4305_v18, %v845_v44  ;;  %v1787_v21 = vadd.f32 1e-10, %v1723_v32 }
 0x173   : > { %v1628_v51 = vcvt.s32.f32 %v1564_v29  ;;  %v1581_v25 = vand.u32 8388607, %v1517_v20  ;;  %v1532_v3 = vxor.u32 %v4416_v52, %v1340_v56  ;;  %v814_v12 = vadd.s32 %v5941_v31, %v748_v5 }
 0x174   : > { %v2187_v16 = vsub.f32 0.0, %v2118_v37  ;;  %v1101_v7 = vmul.u32 2246822507, %v1037_v57  ;;  %5166 = vlog2.f32 %v1787_v21  ;;  %v603_v18 = vmul.u32 128, %v537_v30 }
 0x175   : > { %v1692_v43 = vmul.f32 1.1920929e-07, %v1628_v51  ;;  %v1645_v63 = vcvt.s32.f32 %v1581_v25  ;;  %v5161_v41 = vpop.eup %5160  ;;  %v1596_v54 = vand.u32 8388607, %v1532_v3  ;;  %v4274_v56 = vshrl.u32 %v814_v12, 16 }
 0x176   : > { %v6322_v13 = vadd.f32 %v2251_v58, %v2187_v16  ;;  %v4369_v44 = vshrl.u32 %v1101_v7, 13  ;;  %v5163_v23 = vpop.eup %5162  ;;  %v2056_v32 = vmul.f32 0.6931472, %v5161_v41  ;;  %v667_v57 = vadd.s32 %v603_v18, %v5912_v11 }
 0x177   : > { %v1756_v29 = vadd.f32 1e-10, %v1692_v43  ;;  %v1709_v20 = vmul.f32 1.1920929e-07, %v1645_v63  ;;  %v1928_v15 = vmul.f32 0.6931472, %v5163_v23  ;;  %v1660_v37 = vcvt.s32.f32 %v1596_v54 }
 0x178   : > { %7870 = vst [vmem:[#allocation22_spill] sm:$0xff] %v6322_v13  ;;  %2437 = vmax.xlane.f32.xlu0 %v6322_v13  ;;  %v1293_v52 = vxor.u32 %v4369_v44, %v1101_v7  ;;  %v2156_v21 = vsub.f32 0.0, %v2056_v32  ;;  %v1006_v51 = vxor.u32 %v4274_v56, %v814_v12  ;;  %v521_v3 = vadd.s32 488, %v5908_v9 }
 0x179   : > { %5168 = vlog2.f32 %v1756_v29  ;;  %v1773_v58 = vadd.f32 1e-10, %v1709_v20  ;;  %v1996_v25 = vsub.f32 1e-10, %v1928_v15  ;;  %v1724_v5 = vmul.f32 1.1920929e-07, %v1660_v37  ;;  %v2203_v29 = vld [vmem:[%s5897_s17 + $0x50] sm:$0xff] }
 0x17a   : > { %v1357_v16 = vmul.u32 3266489909, %v1293_v52  ;;  %v6328_v30 = vadd.f32 %v2220_v28, %v2156_v21  ;;  %v1070_v43 = vmul.u32 2246822507, %v1006_v51  ;;  %v586_v44 = vadd.s32 %v5910_v10, %v521_v3 }
 0x17b   : > { %5170 = vlog2.f32 %v1773_v58  ;;  %v731_v63 = vmul.u32 2654435769, %v667_v57  ;;  %v1788_v7 = vadd.f32 1e-10, %v1724_v5  ;;  %v504_v32 = vadd.s32 352, %v5908_v9 }
 0x17c   : > { %7871 = vst [vmem:[#allocation23_spill] sm:$0xff] %v6328_v30  ;;  %v5165_v41 = vpop.eup %5164  ;;  %5172 = vlog2.f32 %v1996_v25  ;;  %v4433_v54 = vshrl.u32 %v1357_v16, 16  ;;  %2375 = vmax.xlane.f32.xlu1 %v6328_v30  ;;  %v4338_v18 = vshrl.u32 %v1070_v43, 13  ;;  %v652_v56 = vmul.u32 128, %v586_v44 }
 0x17d   : > { %v2022_v12 = vmul.f32 0.6931472, %v5165_v41  ;;  %v797_v23 = vadd.s32 %v5941_v31, %v731_v63  ;;  %5174 = vlog2.f32 %v1788_v7  ;;  %v473_v28 = vadd.s32 104, %v5908_v9 }
 0x17e   : > { %v1549_v20 = vxor.u32 %v4433_v54, %v1357_v16  ;;  %v5167_v15 = vpop.eup %5166  ;;  %v1262_v52 = vxor.u32 %v4338_v18, %v1070_v43  ;;  %v569_v21 = vadd.s32 %v5910_v10, %v504_v32  ;;  %v716_v25 = vadd.s32 %v652_v56, %v5912_v11 }
 0x17f   : > { %v2139_v37 = vsub.f32 0.0, %v2022_v12  ;;  %v4257_v57 = vshrl.u32 %v797_v23, 16  ;;  %v1894_v58 = vmul.f32 0.6931472, %v5167_v15  ;;  %v538_v5 = vadd.s32 %v5910_v10, %v473_v28 }
 0x180   : > { %v1613_v51 = vand.u32 8388607, %v1549_v20  ;;  %v1326_v63 = vmul.u32 3266489909, %v1262_v52  ;;  %v635_v16 = vmul.u32 128, %v569_v21  ;;  %v490_v20 = vadd.s32 240, %v5908_v9 }
 0x181   : > { %v6339_v3 = vadd.f32 %v2203_v29, %v2139_v37  ;;  %v989_v41 = vxor.u32 %v4257_v57, %v797_v23  ;;  %v1979_v7 = vsub.f32 1e-10, %v1894_v58  ;;  %v780_v44 = vmul.u32 2654435769, %v716_v25 }
 0x182   : > { %v1677_v54 = vcvt.s32.f32 %v1613_v51  ;;  %v604_v30 = vmul.u32 128, %v538_v5  ;;  %v4402_v43 = vshrl.u32 %v1326_v63, 16  ;;  %v699_v32 = vadd.s32 %v635_v16, %v5912_v11 }
 0x183   : > { %7872 = vst [vmem:[#allocation24_spill] sm:$0xff] %v6339_v3  ;;  %v5169_v12 = vpop.eup %5168  ;;  %2341 = vmax.xlane.f32.xlu0 %v6339_v3  ;;  %v1053_v18 = vmul.u32 2246822507, %v989_v41  ;;  %5176 = vlog2.f32 %v1979_v7  ;;  %v846_v28 = vadd.s32 %v5941_v31, %v780_v44  ;;  %v555_v5 = vadd.s32 %v5910_v10, %v490_v20 }
 0x184   : > { %v1832_v56 = vmul.f32 0.6931472, %v5169_v12  ;;  %v1741_v29 = vmul.f32 1.1920929e-07, %v1677_v54  ;;  %v1518_v15 = vxor.u32 %v4402_v43, %v1326_v63  ;;  %v763_v52 = vmul.u32 2654435769, %v699_v32 }
 0x185   : > { %v5171_v23 = vpop.eup %5170  ;;  %v4321_v37 = vshrl.u32 %v1053_v18, 13  ;;  %v668_v57 = vadd.s32 %v604_v30, %v5912_v11  ;;  %v4306_v12 = vshrl.u32 %v846_v28, 16 }
 0x186   : > { %v5173_v21 = vpop.eup %5172  ;;  %v1948_v58 = vsub.f32 1e-10, %v1832_v56  ;;  %v1866_v51 = vmul.f32 0.6931472, %v5171_v23  ;;  %v1805_v25 = vadd.f32 1e-10, %v1741_v29  ;;  %v829_v63 = vadd.s32 %v5941_v31, %v763_v52 }
 0x187   : > { %v2120_v41 = vmul.f32 0.6931472, %v5173_v21  ;;  %v1582_v16 = vand.u32 8388607, %v1518_v15  ;;  %v1245_v7 = vxor.u32 %v4321_v37, %v1053_v18  ;;  %v5175_v54 = vpop.eup %5174  ;;  %v732_v43 = vmul.u32 2654435769, %v668_v57 }
 0x188   : > { %5178 = vlog2.f32 %v1948_v58  ;;  %v1965_v44 = vsub.f32 1e-10, %v1866_v51  ;;  %v1896_v3 = vmul.f32 0.6931472, %v5175_v54  ;;  %v1038_v29 = vxor.u32 %v4306_v12, %v846_v28 }
 0x189   : > { %v2188_v32 = vsub.f32 0.0, %v2120_v41  ;;  %5180 = vlog2.f32 %v1805_v25  ;;  %v1646_v30 = vcvt.s32.f32 %v1582_v16  ;;  %v1309_v56 = vmul.u32 3266489909, %v1245_v7 }
 0x18a   : > { %5182 = vlog2.f32 %v1965_v44  ;;  %v4289_v23 = vshrl.u32 %v829_v63, 16  ;;  %v1980_v15 = vsub.f32 1e-10, %v1896_v3  ;;  %v798_v37 = vadd.s32 %v5941_v31, %v732_v43 }
 0x18b   : > { %v6349_v20 = vadd.f32 %v2252_v33, %v2188_v32  ;;  %v1710_v18 = vmul.f32 1.1920929e-07, %v1646_v30  ;;  %v4385_v21 = vshrl.u32 %v1309_v56, 16  ;;  %v1102_v58 = vmul.u32 2246822507, %v1038_v29 }
 0x18c   : > { %v1021_v51 = vxor.u32 %v4289_v23, %v829_v63  ;;  %v621_v52 = vmul.u32 128, %v555_v5  ;;  %5184 = vlog2.f32 %v1980_v15  ;;  %v4258_v25 = vshrl.u32 %v798_v37, 16  ;;  %v2235_v63 = vld [vmem:[%s5897_s17 + $0x150] sm:$0xff] }
 0x18d   : > { %7873 = vst [vmem:[#allocation25_spill] sm:$0xff] %v6349_v20  ;;  %2439 = vmax.xlane.f32.xlu1 %v6349_v20  ;;  %v1774_v57 = vadd.f32 1e-10, %v1710_v18  ;;  %v505_v41 = vadd.s32 360, %v5908_v9  ;;  %v5177_v28 = vpop.eup %5176  ;;  %v1501_v16 = vxor.u32 %v4385_v21, %v1309_v56  ;;  %v4370_v33 = vshrl.u32 %v1102_v58, 13 }
 0x18e   : > { %v1085_v7 = vmul.u32 2246822507, %v1021_v51  ;;  %v685_v3 = vadd.s32 %v621_v52, %v5912_v11  ;;  %v2086_v12 = vmul.f32 0.6931472, %v5177_v28  ;;  %v990_v54 = vxor.u32 %v4258_v25, %v798_v37  ;;  %v2204_v28 = vld [vmem:[%s5897_s17 + $0x58] sm:$0xff] }
 0x18f   : > { %5186 = vlog2.f32 %v1774_v57  ;;  %v570_v44 = vadd.s32 %v5910_v10, %v505_v41  ;;  %v1565_v5 = vand.u32 8388607, %v1501_v16  ;;  %v1294_v43 = vxor.u32 %v4370_v33, %v1102_v58 }
 0x190   : > { %v4353_v32 = vshrl.u32 %v1085_v7, 13  ;;  %v749_v30 = vmul.u32 2654435769, %v685_v3  ;;  %v2171_v29 = vsub.f32 0.0, %v2086_v12  ;;  %v1054_v23 = vmul.u32 2246822507, %v990_v54 }
 0x191   : > { %v636_v15 = vmul.u32 128, %v570_v44  ;;  %v522_v56 = vadd.s32 496, %v5908_v9  ;;  %v1629_v21 = vcvt.s32.f32 %v1565_v5  ;;  %v1358_v51 = vmul.u32 3266489909, %v1294_v43 }
 0x192   : > { %v5179_v18 = vpop.eup %5178  ;;  %v1277_v52 = vxor.u32 %v4353_v32, %v1085_v7  ;;  %v815_v57 = vadd.s32 %v5941_v31, %v749_v30  ;;  %v6359_v25 = vadd.f32 %v2235_v63, %v2171_v29  ;;  %v4322_v58 = vshrl.u32 %v1054_v23, 13  ;;  %v2221_v30 = vld [vmem:[%s5897_s17 + $0xe0] sm:$0xff] }
 0x193   : > { %v5181_v37 = vpop.eup %5180  ;;  %v2024_v41 = vmul.f32 0.6931472, %v5179_v18  ;;  %v700_v16 = vadd.s32 %v636_v15, %v5912_v11  ;;  %v1693_v12 = vmul.f32 1.1920929e-07, %v1629_v21  ;;  %v4434_v54 = vshrl.u32 %v1358_v51, 16 }
 0x194   : > { %7874 = vst [vmem:[#allocation26_spill] sm:$0xff] %v6359_v25  ;;  %v5183_v33 = vpop.eup %5182  ;;  %v1930_v3 = vmul.f32 0.6931472, %v5181_v37  ;;  %v1341_v44 = vmul.u32 3266489909, %v1277_v52  ;;  %2405 = vmax.xlane.f32.xlu0 %v6359_v25  ;;  %v1246_v43 = vxor.u32 %v4322_v58, %v1054_v23  ;;  %v4275_v32 = vshrl.u32 %v815_v57, 16 }
 0x195   : > { %v2140_v5 = vsub.f32 0.0, %v2024_v41  ;;  %v2058_v7 = vmul.f32 0.6931472, %v5183_v33  ;;  %v1757_v63 = vadd.f32 1e-10, %v1693_v12  ;;  %v1550_v29 = vxor.u32 %v4434_v54, %v1358_v51  ;;  %v2236_v58 = vld [vmem:[%s5897_s17 + $0x158] sm:$0xff] }
 0x196   : > { %v1997_v20 = vsub.f32 1e-10, %v1930_v3  ;;  %v4417_v18 = vshrl.u32 %v1341_v44, 16  ;;  %v5185_v36 = vpop.eup %5184  ;;  %v1310_v37 = vmul.u32 3266489909, %v1246_v43  ;;  %v1007_v21 = vxor.u32 %v4275_v32, %v815_v57 }
 0x197   : > { %v6365_v13 = vadd.f32 %v2204_v28, %v2140_v5  ;;  %v2157_v15 = vsub.f32 0.0, %v2058_v7  ;;  %v2088_v35 = vmul.f32 0.6931472, %v5185_v36  ;;  %v1614_v52 = vand.u32 8388607, %v1550_v29 }
 0x198   : > { %5188 = vlog2.f32 %v1997_v20  ;;  %v1533_v25 = vxor.u32 %v4417_v18, %v1341_v44  ;;  %v4386_v33 = vshrl.u32 %v1310_v37, 16  ;;  %v1071_v51 = vmul.u32 2246822507, %v1007_v21 }
 0x199   : > { %7875 = vst [vmem:[#allocation27_spill] sm:$0xff] %v6365_v13  ;;  %v5187_v41 = vpop.eup %5186  ;;  %2343 = vmax.xlane.f32.xlu1 %v6365_v13  ;;  %v6368_v23 = vadd.f32 %v2221_v30, %v2157_v15  ;;  %5190 = vlog2.f32 %v1757_v63  ;;  %v2172_v3 = vsub.f32 0.0, %v2088_v35  ;;  %v1678_v28 = vcvt.s32.f32 %v1614_v52 }
 0x19a   : > { %v1868_v12 = vmul.f32 0.6931472, %v5187_v41  ;;  %v1597_v54 = vand.u32 8388607, %v1533_v25  ;;  %v1502_v57 = vxor.u32 %v4386_v33, %v1310_v37  ;;  %v4339_v36 = vshrl.u32 %v1071_v51, 13 }
 0x19b   : > { %7876 = vst [vmem:[#allocation28_spill] sm:$0xff] %v6368_v23  ;;  %2377 = vmax.xlane.f32.xlu0 %v6368_v23  ;;  %v764_v20 = vmul.u32 2654435769, %v700_v16  ;;  %v587_v44 = vadd.s32 %v5910_v10, %v522_v56  ;;  %v6373_v5 = vadd.f32 %v2236_v58, %v2172_v3  ;;  %v1742_v43 = vmul.f32 1.1920929e-07, %v1678_v28 }
 0x19c   : > { %v1966_v7 = vsub.f32 1e-10, %v1868_v12  ;;  %v1661_v32 = vcvt.s32.f32 %v1597_v54  ;;  %v1566_v30 = vand.u32 8388607, %v1502_v57  ;;  %v1263_v63 = vxor.u32 %v4339_v36, %v1071_v51 }
 0x19d   : > { %7877 = vst [vmem:[#allocation29_spill] sm:$0xff] %v6373_v5  ;;  %v830_v29 = vadd.s32 %v5941_v31, %v764_v20  ;;  %v653_v35 = vmul.u32 128, %v587_v44  ;;  %2407 = vmax.xlane.f32.xlu1 %v6373_v5  ;;  %v1806_v25 = vadd.f32 1e-10, %v1742_v43  ;;  %v491_v15 = vadd.s32 248, %v5908_v9 }
 0x19e   : > { %5192 = vlog2.f32 %v1966_v7  ;;  %v1725_v18 = vmul.f32 1.1920929e-07, %v1661_v32  ;;  %v1630_v16 = vcvt.s32.f32 %v1566_v30  ;;  %v1327_v37 = vmul.u32 3266489909, %v1263_v63  ;;  %v2253_v30 = vld [vmem:[%s5897_s17 + $0x1e0] sm:$0xff] }
 0x19f   : > { %v4290_v56 = vshrl.u32 %v830_v29, 16  ;;  %v717_v21 = vadd.s32 %v653_v35, %v5912_v11  ;;  %5194 = vlog2.f32 %v1806_v25  ;;  %v556_v41 = vadd.s32 %v5910_v10, %v491_v15 }
 0x1a0   : > { %v1789_v52 = vadd.f32 1e-10, %v1725_v18  ;;  %v474_v58 = vadd.s32 112, %v5908_v9  ;;  %v1694_v33 = vmul.f32 1.1920929e-07, %v1630_v16  ;;  %v4403_v51 = vshrl.u32 %v1327_v37, 16 }
 0x1a1   : > { %v1022_v3 = vxor.u32 %v4290_v56, %v830_v29  ;;  %v781_v12 = vmul.u32 2654435769, %v717_v21  ;;  %v622_v54 = vmul.u32 128, %v556_v41  ;;  %v523_v36 = vadd.s32 504, %v5908_v9 }
 0x1a2   : > { %v5189_v28 = vpop.eup %5188  ;;  %5196 = vlog2.f32 %v1789_v52  ;;  %v539_v57 = vadd.s32 %v5910_v10, %v474_v58  ;;  %v1758_v7 = vadd.f32 1e-10, %v1694_v33  ;;  %v1519_v43 = vxor.u32 %v4403_v51, %v1327_v37 }
 0x1a3   : > { %v5191_v20 = vpop.eup %5190  ;;  %v2122_v44 = vmul.f32 0.6931472, %v5189_v28  ;;  %v1086_v32 = vmul.u32 2246822507, %v1022_v3  ;;  %v847_v35 = vadd.s32 %v5941_v31, %v781_v12  ;;  %v686_v25 = vadd.s32 %v622_v54, %v5912_v11 }
 0x1a4   : > { %v1834_v63 = vmul.f32 0.6931472, %v5191_v20  ;;  %v605_v29 = vmul.u32 128, %v539_v57  ;;  %5198 = vlog2.f32 %v1758_v7  ;;  %v1583_v15 = vand.u32 8388607, %v1519_v43 }
 0x1a5   : > { %v2189_v18 = vsub.f32 0.0, %v2122_v44  ;;  %v4354_v16 = vshrl.u32 %v1086_v32, 13  ;;  %v4307_v21 = vshrl.u32 %v847_v35, 16  ;;  %v750_v52 = vmul.u32 2654435769, %v686_v25 }
 0x1a6   : > { %v1949_v56 = vsub.f32 1e-10, %v1834_v63  ;;  %v669_v41 = vadd.s32 %v605_v29, %v5912_v11  ;;  %v1647_v37 = vcvt.s32.f32 %v1583_v15  ;;  %v588_v51 = vadd.s32 %v5910_v10, %v523_v36  ;;  %v2222_v63 = vld [vmem:[%s5897_s17 + $0xe8] sm:$0xff] }
 0x1a7   : > { %v6387_v58 = vadd.f32 %v2253_v30, %v2189_v18  ;;  %v1278_v33 = vxor.u32 %v4354_v16, %v1086_v32  ;;  %v1039_v12 = vxor.u32 %v4307_v21, %v847_v35  ;;  %v816_v28 = vadd.s32 %v5941_v31, %v750_v52 }
 0x1a8   : > { %v5193_v3 = vpop.eup %5192  ;;  %5200 = vlog2.f32 %v1949_v56  ;;  %v733_v54 = vmul.u32 2654435769, %v669_v41  ;;  %v1711_v20 = vmul.f32 1.1920929e-07, %v1647_v37  ;;  %v654_v7 = vmul.u32 128, %v588_v51 }
 0x1a9   : > { %7878 = vst [vmem:[#allocation30_spill] sm:$0xff] %v6387_v58  ;;  %2441 = vmax.xlane.f32.xlu0 %v6387_v58  ;;  %v2060_v57 = vmul.f32 0.6931472, %v5193_v3  ;;  %v1342_v44 = vmul.u32 3266489909, %v1278_v33  ;;  %v5195_v43 = vpop.eup %5194  ;;  %v4276_v25 = vshrl.u32 %v816_v28, 16  ;;  %v6398_v3 = vpop.xlane.xlu0 %2321 }
 0x1aa   : > { %v1103_v30 = vmul.u32 2246822507, %v1039_v12  ;;  %v799_v32 = vadd.s32 %v5941_v31, %v733_v54  ;;  %v506_v36 = vadd.s32 368, %v5908_v9  ;;  %v1932_v18 = vmul.f32 0.6931472, %v5195_v43 }
 0x1ab   : > { %v2158_v29 = vsub.f32 0.0, %v2060_v57  ;;  %v1775_v35 = vadd.f32 1e-10, %v1711_v20  ;;  %v4418_v15 = vshrl.u32 %v1342_v44, 16  ;;  %v1008_v21 = vxor.u32 %v4276_v25, %v816_v28 }
 0x1ac   : > { %v5197_v16 = vpop.eup %5196  ;;  %v4371_v56 = vshrl.u32 %v1103_v30, 13  ;;  %v4259_v52 = vshrl.u32 %v799_v32, 16  ;;  %v718_v41 = vadd.s32 %v654_v7, %v5912_v11  ;;  %v1998_v33 = vsub.f32 1e-10, %v1932_v18 }
 0x1ad   : > { %v6396_v37 = vadd.f32 %v2222_v63, %v2158_v29  ;;  %v1898_v51 = vmul.f32 0.6931472, %v5197_v16  ;;  %5202 = vlog2.f32 %v1775_v35  ;;  %v1534_v12 = vxor.u32 %v4418_v15, %v1342_v44 }
 0x1ae   : > { %v1295_v54 = vxor.u32 %v4371_v56, %v1103_v30  ;;  %v1072_v5 = vmul.u32 2246822507, %v1008_v21  ;;  %v991_v57 = vxor.u32 %v4259_v52, %v799_v32  ;;  %v5199_v43 = vpop.eup %5198  ;;  %5204 = vlog2.f32 %v1998_v33 }
 0x1af   : > { %7879 = vst [vmem:[#allocation31_spill] sm:$0xff] %v6396_v37  ;;  %2379 = vmax.xlane.f32.xlu1 %v6396_v37  ;;  %v1981_v20 = vsub.f32 1e-10, %v1898_v51  ;;  %v782_v28 = vmul.u32 2654435769, %v718_v41  ;;  %v571_v25 = vadd.s32 %v5910_v10, %v506_v36  ;;  %v6403_v51 = vpop.xlane.xlu0 %2353  ;;  %v2205_v36 = vld [vmem:[%s5897_s17 + $0x60] sm:$0xff] }
 0x1b0   : > { %v1836_v7 = vmul.f32 0.6931472, %v5199_v43  ;;  %v1598_v63 = vand.u32 8388607, %v1534_v12  ;;  %v1359_v29 = vmul.u32 3266489909, %v1295_v54 }
 0x1b1   : > { %5206 = vlog2.f32 %v1981_v20  ;;  %v4340_v18 = vshrl.u32 %v1072_v5, 13  ;;  %v1055_v35 = vmul.u32 2246822507, %v991_v57  ;;  %v848_v44 = vadd.s32 %v5941_v31, %v782_v28 }
 0x1b2   : > { %v5201_v30 = vpop.eup %5200  ;;  %v1950_v15 = vsub.f32 1e-10, %v1836_v7  ;;  %v1662_v32 = vcvt.s32.f32 %v1598_v63  ;;  %v4435_v16 = vshrl.u32 %v1359_v29, 16  ;;  %v637_v56 = vmul.u32 128, %v571_v25 }
 0x1b3   : > { %v2026_v21 = vmul.f32 0.6931472, %v5201_v30  ;;  %v1264_v52 = vxor.u32 %v4340_v18, %v1072_v5  ;;  %v4323_v33 = vshrl.u32 %v1055_v35, 13  ;;  %v4308_v41 = vshrl.u32 %v848_v44, 16 }
 0x1b4   : > { %5208 = vlog2.f32 %v1950_v15  ;;  %v1726_v12 = vmul.f32 1.1920929e-07, %v1662_v32  ;;  %v1551_v54 = vxor.u32 %v4435_v16, %v1359_v29  ;;  %v701_v43 = vadd.s32 %v637_v56, %v5912_v11 }
 0x1b5   : > { %v2141_v57 = vsub.f32 0.0, %v2026_v21  ;;  %v1328_v20 = vmul.u32 3266489909, %v1264_v52  ;;  %v1247_v28 = vxor.u32 %v4323_v33, %v1055_v35  ;;  %v1040_v37 = vxor.u32 %v4308_v41, %v848_v44  ;;  %v6412_v21 = vpop.xlane.xlu0 %2355 }
 0x1b6   : > { %v1790_v7 = vadd.f32 1e-10, %v1726_v12  ;;  %v1615_v63 = vand.u32 8388607, %v1551_v54  ;;  %v765_v13 = vmul.u32 2654435769, %v701_v43 }
 0x1b7   : > { %v5203_v25 = vpop.eup %5202  ;;  %v6407_v30 = vadd.f32 %v2205_v36, %v2141_v57  ;;  %v4404_v5 = vshrl.u32 %v1328_v20, 16  ;;  %v1311_v18 = vmul.u32 3266489909, %v1247_v28  ;;  %v1104_v58 = vmul.u32 2246822507, %v1040_v37  ;;  %v2254_v12 = vld [vmem:[%s5897_s17 + $0x1e8] sm:$0xff] }
 0x1b8   : > { %v1870_v23 = vmul.f32 0.6931472, %v5203_v25  ;;  %5210 = vlog2.f32 %v1790_v7  ;;  %v1679_v15 = vcvt.s32.f32 %v1615_v63  ;;  %v831_v29 = vadd.s32 %v5941_v31, %v765_v13  ;;  %v5205_v32 = vpop.eup %5204  ;;  %v2237_v63 = vld [vmem:[%s5897_s17 + $0x160] sm:$0xff] }
 0x1b9   : > { %7880 = vst [vmem:[#allocation32_spill] sm:$0xff] %v6407_v30  ;;  %2345 = vmax.xlane.f32.xlu0 %v6407_v30  ;;  %v1520_v35 = vxor.u32 %v4404_v5, %v1328_v20  ;;  %v4387_v44 = vshrl.u32 %v1311_v18, 16  ;;  %v4372_v16 = vshrl.u32 %v1104_v58, 13  ;;  %v475_v56 = vadd.s32 120, %v5908_v9 }
 0x1ba   : > { %v2124_v52 = vmul.f32 0.6931472, %v5205_v32  ;;  %v1967_v33 = vsub.f32 1e-10, %v1870_v23  ;;  %v1743_v37 = vmul.f32 1.1920929e-07, %v1679_v15  ;;  %v4291_v41 = vshrl.u32 %v831_v29, 16  ;;  %v6417_v23 = vpop.xlane.xlu1 %2417 }
 0x1bb   : > { %v5207_v36 = vpop.eup %5206  ;;  %v1584_v54 = vand.u32 8388607, %v1520_v35  ;;  %v1503_v43 = vxor.u32 %v4387_v44, %v1311_v18  ;;  %v1296_v13 = vxor.u32 %v4372_v16, %v1104_v58  ;;  %v540_v57 = vadd.s32 %v5910_v10, %v475_v56 }
 0x1bc   : > { %v2190_v28 = vsub.f32 0.0, %v2124_v52  ;;  %v2090_v20 = vmul.f32 0.6931472, %v5207_v36  ;;  %5212 = vlog2.f32 %v1967_v33  ;;  %v1807_v7 = vadd.f32 1e-10, %v1743_v37  ;;  %v6421_v52 = vpop.xlane.xlu0 %2385  ;;  %v2206_v37 = vld [vmem:[%s5897_s17 + $0x68] sm:$0xff] }
 0x1bd   : > { %v1648_v25 = vcvt.s32.f32 %v1584_v54  ;;  %v1567_v5 = vand.u32 8388607, %v1503_v43  ;;  %v1360_v30 = vmul.u32 3266489909, %v1296_v13  ;;  %v1023_v32 = vxor.u32 %v4291_v41, %v831_v29 }
 0x1be   : > { %v5209_v15 = vpop.eup %5208  ;;  %v6419_v22 = vadd.f32 %v2254_v12, %v2190_v28  ;;  %v2173_v35 = vsub.f32 0.0, %v2090_v20  ;;  %5214 = vlog2.f32 %v1807_v7  ;;  %v606_v58 = vmul.u32 128, %v540_v57 }
 0x1bf   : > { %v2028_v18 = vmul.f32 0.6931472, %v5209_v15  ;;  %v1712_v44 = vmul.f32 1.1920929e-07, %v1648_v25  ;;  %v1631_v16 = vcvt.s32.f32 %v1567_v5  ;;  %v4436_v56 = vshrl.u32 %v1360_v30, 16 }
 0x1c0   : > { %7881 = vst [vmem:[#allocation33_spill] sm:$0xff] %v6419_v22  ;;  %2443 = vmax.xlane.f32.xlu1 %v6419_v22  ;;  %v6424_v33 = vadd.f32 %v2237_v63, %v2173_v35  ;;  %v1087_v29 = vmul.u32 2246822507, %v1023_v32  ;;  %v670_v41 = vadd.s32 %v606_v58, %v5912_v11  ;;  %v507_v36 = vadd.s32 376, %v5908_v9  ;;  %v6433_v32 = vpop.xlane.xlu1 %2419 }
 0x1c1   : > { %v2142_v12 = vsub.f32 0.0, %v2028_v18  ;;  %v1776_v54 = vadd.f32 1e-10, %v1712_v44  ;;  %v1695_v43 = vmul.f32 1.1920929e-07, %v1631_v16  ;;  %v1552_v13 = vxor.u32 %v4436_v56, %v1360_v30  ;;  %v6437_v18 = vpop.xlane.xlu0 %2357 }
 0x1c2   : > { %v5211_v57 = vpop.eup %5210  ;;  %2409 = vmax.xlane.f32.xlu0 %v6424_v33  ;;  %v4355_v28 = vshrl.u32 %v1087_v29, 13  ;;  %v734_v20 = vmul.u32 2654435769, %v670_v41  ;;  %v572_v7 = vadd.s32 %v5910_v10, %v507_v36 }
 0x1c3   : > { %v6431_v25 = vadd.f32 %v2206_v37, %v2142_v12  ;;  %v1900_v63 = vmul.f32 0.6931472, %v5211_v57  ;;  %5216 = vlog2.f32 %v1776_v54  ;;  %v1759_v5 = vadd.f32 1e-10, %v1695_v43  ;;  %v2223_v12 = vld [vmem:[%s5897_s17 + $0xf0] sm:$0xff] }
 0x1c4   : > { %v1616_v15 = vand.u32 8388607, %v1552_v13  ;;  %v1279_v9 = vxor.u32 %v4355_v28, %v1087_v29  ;;  %v800_v35 = vadd.s32 %v5941_v31, %v734_v20  ;;  %v638_v30 = vmul.u32 128, %v572_v7  ;;  %v6441_v20 = vpop.xlane.xlu1 %2323 }
 0x1c5   : > { %7882 = vst [vmem:[#allocation34_spill] sm:$0xff] %v6431_v25  ;;  %2347 = vmax.xlane.f32.xlu1 %v6431_v25  ;;  %v1982_v58 = vsub.f32 1e-10, %v1900_v63  ;;  %5218 = vlog2.f32 %v1759_v5 }
 0x1c6   : > { %v5213_v10 = vpop.eup %5212  ;;  %v1680_v44 = vcvt.s32.f32 %v1616_v15  ;;  %v1343_v16 = vmul.u32 3266489909, %v1279_v9  ;;  %v4260_v56 = vshrl.u32 %v800_v35, 16  ;;  %v702_v37 = vadd.s32 %v638_v30, %v5912_v11  ;;  %v6446_v30 = vpop.xlane.xlu0 %2421 }
 0x1c7   : > { %v2062_v41 = vmul.f32 0.6931472, %v5213_v10  ;;  %5220 = vlog2.f32 %v1982_v58 }
 0x1c8   : > { %v5215_v36 = vpop.eup %5214  ;;  %v1744_v29 = vmul.f32 1.1920929e-07, %v1680_v44  ;;  %v4419_v54 = vshrl.u32 %v1343_v16, 16  ;;  %v992_v43 = vxor.u32 %v4260_v56, %v800_v35  ;;  %v766_v13 = vmul.u32 2654435769, %v702_v37 }
 0x1c9   : > { %v2159_v57 = vsub.f32 0.0, %v2062_v41  ;;  %v1934_v28 = vmul.f32 0.6931472, %v5215_v36 }
 0x1ca   : > { %v1808_v7 = vadd.f32 1e-10, %v1744_v29  ;;  %v1535_v63 = vxor.u32 %v4419_v54, %v1343_v16  ;;  %v1056_v5 = vmul.u32 2246822507, %v992_v43  ;;  %v832_v15 = vadd.s32 %v5941_v31, %v766_v13  ;;  %v6449_v31 = vpop.xlane.xlu1 %2387 }
 0x1cb   : > { %v6444_v9 = vadd.f32 %v2223_v12, %v2159_v57  ;;  %v1999_v11 = vsub.f32 1e-10, %v1934_v28  ;;  %v6451_v28 = vpop.xlane.xlu0 %2325 }
 0x1cc   : > { %5222 = vlog2.f32 %v1808_v7  ;;  %v1599_v58 = vand.u32 8388607, %v1535_v63  ;;  %v4324_v10 = vshrl.u32 %v1056_v5, 13  ;;  %v4292_v44 = vshrl.u32 %v832_v15, 16 }
 0x1cd   : > { %7883 = vst [vmem:[#allocation35_spill] sm:$0xff] %v6444_v9  ;;  %v5217_v35 = vpop.eup %5216  ;;  %2381 = vmax.xlane.f32.xlu0 %v6444_v9  ;;  %5224 = vlog2.f32 %v1999_v11 }
 0x1ce   : > { %v1872_v56 = vmul.f32 0.6931472, %v5217_v35  ;;  %v1663_v37 = vcvt.s32.f32 %v1599_v58  ;;  %v1248_v16 = vxor.u32 %v4324_v10, %v1056_v5  ;;  %v1024_v41 = vxor.u32 %v4292_v44, %v832_v15  ;;  %v2238_v35 = vld [vmem:[%s5897_s17 + $0x168] sm:$0xff]  ;;  %v6454_v44 = vpop.xlane.xlu1 %2359 }
 0x1cf   : > { %v5219_v36 = vpop.eup %5218 }
 0x1d0   : > { %v1968_v12 = vsub.f32 1e-10, %v1872_v56  ;;  %v1838_v29 = vmul.f32 0.6931472, %v5219_v36  ;;  %v1727_v54 = vmul.f32 1.1920929e-07, %v1663_v37 }
 0x1d1   : > { %v5221_v43 = vpop.eup %5220  ;;  %v1312_v13 = vmul.u32 3266489909, %v1248_v16  ;;  %v1088_v57 = vmul.u32 2246822507, %v1024_v41 }
 0x1d2   : > { %v2092_v7 = vmul.f32 0.6931472, %v5221_v43  ;;  %5226 = vlog2.f32 %v1968_v12  ;;  %v1951_v63 = vsub.f32 1e-10, %v1838_v29  ;;  %v1791_v11 = vadd.f32 1e-10, %v1727_v54  ;;  %v6458_v29 = vpop.xlane.xlu0 %2389 }
 0x1d3   : > { %v4388_v58 = vshrl.u32 %v1312_v13, 16  ;;  %v4356_v25 = vshrl.u32 %v1088_v57, 13  ;;  %v2255_v43 = vld [vmem:[%s5897_s17 + $0x1f0] sm:$0xff] }
 0x1d4   : > { %v2174_v5 = vsub.f32 0.0, %v2092_v7  ;;  %5228 = vlog2.f32 %v1951_v63 }
 0x1d5   : > { %5230 = vlog2.f32 %v1791_v11  ;;  %v1504_v15 = vxor.u32 %v4388_v58, %v1312_v13  ;;  %v1280_v10 = vxor.u32 %v4356_v25, %v1088_v57 }
 0x1d6   : > { %v5223_v56 = vpop.eup %5222  ;;  %v6456_v37 = vadd.f32 %v2238_v35, %v2174_v5  ;;  %v6462_v35 = vpop.xlane.xlu1 %2423 }
 0x1d7   : > { %v5225_v16 = vpop.eup %5224  ;;  %v1936_v41 = vmul.f32 0.6931472, %v5223_v56  ;;  %v1568_v36 = vand.u32 8388607, %v1504_v15  ;;  %v1344_v12 = vmul.u32 3266489909, %v1280_v10 }
 0x1d8   : > { %7884 = vst [vmem:[#allocation36_spill] sm:$0xff] %v6456_v37  ;;  %2411 = vmax.xlane.f32.xlu1 %v6456_v37  ;;  %v2126_v54 = vmul.f32 0.6931472, %v5225_v16  ;;  %v6466_v37 = vpop.xlane.xlu0 %2361 }
 0x1d9   : > { %v2000_v7 = vsub.f32 1e-10, %v1936_v41  ;;  %v1632_v63 = vcvt.s32.f32 %v1568_v36  ;;  %v4420_v13 = vshrl.u32 %v1344_v12, 16  ;;  %v2224_v41 = vld [vmem:[%s5897_s17 + $0xf8] sm:$0xff] }
 0x1da   : > { %v2191_v25 = vsub.f32 0.0, %v2126_v54 }
 0x1db   : > { %5232 = vlog2.f32 %v2000_v7  ;;  %v1696_v57 = vmul.f32 1.1920929e-07, %v1632_v63  ;;  %v1536_v11 = vxor.u32 %v4420_v13, %v1344_v12  ;;  %v2207_v63 = vld [vmem:[%s5897_s17 + $0x70] sm:$0xff] }
 0x1dc   : > { %v5227_v58 = vpop.eup %5226  ;;  %v6464_v5 = vadd.f32 %v2255_v43, %v2191_v25  ;;  %v6478_v22 = vpop.xlane.xlu0 %2425 }
 0x1dd   : > { %v2064_v15 = vmul.f32 0.6931472, %v5227_v58  ;;  %v1760_v10 = vadd.f32 1e-10, %v1696_v57  ;;  %v1600_v56 = vand.u32 8388607, %v1536_v11  ;;  %v6473_v57 = vpop.xlane.xlu1 %2327 }
 0x1de   : > { %7885 = vst [vmem:[#allocation37_spill] sm:$0xff] %v6464_v5  ;;  %v5229_v16 = vpop.eup %5228  ;;  %2445 = vmax.xlane.f32.xlu0 %v6464_v5 }
 0x1df   : > { %v5231_v36 = vpop.eup %5230  ;;  %v2160_v54 = vsub.f32 0.0, %v2064_v15  ;;  %v2030_v7 = vmul.f32 0.6931472, %v5229_v16  ;;  %5234 = vlog2.f32 %v1760_v10  ;;  %v1664_v12 = vcvt.s32.f32 %v1600_v56  ;;  %v2256_v16 = vld [vmem:[%s5897_s17 + $0x1f8] sm:$0xff] }
 0x1e0   : > { %v1902_v13 = vmul.f32 0.6931472, %v5231_v36  ;;  %v2449_v15 = vsub.f32 %v6011_v26, %v6398_v3  ;;  %v2497_v3 = vsub.f32 %v6019_v46, %v6417_v23  ;;  %v2481_v46 = vsub.f32 %v6030_v60, %v6421_v52 }
 0x1e1   : > { %v6471_v9 = vadd.f32 %v2224_v41, %v2160_v54  ;;  %v2143_v43 = vsub.f32 0.0, %v2030_v7  ;;  %v1728_v25 = vmul.f32 1.1920929e-07, %v1664_v12  ;;  %v6484_v41 = vpop.xlane.xlu1 %2391  ;;  %v2465_v7 = vsub.f32 %v6016_v40, %v6403_v51 }
 0x1e2   : > { %v1983_v11 = vsub.f32 1e-10, %v1902_v13  ;;  %v2513_v54 = vmul.f32 1.442695, %v2449_v15  ;;  %v2609_v15 = vmul.f32 1.442695, %v2497_v3  ;;  %v2467_v3 = vsub.f32 %v6034_v6, %v6437_v18 }
 0x1e3   : > { %2383 = vmax.xlane.f32.xlu1 %v6471_v9  ;;  %v6476_v58 = vadd.f32 %v2207_v63, %v2143_v43  ;;  %v1792_v5 = vadd.f32 1e-10, %v1728_v25  ;;  %v6488_v63 = vpop.xlane.xlu0 %2329  ;;  %v2545_v43 = vmul.f32 1.442695, %v2465_v7 }
 0x1e4   : > { %5236 = vlog2.f32 %v1983_v11 }
 0x1e5   : > { %v5233_v10 = vpop.eup %5232  ;;  %2349 = vmax.xlane.f32.xlu0 %v6476_v58  ;;  %5238 = vlog2.f32 %v1792_v5  ;;  %v6495_v25 = vpop.xlane.xlu1 %2363 }
 0x1e6   : > { %v2128_v56 = vmul.f32 0.6931472, %v5233_v10  ;;  %5240 = vpow2.f32 %v2513_v54  ;;  %v2466_v54 = vsub.f32 %v6022_v50, %v6412_v21  ;;  %v2549_v50 = vmul.f32 1.442695, %v2467_v3 }
 0x1e7   : > { %v6497_v10 = vpop.xlane.xlu0 %2393  ;;  %v2499_v21 = vsub.f32 %v6069_v27, %v6446_v30  ;;  %v2451_v27 = vsub.f32 %v6085_v14, %v6451_v28  ;;  %v2483_v28 = vsub.f32 %v6099_v19, %v6458_v29 }
 0x1e8   : > { %v2192_v36 = vsub.f32 0.0, %v2128_v56  ;;  %v2239_v56 = vld [vmem:[%s5897_s17 + $0x170] sm:$0xff]  ;;  %v2547_v52 = vmul.f32 1.442695, %v2466_v54 }
 0x1e9   : > { %v5235_v12 = vpop.eup %5234  ;;  %v6506_v7 = vpop.xlane.xlu1 %2427  ;;  %v2517_v14 = vmul.f32 1.442695, %v2451_v27 }
 0x1ea   : > { %v6490_v13 = vadd.f32 %v2256_v16, %v2192_v36  ;;  %v1840_v26 = vmul.f32 0.6931472, %v5235_v12 }
 0x1ec   : > { %2447 = vmax.xlane.f32.xlu1 %v6490_v13  ;;  %v1952_v5 = vsub.f32 1e-10, %v1840_v26  ;;  %v2577_v26 = vmul.f32 1.442695, %v2481_v46 }
 0x1ed   : > { %v6520_v6 = vpop.xlane.xlu1 %2331 }
 0x1ee   : > { %v5237_v11 = vpop.eup %5236  ;;  %5242 = vlog2.f32 %v1952_v5  ;;  %v6511_v5 = vpop.xlane.xlu0 %2365 }
 0x1ef   : > { %v5239_v40 = vpop.eup %5238  ;;  %v2094_v51 = vmul.f32 0.6931472, %v5237_v11  ;;  %5244 = vpow2.f32 %v2545_v43  ;;  %v2498_v43 = vsub.f32 %v6026_v55, %v6433_v32  ;;  %v2450_v55 = vsub.f32 %v6032_v2, %v6441_v20 }
 0x1f0   : > { %v1904_v16 = vmul.f32 0.6931472, %v5239_v40  ;;  %5246 = vpow2.f32 %v2609_v15  ;;  %v6513_v60 = vpop.eup %5240  ;;  %v2482_v2 = vsub.f32 %v6064_v17, %v6449_v31  ;;  %v2468_v17 = vsub.f32 %v6074_v34, %v6454_v44 }
 0x1f1   : > { %v2175_v23 = vsub.f32 0.0, %v2094_v51  ;;  %v2208_v51 = vld [vmem:[%s5897_s17 + $0x78] sm:$0xff]  ;;  %v2515_v54 = vmul.f32 1.442695, %v2450_v55  ;;  %v6539_v20 = vpop.xlane.xlu1 %2395  ;;  %v2581_v31 = vmul.f32 1.442695, %v2483_v28  ;;  %v2500_v34 = vsub.f32 %v6092_v48, %v6462_v35 }
 0x1f2   : > { %v1984_v36 = vsub.f32 1e-10, %v1904_v16  ;;  %v6527_v32 = vpop.xlane.xlu0 %2429  ;;  %v2613_v16 = vmul.f32 1.442695, %v2499_v21  ;;  %v2469_v21 = vsub.f32 %v6114_v0, %v6466_v37  ;;  %v2501_v0 = vsub.f32 %v6127_v4, %v6478_v22 }
 0x1f3   : > { %v6502_v12 = vadd.f32 %v2239_v56, %v2175_v23  ;;  %v2611_v56 = vmul.f32 1.442695, %v2498_v43  ;;  %v2615_v55 = vmul.f32 1.442695, %v2500_v34  ;;  %v2452_v48 = vsub.f32 %v6105_v45, %v6473_v57 }
 0x1f4   : > { %5248 = vlog2.f32 %v1984_v36  ;;  %v2453_v4 = vsub.f32 %v6147_v42, %v6488_v63  ;;  %v2484_v45 = vsub.f32 %v6121_v49, %v6484_v41  ;;  %v2485_v42 = vsub.f32 %v6161_v61, %v6497_v10 }
 0x1f5   : > { %2413 = vmax.xlane.f32.xlu0 %v6502_v12  ;;  %5250 = vpow2.f32 %v2577_v26  ;;  %v2240_v26 = vld [vmem:[%s5897_s17 + $0x178] sm:$0xff]  ;;  %v6559_v29 = vpop.xlane.xlu1 %2367  ;;  %v2470_v49 = vsub.f32 %v6139_v62, %v6495_v25  ;;  %v2471_v61 = vsub.f32 %v6176_v8, %v6511_v5  ;;  %v2502_v62 = vsub.f32 %v6154_v38, %v6506_v7  ;;  %s4237_s17 = sshll.u32 %s8082_s26, 2 }
 0x1f6   : > { %5252 = vpow2.f32 %v2547_v52  ;;  %v6545_v52 = vpop.xlane.xlu0 %2333  ;;  %v2521_v57 = vmul.f32 1.442695, %v2453_v4  ;;  %v2503_v8 = vsub.f32 %v6196_v59, %v6527_v32  ;;  %v2454_v38 = vsub.f32 %v6172_v53, %v6520_v6  ;;  %s436_s29 = scalar_lea.vmem %s7716_s5, %s4237_s17 }
 0x1f7   : > { %5254 = vpow2.f32 %v2549_v50  ;;  %v2579_v50 = vmul.f32 1.442695, %v2482_v2  ;;  %v2455_v59 = vsub.f32 %v6212_v39, %v6545_v52  ;;  %v2486_v53 = vsub.f32 %v6191_v1, %v6539_v20 }
 0x1f8   : > { %v5243_v11 = vpop.eup %5242  ;;  %5256 = vpow2.f32 %v2611_v56  ;;  %v2621_v7 = vmul.f32 1.442695, %v2503_v8  ;;  %v2472_v1 = vsub.f32 %v6202_v24, %v6559_v29  ;;  %v7887_v24 = vld [vmem:[#allocation10_spill] sm:$0xff]  ;;  %v7890_v8 = vld [vmem:[#allocation16_spill] sm:$0xff] }
 0x1f9   : > { %v2032_v40 = vmul.f32 0.6931472, %v5243_v11  ;;  %2641 = vadd.xlane.f32.xlu0 %v6513_v60  ;;  %v6522_v18 = vpop.eup %5244  ;;  %5258 = vpow2.f32 %v2613_v16  ;;  %v6577_v35 = vpop.xlane.xlu1 %2431  ;;  %v2617_v16 = vmul.f32 1.442695, %v2501_v0  ;;  %v2525_v0 = vmul.f32 1.442695, %v2455_v59 }
 0x1fa   : > { %v6531_v30 = vpop.eup %5246  ;;  %5260 = vpow2.f32 %v2515_v54  ;;  %v6565_v44 = vpop.xlane.xlu0 %2397  ;;  %v2504_v29 = vsub.f32 %v7887_v24, %v6577_v35  ;;  %v7889_v35 = vld [vmem:[#allocation11_spill] sm:$0xff]  ;;  %v7891_v59 = vld [vmem:[#allocation13_spill] sm:$0xff]  ;;  %v7894_v24 = vld [vmem:[#allocation20_spill] sm:$0xff] }
 0x1fb   : > { %v2144_v15 = vsub.f32 0.0, %v2032_v40  ;;  %5262 = vpow2.f32 %v2517_v14  ;;  %v2585_v14 = vmul.f32 1.442695, %v2485_v42  ;;  %v2487_v39 = vsub.f32 %v6226_v47, %v6565_v44  ;;  %v7886_v47 = vld [vmem:[#allocation12_spill] sm:$0xff] }
 0x1fc   : > { %5264 = vpow2.f32 %v2579_v50  ;;  %v2557_v50 = vmul.f32 1.442695, %v2471_v61 }
 0x1fd   : > { %v6533_v46 = vadd.f32 %v2208_v51, %v2144_v15  ;;  %2673 = vadd.xlane.f32.xlu0 %v6522_v18  ;;  %v2551_v51 = vmul.f32 1.442695, %v2468_v17  ;;  %5266 = vpow2.f32 %v2581_v31  ;;  %v2553_v15 = vmul.f32 1.442695, %v2469_v21  ;;  %v6597_v54 = vpop.xlane.xlu1 %2335 }
 0x1fe   : > { %v5249_v23 = vpop.eup %5248  ;;  %v6585_v27 = vpop.xlane.xlu0 %2369  ;;  %v2619_v21 = vmul.f32 1.442695, %v2502_v62  ;;  %v2456_v62 = vsub.f32 %v7889_v35, %v6597_v54 }
 0x1ff   : > { %2351 = vmax.xlane.f32.xlu1 %v6533_v46  ;;  %v2096_v36 = vmul.f32 0.6931472, %v5249_v23  ;;  %v6547_v43 = vpop.eup %5250  ;;  %5268 = vpow2.f32 %v2551_v51  ;;  %v2473_v44 = vsub.f32 %v7886_v47, %v6585_v27  ;;  %v7888_v27 = vld [vmem:[#allocation14_spill] sm:$0xff] }
 0x200   : > { %v6555_v19 = vpop.eup %5252  ;;  %5270 = vpow2.f32 %v2553_v15  ;;  %v2523_v15 = vmul.f32 1.442695, %v2454_v38  ;;  %v2527_v54 = vmul.f32 1.442695, %v2456_v62 }
 0x201   : > { %v2176_v3 = vsub.f32 0.0, %v2096_v36  ;;  %2737 = vadd.xlane.f32.xlu0 %v6531_v30  ;;  %v6561_v40 = vpop.eup %5254  ;;  %5272 = vpow2.f32 %v2615_v55  ;;  %v2519_v36 = vmul.f32 1.442695, %v2452_v48  ;;  %v6615_v25 = vpop.xlane.xlu1 %2399  ;;  %v2587_v48 = vmul.f32 1.442695, %v2486_v53 }
 0x202   : > { %v6569_v37 = vpop.eup %5256  ;;  %5274 = vpow2.f32 %v2617_v16  ;;  %v6603_v41 = vpop.xlane.xlu0 %2433  ;;  %v2589_v16 = vmul.f32 1.442695, %v2487_v39  ;;  %v2561_v42 = vmul.f32 1.442695, %v2473_v44  ;;  %v7893_v44 = vld [vmem:[#allocation15_spill] sm:$0xff] }
 0x203   : > { %v6549_v11 = vadd.f32 %v2240_v26, %v2176_v3  ;;  %v6573_v56 = vpop.eup %5258  ;;  %5276 = vpow2.f32 %v2519_v36  ;;  %v2583_v26 = vmul.f32 1.442695, %v2484_v45  ;;  %v2555_v3 = vmul.f32 1.442695, %v2470_v49 }
 0x204   : > { %v6581_v22 = vpop.eup %5260  ;;  %5278 = vpow2.f32 %v2521_v57  ;;  %v2559_v57 = vmul.f32 1.442695, %v2472_v1 }
 0x205   : > { %2415 = vmax.xlane.f32.xlu1 %v6549_v11  ;;  %2705 = vadd.xlane.f32.xlu0 %v6547_v43  ;;  %v6587_v23 = vpop.eup %5262  ;;  %5280 = vpow2.f32 %v2583_v26  ;;  %v6635_v51 = vpop.xlane.xlu1 %2371  ;;  %v2505_v26 = vsub.f32 %v7888_v27, %v6603_v41 }
 0x206   : > { %v6593_v63 = vpop.eup %5264  ;;  %5282 = vpow2.f32 %v2585_v14  ;;  %v6623_v17 = vpop.xlane.xlu0 %2337 }
 0x207   : > { %v6599_v2 = vpop.eup %5266  ;;  %5284 = vpow2.f32 %v2555_v3  ;;  %v2623_v3 = vmul.f32 1.442695, %v2504_v29  ;;  %v2625_v41 = vmul.f32 1.442695, %v2505_v26 }
 0x208   : > { %5286 = vpow2.f32 %v2557_v50 }
 0x209   : > { %2675 = vadd.xlane.f32.xlu1 %v6555_v19  ;;  %2677 = vadd.xlane.f32.xlu0 %v6561_v40  ;;  %v6607_v10 = vpop.eup %5268  ;;  %5288 = vpow2.f32 %v2619_v21  ;;  %v6653_v20 = vpop.xlane.xlu1 %2435  ;;  %v2457_v21 = vsub.f32 %v7890_v8, %v6623_v17 }
 0x20a   : > { %v6611_v28 = vpop.eup %5270  ;;  %v6641_v6 = vpop.xlane.xlu0 %2401  ;;  %5290 = vpow2.f32 %v2621_v7 }
 0x20b   : > { %v6619_v5 = vpop.eup %5272  ;;  %5292 = vpow2.f32 %v2523_v15  ;;  %v2488_v15 = vsub.f32 %v7891_v59, %v6615_v25  ;;  %v2529_v53 = vmul.f32 1.442695, %v2457_v21  ;;  %v2474_v25 = vsub.f32 %v7893_v44, %v6635_v51  ;;  %v7897_v59 = vld [vmem:[#allocation19_spill] sm:$0xff] }
 0x20c   : > { %v6625_v31 = vpop.eup %5274  ;;  %5294 = vpow2.f32 %v2525_v0  ;;  %v7892_v0 = vld [vmem:[#allocation18_spill] sm:$0xff] }
 0x20d   : > { %2739 = vadd.xlane.f32.xlu1 %v6569_v37  ;;  %2741 = vadd.xlane.f32.xlu0 %v6573_v56  ;;  %v6631_v32 = vpop.eup %5276  ;;  %5296 = vpow2.f32 %v2587_v48  ;;  %v6672_v14 = vpop.xlane.xlu1 %2339  ;;  %v2489_v39 = vsub.f32 %v7892_v0, %v6641_v6  ;;  %v2591_v47 = vmul.f32 1.442695, %v2488_v15  ;;  %v2563_v26 = vmul.f32 1.442695, %v2474_v25  ;;  %v7898_v0 = vld [vmem:[#allocation24_spill] sm:$0xff] }
 0x20e   : > { %v6637_v34 = vpop.eup %5278  ;;  %v2374_v36 = vpop.xlane.xlu0 %2373  ;;  %5298 = vpow2.f32 %v2589_v16  ;;  %v2458_v15 = vsub.f32 %v7897_v59, %v6672_v14  ;;  %v7902_v59 = vld [vmem:[#allocation28_spill] sm:$0xff] }
 0x20f   : > { %v6645_v52 = vpop.eup %5280  ;;  %5300 = vpow2.f32 %v2559_v57  ;;  %v2593_v57 = vmul.f32 1.442695, %v2489_v39  ;;  %v2475_v29 = vsub.f32 %v7894_v24, %v2374_v36 }
 0x210   : > { %v6649_v55 = vpop.eup %5282  ;;  %5302 = vpow2.f32 %v2561_v42  ;;  %v2531_v25 = vmul.f32 1.442695, %v2458_v15 }
 0x211   : > { %2643 = vadd.xlane.f32.xlu1 %v6581_v22  ;;  %2645 = vadd.xlane.f32.xlu0 %v6587_v23  ;;  %v6657_v4 = vpop.eup %5284  ;;  %5304 = vpow2.f32 %v2623_v3  ;;  %v2404_v17 = vpop.xlane.xlu1 %2403  ;;  %v7895_v3 = vld [vmem:[#allocation17_spill] sm:$0xff]  ;;  %v2565_v51 = vmul.f32 1.442695, %v2475_v29  ;;  %v7900_v29 = vld [vmem:[#allocation26_spill] sm:$0xff] }
 0x212   : > { %v6661_v45 = vpop.eup %5286  ;;  %v2438_v50 = vpop.xlane.xlu0 %2437  ;;  %5306 = vpow2.f32 %v2625_v41  ;;  %v2506_v35 = vsub.f32 %v7895_v3, %v6653_v20  ;;  %v7896_v41 = vld [vmem:[#allocation22_spill] sm:$0xff] }
 0x213   : > { %v6668_v49 = vpop.eup %5288  ;;  %5308 = vpow2.f32 %v2527_v54  ;;  %v2507_v8 = vsub.f32 %v7896_v41, %v2438_v50  ;;  %v7901_v41 = vld [vmem:[#allocation23_spill] sm:$0xff] }
 0x214   : > { %v6675_v61 = vpop.eup %5290  ;;  %5310 = vpow2.f32 %v2529_v53  ;;  %v2627_v54 = vmul.f32 1.442695, %v2506_v35 }
 0x215   : > { %2707 = vadd.xlane.f32.xlu1 %v6593_v63  ;;  %2709 = vadd.xlane.f32.xlu0 %v6599_v2  ;;  %v6682_v38 = vpop.eup %5292  ;;  %v2376_v6 = vpop.xlane.xlu1 %2375  ;;  %5312 = vpow2.f32 %v2591_v47  ;;  %v2629_v20 = vmul.f32 1.442695, %v2507_v8 }
 0x216   : > { %v6686_v7 = vpop.eup %5294  ;;  %v2342_v1 = vpop.xlane.xlu0 %2341  ;;  %5314 = vpow2.f32 %v2593_v57  ;;  %v7899_v57 = vld [vmem:[#allocation21_spill] sm:$0xff]  ;;  %v2476_v8 = vsub.f32 %v7901_v41, %v2376_v6 }
 0x217   : > { %v6697_v48 = vpop.eup %5296  ;;  %5316 = vpow2.f32 %v2563_v26  ;;  %v2459_v39 = vsub.f32 %v7898_v0, %v2342_v1  ;;  %v2490_v24 = vsub.f32 %v7899_v57, %v2404_v17 }
 0x218   : > { %v6701_v16 = vpop.eup %5298  ;;  %5318 = vpow2.f32 %v2565_v51  ;;  %v2567_v0 = vmul.f32 1.442695, %v2476_v8 }
 0x219   : > { %2679 = vadd.xlane.f32.xlu1 %v6607_v10  ;;  %2681 = vadd.xlane.f32.xlu0 %v6611_v28  ;;  %v6706_v42 = vpop.eup %5300  ;;  %5320 = vpow2.f32 %v2627_v54  ;;  %v2533_v14 = vmul.f32 1.442695, %v2459_v39  ;;  %v2595_v51 = vmul.f32 1.442695, %v2490_v24  ;;  %v7904_v39 = vld [vmem:[#allocation25_spill] sm:$0xff]  ;;  %v7905_v24 = vld [vmem:[#allocation30_spill] sm:$0xff] }
 0x21a   : > { %v6710_v27 = vpop.eup %5302  ;;  %v2440_v53 = vpop.xlane.xlu1 %2439  ;;  %5322 = vpow2.f32 %v2629_v20 }
 0x21b   : > { %v6715_v36 = vpop.eup %5304  ;;  %5324 = vpow2.f32 %v2531_v25  ;;  %v2508_v25 = vsub.f32 %v7904_v39, %v2440_v53 }
 0x21c   : > { %v6719_v21 = vpop.eup %5306  ;;  %5326 = vpow2.f32 %v2533_v14 }
 0x21d   : > { %2743 = vadd.xlane.f32.xlu1 %v6619_v5  ;;  %2745 = vadd.xlane.f32.xlu0 %v6625_v31  ;;  %v6724_v47 = vpop.eup %5308  ;;  %5328 = vpow2.f32 %v2595_v51  ;;  %v2631_v41 = vmul.f32 1.442695, %v2508_v25  ;;  %v7906_v51 = vld [vmem:[#allocation27_spill] sm:$0xff] }
 0x21e   : > { %v6728_v44 = vpop.eup %5310 }
 0x21f   : > { %v6732_v3 = vpop.eup %5312 }
 0x220   : > { %v6736_v35 = vpop.eup %5314 }
 0x221   : > { %2647 = vadd.xlane.f32.xlu1 %v6631_v32  ;;  %2649 = vadd.xlane.f32.xlu0 %v6637_v34  ;;  %v2406_v62 = vpop.xlane.xlu0 %2405  ;;  %v6740_v20 = vpop.eup %5316 }
 0x222   : > { %v2491_v26 = vsub.f32 %v7900_v29, %v2406_v62  ;;  %v6744_v62 = vpop.eup %5318 }
 0x223   : > { %7903 = vst [vmem:[#allocation12_spill] sm:$0xff] %v6744_v62  ;;  %v6748_v29 = vpop.eup %5320 }
 0x224   : > { %v2597_v17 = vmul.f32 1.442695, %v2491_v26  ;;  %v6752_v26 = vpop.eup %5322 }
 0x225   : > { %2711 = vadd.xlane.f32.xlu1 %v6645_v52  ;;  %2713 = vadd.xlane.f32.xlu0 %v6649_v55 }
 0x226   : > { %v2344_v1 = vpop.xlane.xlu1 %2343  ;;  %5330 = vpow2.f32 %v2597_v17 }
 0x227   : > { %5332 = vpow2.f32 %v2567_v0  ;;  %v2460_v8 = vsub.f32 %v7906_v51, %v2344_v1 }
 0x228   : > { %v2378_v50 = vpop.xlane.xlu0 %2377 }
 0x229   : > { %2683 = vadd.xlane.f32.xlu1 %v6657_v4  ;;  %2685 = vadd.xlane.f32.xlu0 %v6661_v45  ;;  %v2477_v15 = vsub.f32 %v7902_v59, %v2378_v50  ;;  %v7907_v59 = vld [vmem:[#allocation32_spill] sm:$0xff] }
 0x22a   : > { %v2408_v57 = vpop.xlane.xlu1 %2407 }
 0x22b   : > { %v2569_v6 = vmul.f32 1.442695, %v2477_v15  ;;  %v6756_v15 = vpop.eup %5324 }
 0x22c   : > { %v6760_v39 = vpop.eup %5326 }
 0x22d   : > { %2747 = vadd.xlane.f32.xlu1 %v6668_v49  ;;  %2749 = vadd.xlane.f32.xlu0 %v6675_v61  ;;  %5334 = vpow2.f32 %v2569_v6 }
 0x22e   : > { %5336 = vpow2.f32 %v2631_v41  ;;  %v7911_v41 = vld [vmem:[#allocation31_spill] sm:$0xff] }
 0x231   : > { %2651 = vadd.xlane.f32.xlu1 %v6682_v38  ;;  %2653 = vadd.xlane.f32.xlu0 %v6686_v7 }
 0x235   : > { %2715 = vadd.xlane.f32.xlu1 %v6697_v48  ;;  %2717 = vadd.xlane.f32.xlu0 %v6701_v16 }
 0x236   : > { %v2442_v54 = vpop.xlane.xlu0 %2441 }
 0x237   : > { %v2509_v14 = vsub.f32 %v7905_v24, %v2442_v54  ;;  %v2535_v24 = vmul.f32 1.442695, %v2460_v8 }
 0x239   : > { %2687 = vadd.xlane.f32.xlu1 %v6706_v42  ;;  %2689 = vadd.xlane.f32.xlu0 %v6710_v27  ;;  %v2633_v53 = vmul.f32 1.442695, %v2509_v14  ;;  %v6764_v14 = vpop.eup %5328 }
 0x23a   : > { %7909 = vst [vmem:[#allocation10_spill] sm:$0xff] %v6764_v14 }
 0x23b   : > { %5338 = vpow2.f32 %v2633_v53 }
 0x23c   : > { %v2380_v54 = vpop.xlane.xlu1 %2379  ;;  %5340 = vpow2.f32 %v2535_v24 }
 0x23d   : > { %2751 = vadd.xlane.f32.xlu1 %v6715_v36  ;;  %2753 = vadd.xlane.f32.xlu0 %v6719_v21  ;;  %v2478_v8 = vsub.f32 %v7911_v41, %v2380_v54 }
 0x23f   : > { %v2571_v53 = vmul.f32 1.442695, %v2478_v8 }
 0x241   : > { %2655 = vadd.xlane.f32.xlu1 %v6724_v47  ;;  %2657 = vadd.xlane.f32.xlu0 %v6728_v44 }
 0x245   : > { %2719 = vadd.xlane.f32.xlu1 %v6732_v3  ;;  %2721 = vadd.xlane.f32.xlu0 %v6736_v35 }
 0x246   : > { %v2346_v50 = vpop.xlane.xlu0 %2345 }
 0x247   : > { %v2461_v17 = vsub.f32 %v7907_v59, %v2346_v50  ;;  %v6768_v50 = vpop.eup %5330 }
 0x248   : > { %7910 = vst [vmem:[#allocation14_spill] sm:$0xff] %v6768_v50 }
 0x249   : > { %2691 = vadd.xlane.f32.xlu1 %v6740_v20  ;;  %2693 = vadd.xlane.f32.xlu0 %v6744_v62  ;;  %v7908_v62 = vld [vmem:[#allocation29_spill] sm:$0xff]  ;;  %v2537_v1 = vmul.f32 1.442695, %v2461_v17 }
 0x24a   : > { %v2492_v0 = vsub.f32 %v7908_v62, %v2408_v57  ;;  %v6771_v57 = vpop.eup %5332  ;;  %v7913_v17 = vld [vmem:[#allocation33_spill] sm:$0xff] }
 0x24b   : > { %5342 = vpow2.f32 %v2537_v1 }
 0x24c   : > { %v2599_v51 = vmul.f32 1.442695, %v2492_v0 }
 0x24d   : > { %2755 = vadd.xlane.f32.xlu1 %v6748_v29  ;;  %2757 = vadd.xlane.f32.xlu0 %v6752_v26  ;;  %v2444_v59 = vpop.xlane.xlu1 %2443 }
 0x24e   : > { %5344 = vpow2.f32 %v2599_v51 }
 0x24f   : > { %v2410_v25 = vpop.xlane.xlu0 %2409 }
 0x250   : > { %v2493_v6 = vsub.f32 %v6424_v33, %v2410_v25  ;;  %v6775_v33 = vpop.eup %5334  ;;  %v2510_v25 = vsub.f32 %v7913_v17, %v2444_v59 }
 0x251   : > { %2659 = vadd.xlane.f32.xlu1 %v6756_v15  ;;  %2661 = vadd.xlane.f32.xlu0 %v6760_v39  ;;  %7912 = vst [vmem:[#allocation11_spill] sm:$0xff] %v6775_v33  ;;  %v6778_v24 = vpop.eup %5336 }
 0x252   : > { %v2601_v62 = vmul.f32 1.442695, %v2493_v6  ;;  %v2348_v54 = vpop.xlane.xlu1 %2347  ;;  %v6782_v0 = vpop.eup %5338  ;;  %v7914_v6 = vld [vmem:[#allocation35_spill] sm:$0xff] }
 0x253   : > { %v6786_v8 = vpop.eup %5340 }
 0x254   : > { %5346 = vpow2.f32 %v2601_v62 }
 0x255   : > { %2723 = vadd.xlane.f32.xlu1 %v6764_v14  ;;  %2725 = vadd.xlane.f32.xlu0 %v6768_v50  ;;  %5348 = vpow2.f32 %v2571_v53  ;;  %v2635_v50 = vmul.f32 1.442695, %v2510_v25  ;;  %v7915_v14 = vld [vmem:[#allocation34_spill] sm:$0xff]  ;;  %v6790_v62 = vpop.eup %5342 }
 0x256   : > { %v2462_v51 = vsub.f32 %v7915_v14, %v2348_v54  ;;  %7916 = vst [vmem:[#allocation16_spill] sm:$0xff] %v6790_v62  ;;  %v7920_v54 = vld [vmem:[#allocation36_spill] sm:$0xff] }
 0x258   : > { %v2539_v17 = vmul.f32 1.442695, %v2462_v51 }
 0x259   : > { %2695 = vadd.xlane.f32.xlu1 %v6771_v57  ;;  %2697 = vadd.xlane.f32.xlu0 %v6775_v33  ;;  %v6792_v33 = vpop.eup %5344 }
 0x25a   : > { %v2382_v1 = vpop.xlane.xlu0 %2381  ;;  %7917 = vst [vmem:[#allocation13_spill] sm:$0xff] %v6792_v33 }
 0x25b   : > { %v2479_v41 = vsub.f32 %v7914_v6, %v2382_v1 }
 0x25d   : > { %2759 = vadd.xlane.f32.xlu1 %v6778_v24  ;;  %v2573_v59 = vmul.f32 1.442695, %v2479_v41  ;;  %2761 = vadd.xlane.f32.xlu0 %v6782_v0 }
 0x25e   : > { %v6796_v53 = vpop.eup %5346 }
 0x25f   : > { %5350 = vpow2.f32 %v2573_v59  ;;  %7918 = vst [vmem:[#allocation18_spill] sm:$0xff] %v6796_v53  ;;  %v6800_v25 = vpop.eup %5348  ;;  %v7921_v59 = vld [vmem:[#allocation37_spill] sm:$0xff] }
 0x260   : > { %5352 = vpow2.f32 %v2635_v50  ;;  %7919 = vst [vmem:[#allocation15_spill] sm:$0xff] %v6800_v25 }
 0x261   : > { %2663 = vadd.xlane.f32.xlu1 %v6786_v8  ;;  %2665 = vadd.xlane.f32.xlu0 %v6790_v62  ;;  %5354 = vpow2.f32 %v2539_v17 }
 0x265   : > { %v2412_v14 = vpop.xlane.xlu1 %2411  ;;  %2727 = vadd.xlane.f32.xlu1 %v6792_v33  ;;  %2729 = vadd.xlane.f32.xlu0 %v6796_v53 }
 0x266   : > { %v2494_v1 = vsub.f32 %v7920_v54, %v2412_v14 }
 0x268   : > { %v2603_v50 = vmul.f32 1.442695, %v2494_v1 }
 0x269   : > { %v6803_v6 = vpop.eup %5350  ;;  %2699 = vadd.xlane.f32.xlu1 %v6800_v25 }
 0x26a   : > { %v6806_v41 = vpop.eup %5352  ;;  %5356 = vpow2.f32 %v2603_v50  ;;  %2701 = vadd.xlane.f32.xlu0 %v6803_v6 }
 0x26b   : > { %v2446_v51 = vpop.xlane.xlu0 %2445  ;;  %v6811_v53 = vpop.eup %5354 }
 0x26c   : > { %v2511_v17 = vsub.f32 %v7921_v59, %v2446_v51 }
 0x26d   : > { %2763 = vadd.xlane.f32.xlu1 %v6806_v41 }
 0x26e   : > { %v2637_v33 = vmul.f32 1.442695, %v2511_v17 }
 0x270   : > { %5358 = vpow2.f32 %v2637_v33  ;;  %v2384_v14 = vpop.xlane.xlu1 %2383 }
 0x271   : > { %v2480_v54 = vsub.f32 %v6471_v9, %v2384_v14  ;;  %2667 = vadd.xlane.f32.xlu1 %v6811_v53 }
 0x272   : > { %v2350_v1 = vpop.xlane.xlu0 %2349 }
 0x273   : > { %v2575_v25 = vmul.f32 1.442695, %v2480_v54  ;;  %v2463_v50 = vsub.f32 %v6476_v58, %v2350_v1 }
 0x274   : > { %v6816_v62 = vpop.eup %5356 }
 0x275   : > { %5360 = vpow2.f32 %v2575_v25  ;;  %v2541_v51 = vmul.f32 1.442695, %v2463_v50  ;;  %2731 = vadd.xlane.f32.xlu1 %v6816_v62 }
 0x277   : > { %5362 = vpow2.f32 %v2541_v51 }
 0x279   : > { %v2448_v59 = vpop.xlane.xlu1 %2447 }
 0x27a   : > { %v6819_v17 = vpop.eup %5358  ;;  %v2512_v33 = vsub.f32 %v6490_v13, %v2448_v59 }
 0x27b   : > { %2765 = vadd.xlane.f32.xlu0 %v6819_v17 }
 0x27c   : > { %v2639_v9 = vmul.f32 1.442695, %v2512_v33 }
 0x27e   : > { %5364 = vpow2.f32 %v2639_v9 }
 0x27f   : > { %v6823_v14 = vpop.eup %5360 }
 0x280   : > { %2703 = vadd.xlane.f32.xlu1 %v6823_v14 }
 0x281   : > { %v6826_v58 = vpop.eup %5362 }
 0x282   : > { %7922 = vst [vmem:[#allocation20_spill] sm:$0xff] %v6826_v58  ;;  %v2414_v25 = vpop.xlane.xlu0 %2413  ;;  %2669 = vadd.xlane.f32.xlu0 %v6826_v58 }
 0x283   : > { %v2495_v54 = vsub.f32 %v6502_v12, %v2414_v25 }
 0x285   : > { %v2605_v1 = vmul.f32 1.442695, %v2495_v54 }
 0x286   : > { %v2642_v50 = vpop.xlane.xlu0 %2641 }
 0x287   : > { %5366 = vpow2.f32 %v2605_v1 }
 0x288   : > { %v6831_v13 = vpop.eup %5364  ;;  %5368 = vrcp.f32 %v2642_v50 }
 0x289   : > { %2767 = vadd.xlane.f32.xlu1 %v6831_v13 }
 0x28a   : > { %v2674_v51 = vpop.xlane.xlu0 %2673 }
 0x28b   : > { %5370 = vrcp.f32 %v2674_v51 }
 0x28c   : > { %v2352_v59 = vpop.xlane.xlu1 %2351 }
 0x28d   : > { %v2464_v33 = vsub.f32 %v6533_v46, %v2352_v59 }
 0x28e   : > { %v2738_v9 = vpop.xlane.xlu0 %2737 }
 0x28f   : > { %v2543_v58 = vmul.f32 1.442695, %v2464_v33  ;;  %5372 = vrcp.f32 %v2738_v9 }
 0x291   : > { %v6835_v12 = vpop.eup %5366  ;;  %5374 = vpow2.f32 %v2543_v58 }
 0x292   : > { %7923 = vst [vmem:[#allocation17_spill] sm:$0xff] %v6835_v12  ;;  %v5369_v25 = vpop.eup %5368  ;;  %v2416_v54 = vpop.xlane.xlu1 %2415  ;;  %2733 = vadd.xlane.f32.xlu0 %v6835_v12 }
 0x293   : > { %v2706_v1 = vpop.xlane.xlu0 %2705  ;;  %v2496_v46 = vsub.f32 %v6549_v11, %v2416_v54  ;;  %v6845_v50 = vmul.f32 %v5369_v25, %v6513_v60 }
 0x294   : > { %5376 = vrcp.f32 %v2706_v1 }
 0x295   : > { %7924 = vst [vmem:[#allocation22_spill] sm:$0xff] %v6845_v50  ;;  %v5371_v51 = vpop.eup %5370  ;;  %v2607_v58 = vmul.f32 1.442695, %v2496_v46  ;;  %2897 = vst [vmem:[%s6841_s16] sm:$0xff] %v6845_v50 }
 0x296   : > { %v2676_v59 = vpop.xlane.xlu1 %2675  ;;  %v6850_v9 = vmul.f32 %v5371_v51, %v6522_v18 }
 0x297   : > { %v2678_v33 = vpop.xlane.xlu0 %2677  ;;  %5378 = vpow2.f32 %v2607_v58 }
 0x298   : > { %7925 = vst [vmem:[#allocation19_spill] sm:$0xff] %v6850_v9  ;;  %5380 = vrcp.f32 %v2676_v59  ;;  %2913 = vst [vmem:[%s6841_s16 + $0x80] sm:$0xff] %v6850_v9 }
 0x299   : > { %v5373_v12 = vpop.eup %5372  ;;  %5382 = vrcp.f32 %v2678_v33 }
 0x29a   : > { %v2740_v11 = vpop.xlane.xlu1 %2739  ;;  %v6855_v25 = vmul.f32 %v5373_v12, %v6531_v30 }
 0x29b   : > { %v2742_v60 = vpop.xlane.xlu0 %2741  ;;  %v6857_v54 = vpop.eup %5374  ;;  %5384 = vrcp.f32 %v2740_v11 }
 0x29c   : > { %7926 = vst [vmem:[#allocation24_spill] sm:$0xff] %v6855_v25  ;;  %2671 = vadd.xlane.f32.xlu1 %v6857_v54  ;;  %5386 = vrcp.f32 %v2742_v60  ;;  %2945 = vst [vmem:[%s6841_s16 + $0x180] sm:$0xff] %v6855_v25 }
 0x29e   : > { %v5377_v18 = vpop.eup %5376  ;;  %v2644_v1 = vpop.xlane.xlu1 %2643 }
 0x29f   : > { %v2646_v46 = vpop.xlane.xlu0 %2645  ;;  %v6863_v51 = vmul.f32 %v5377_v18, %v6547_v43  ;;  %5388 = vrcp.f32 %v2644_v1 }
 0x2a0   : > { %5390 = vrcp.f32 %v2646_v46 }
 0x2a1   : > { %7927 = vst [vmem:[#allocation21_spill] sm:$0xff] %v6863_v51  ;;  %2929 = vst [vmem:[%s6841_s16 + $0x100] sm:$0xff] %v6863_v51  ;;  %v6867_v30 = vpop.eup %5378 }
 0x2a2   : > { %7928 = vst [vmem:[#allocation26_spill] sm:$0xff] %v6867_v30  ;;  %v5381_v12 = vpop.eup %5380  ;;  %2735 = vadd.xlane.f32.xlu1 %v6867_v30  ;;  %v2708_v58 = vpop.xlane.xlu1 %2707 }
 0x2a3   : > { %v2710_v59 = vpop.xlane.xlu0 %2709  ;;  %v5383_v33 = vpop.eup %5382  ;;  %5392 = vrcp.f32 %v2708_v58  ;;  %v6871_v11 = vmul.f32 %v5381_v12, %v6555_v19 }
 0x2a4   : > { %5394 = vrcp.f32 %v2710_v59  ;;  %v6874_v43 = vmul.f32 %v5383_v33, %v6561_v40 }
 0x2a5   : > { %7929 = vst [vmem:[#allocation23_spill] sm:$0xff] %v6871_v11  ;;  %v5385_v60 = vpop.eup %5384  ;;  %2914 = vst [vmem:[%s6841_s16 + $0x88] sm:$0xff] %v6871_v11  ;;  %v6880_v18 = vpack.c.bf16 %v6871_v11, %v6850_v9 }
 0x2a6   : > { %v5387_v1 = vpop.eup %5386  ;;  %v2680_v46 = vpop.xlane.xlu1 %2679  ;;  %v6883_v30 = vmul.f32 %v5385_v60, %v6569_v37  ;;  %2915 = vst [vmem:[%s6841_s16 + $0x90] sm:$0xff] %v6874_v43 }
 0x2a7   : > { %v2682_v58 = vpop.xlane.xlu0 %2681  ;;  %5396 = vrcp.f32 %v2680_v46  ;;  %4727 = vmatprep.subr.bf16.mxu0 %v6880_v18  ;;  %v6889_v19 = vmul.f32 %v5387_v1, %v6573_v56 }
 0x2a8   : > { %7930 = vst [vmem:[#allocation28_spill] sm:$0xff] %v6883_v30  ;;  %2946 = vst [vmem:[%s6841_s16 + $0x188] sm:$0xff] %v6883_v30  ;;  %v6895_v40 = vpack.c.bf16 %v6883_v30, %v6855_v25  ;;  %5398 = vrcp.f32 %v2682_v58 }
 0x2a9   : > { %7931 = vst [vmem:[#allocation25_spill] sm:$0xff] %v6889_v19  ;;  %v5389_v37 = vpop.eup %5388  ;;  %2947 = vst [vmem:[%s6841_s16 + $0x190] sm:$0xff] %v6889_v19 }
 0x2aa   : > { %v5391_v12 = vpop.eup %5390  ;;  %v2744_v59 = vpop.xlane.xlu1 %2743  ;;  %4759 = vmatprep.subr.bf16.mxu1 %v6895_v40  ;;  %v6901_v33 = vmul.f32 %v5389_v37, %v6581_v22 }
 0x2ab   : > { %v2746_v56 = vpop.xlane.xlu0 %2745  ;;  %5400 = vrcp.f32 %v2744_v59  ;;  %v6904_v60 = vmul.f32 %v5391_v12, %v6587_v23 }
 0x2ac   : > { %7932 = vst [vmem:[#allocation30_spill] sm:$0xff] %v6901_v33  ;;  %2898 = vst [vmem:[%s6841_s16 + $0x8] sm:$0xff] %v6901_v33  ;;  %v6910_v1 = vpack.c.bf16 %v6901_v33, %v6845_v50  ;;  %5402 = vrcp.f32 %v2746_v56 }
 0x2ad   : > { %v5393_v46 = vpop.eup %5392  ;;  %2899 = vst [vmem:[%s6841_s16 + $0x10] sm:$0xff] %v6904_v60 }
 0x2ae   : > { %v5395_v58 = vpop.eup %5394  ;;  %v2648_v22 = vpop.xlane.xlu1 %2647  ;;  %4729 = vmatpush3.bf16.xpose.msra.mxu0 %v6910_v1  ;;  %v6916_v37 = vmul.f32 %v5393_v46, %v6593_v63 }
 0x2af   : > { %v2650_v23 = vpop.xlane.xlu0 %2649  ;;  %5404 = vrcp.f32 %v2648_v22  ;;  %v6919_v12 = vmul.f32 %v5395_v58, %v6599_v2 }
 0x2b0   : > { %7933 = vst [vmem:[#allocation27_spill] sm:$0xff] %v6916_v37  ;;  %2930 = vst [vmem:[%s6841_s16 + $0x108] sm:$0xff] %v6916_v37  ;;  %v6925_v59 = vpack.c.bf16 %v6916_v37, %v6863_v51  ;;  %5406 = vrcp.f32 %v2650_v23 }
 0x2b1   : > { %7934 = vst [vmem:[#allocation32_spill] sm:$0xff] %v6919_v12  ;;  %v5397_v56 = vpop.eup %5396  ;;  %2931 = vst [vmem:[%s6841_s16 + $0x110] sm:$0xff] %v6919_v12 }
 0x2b2   : > { %v5399_v33 = vpop.eup %5398  ;;  %v2712_v63 = vpop.xlane.xlu1 %2711  ;;  %4761 = vmatpush3.bf16.xpose.msra.mxu1 %v6925_v59  ;;  %v6931_v46 = vmul.f32 %v5397_v56, %v6607_v10 }
 0x2b3   : > { %v2714_v2 = vpop.xlane.xlu0 %2713  ;;  %5408 = vrcp.f32 %v2712_v63  ;;  %v6934_v58 = vmul.f32 %v5399_v33, %v6611_v28 }
 0x2b4   : > { %7935 = vst [vmem:[#allocation29_spill] sm:$0xff] %v6931_v46  ;;  %2916 = vst [vmem:[%s6841_s16 + $0x98] sm:$0xff] %v6931_v46  ;;  %v6940_v22 = vpack.c.bf16 %v6931_v46, %v6874_v43  ;;  %5410 = vrcp.f32 %v2714_v2 }
 0x2b5   : > { %v5401_v23 = vpop.eup %5400  ;;  %2917 = vst [vmem:[%s6841_s16 + $0xa0] sm:$0xff] %v6934_v58 }
 0x2b6   : > { %v5403_v37 = vpop.eup %5402  ;;  %v2684_v10 = vpop.xlane.xlu1 %2683  ;;  %4731 = vmatprep.subr.bf16.mxu0 %v6940_v22  ;;  %v6946_v56 = vmul.f32 %v5401_v23, %v6619_v5 }
 0x2b7   : > { %v2686_v28 = vpop.xlane.xlu0 %2685  ;;  %5412 = vrcp.f32 %v2684_v10  ;;  %v6949_v33 = vmul.f32 %v5403_v37, %v6625_v31 }
 0x2b8   : > { %7936 = vst [vmem:[#allocation31_spill] sm:$0xff] %v6946_v56  ;;  %2948 = vst [vmem:[%s6841_s16 + $0x198] sm:$0xff] %v6946_v56  ;;  %v6955_v63 = vpack.c.bf16 %v6946_v56, %v6889_v19  ;;  %5414 = vrcp.f32 %v2686_v28 }
 0x2b9   : > { %7937 = vst [vmem:[#allocation33_spill] sm:$0xff] %v6949_v33  ;;  %v5405_v2 = vpop.eup %5404  ;;  %2949 = vst [vmem:[%s6841_s16 + $0x1a0] sm:$0xff] %v6949_v33 }
 0x2ba   : > { %v5407_v46 = vpop.eup %5406  ;;  %v2748_v5 = vpop.xlane.xlu1 %2747  ;;  %4763 = vmatprep.subr.bf16.mxu1 %v6955_v63  ;;  %v6961_v23 = vmul.f32 %v5405_v2, %v6631_v32 }
 0x2bb   : > { %v2750_v31 = vpop.xlane.xlu0 %2749  ;;  %5416 = vrcp.f32 %v2748_v5  ;;  %v6964_v37 = vmul.f32 %v5407_v46, %v6637_v34  ;;  %v6984_v5 = vld [vmem:[%s7714_s3] sm:$0xf] }
 0x2bc   : > { %7938 = vst [vmem:[#allocation35_spill] sm:$0xff] %v6961_v23  ;;  %2900 = vst [vmem:[%s6841_s16 + $0x18] sm:$0xff] %v6961_v23  ;;  %v6970_v10 = vpack.c.bf16 %v6961_v23, %v6904_v60  ;;  %5418 = vrcp.f32 %v2750_v31  ;;  %4538 = vmatprep.mubr.f32.mxu0 %v6984_v5  ;;  %4572 = vmatprep.mubr.f32.mxu1 %v6984_v5 }
 0x2bd   : > { %v5409_v28 = vpop.eup %5408  ;;  %2901 = vst [vmem:[%s6841_s16 + $0x20] sm:$0xff] %v6964_v37 }
 0x2be   : > { %v5411_v56 = vpop.eup %5410  ;;  %v2652_v32 = vpop.xlane.xlu1 %2651  ;;  %4733 = vmatpush3.bf16.xpose.msra.mxu0 %v6970_v10  ;;  %v6976_v2 = vmul.f32 %v5409_v28, %v6645_v52 }
 0x2bf   : > { %v2654_v34 = vpop.xlane.xlu0 %2653  ;;  %5420 = vrcp.f32 %v2652_v32  ;;  %v6979_v46 = vmul.f32 %v5411_v56, %v6649_v55 }
 0x2c0   : > { %7939 = vst [vmem:[#allocation34_spill] sm:$0xff] %v6976_v2  ;;  %2932 = vst [vmem:[%s6841_s16 + $0x118] sm:$0xff] %v6976_v2  ;;  %v6990_v31 = vpack.c.bf16 %v6976_v2, %v6919_v12  ;;  %5422 = vrcp.f32 %v2654_v34 }
 0x2c1   : > { %v5413_v52 = vpop.eup %5412  ;;  %2933 = vst [vmem:[%s6841_s16 + $0x120] sm:$0xff] %v6979_v46 }
 0x2c2   : > { %v5415_v55 = vpop.eup %5414  ;;  %v2716_v56 = vpop.xlane.xlu1 %2715  ;;  %4765 = vmatpush3.bf16.xpose.msra.mxu1 %v6990_v31  ;;  %v6998_v28 = vmul.f32 %v5413_v52, %v6657_v4 }
 0x2c3   : > { %v2718_v32 = vpop.xlane.xlu0 %2717  ;;  %5424 = vrcp.f32 %v2716_v56  ;;  %v7001_v34 = vmul.f32 %v5415_v55, %v6661_v45 }
 0x2c4   : > { %7940 = vst [vmem:[#allocation36_spill] sm:$0xff] %v6998_v28  ;;  %2918 = vst [vmem:[%s6841_s16 + $0xa8] sm:$0xff] %v6998_v28  ;;  %v7007_v2 = vpack.c.bf16 %v6998_v28, %v6934_v58  ;;  %5426 = vrcp.f32 %v2718_v32 }
 0x2c5   : > { %v5417_v12 = vpop.eup %5416  ;;  %2919 = vst [vmem:[%s6841_s16 + $0xb0] sm:$0xff] %v7001_v34 }
 0x2c6   : > { %v5419_v23 = vpop.eup %5418  ;;  %v2688_v4 = vpop.xlane.xlu1 %2687  ;;  %4735 = vmatprep.subr.bf16.mxu0 %v7007_v2  ;;  %v7013_v52 = vmul.f32 %v5417_v12, %v6668_v49 }
 0x2c7   : > { %v2690_v45 = vpop.xlane.xlu0 %2689  ;;  %5428 = vrcp.f32 %v2688_v4  ;;  %v7016_v55 = vmul.f32 %v5419_v23, %v6675_v61 }
 0x2c8   : > { %7941 = vst [vmem:[#allocation37_spill] sm:$0xff] %v7013_v52  ;;  %2950 = vst [vmem:[%s6841_s16 + $0x1a8] sm:$0xff] %v7013_v52  ;;  %v7022_v56 = vpack.c.bf16 %v7013_v52, %v6949_v33  ;;  %5430 = vrcp.f32 %v2690_v45 }
 0x2c9   : > { %7942 = vst [vmem:[#allocation38_spill] sm:$0xff] %v7016_v55  ;;  %v5421_v32 = vpop.eup %5420  ;;  %2951 = vst [vmem:[%s6841_s16 + $0x1b0] sm:$0xff] %v7016_v55 }
 0x2ca   : > { %v5423_v28 = vpop.eup %5422  ;;  %v2752_v49 = vpop.xlane.xlu1 %2751  ;;  %4767 = vmatprep.subr.bf16.mxu1 %v7022_v56  ;;  %v7028_v12 = vmul.f32 %v5421_v32, %v6682_v38 }
 0x2cb   : > { %v2754_v61 = vpop.xlane.xlu0 %2753  ;;  %5432 = vrcp.f32 %v2752_v49  ;;  %v7031_v23 = vmul.f32 %v5423_v28, %v6686_v7 }
 0x2cc   : > { %7943 = vst [vmem:[#allocation39_spill] sm:$0xff] %v7028_v12  ;;  %2902 = vst [vmem:[%s6841_s16 + $0x28] sm:$0xff] %v7028_v12  ;;  %v7037_v4 = vpack.c.bf16 %v7028_v12, %v6964_v37  ;;  %5434 = vrcp.f32 %v2754_v61 }
 0x2cd   : > { %v5425_v45 = vpop.eup %5424  ;;  %2903 = vst [vmem:[%s6841_s16 + $0x30] sm:$0xff] %v7031_v23 }
 0x2ce   : > { %v5427_v52 = vpop.eup %5426  ;;  %v2656_v38 = vpop.xlane.xlu1 %2655  ;;  %4737 = vmatpush3.bf16.xpose.msra.mxu0 %v7037_v4  ;;  %v7043_v32 = vmul.f32 %v5425_v45, %v6697_v48 }
 0x2cf   : > { %v2658_v7 = vpop.xlane.xlu0 %2657  ;;  %5436 = vrcp.f32 %v2656_v38  ;;  %v7046_v28 = vmul.f32 %v5427_v52, %v6701_v16 }
 0x2d0   : > { %7944 = vst [vmem:[#allocation40_spill] sm:$0xff] %v7043_v32  ;;  %2934 = vst [vmem:[%s6841_s16 + $0x128] sm:$0xff] %v7043_v32  ;;  %v7052_v49 = vpack.c.bf16 %v7043_v32, %v6979_v46  ;;  %5438 = vrcp.f32 %v2658_v7 }
 0x2d1   : > { %7945 = vst [vmem:[#allocation41_spill] sm:$0xff] %v7046_v28  ;;  %v5429_v61 = vpop.eup %5428  ;;  %2935 = vst [vmem:[%s6841_s16 + $0x130] sm:$0xff] %v7046_v28 }
 0x2d2   : > { %v5431_v12 = vpop.eup %5430  ;;  %v2720_v48 = vpop.xlane.xlu1 %2719  ;;  %4769 = vmatpush3.bf16.xpose.msra.mxu1 %v7052_v49  ;;  %v7058_v45 = vmul.f32 %v5429_v61, %v6706_v42 }
 0x2d3   : > { %v2722_v16 = vpop.xlane.xlu0 %2721  ;;  %5440 = vrcp.f32 %v2720_v48  ;;  %v7061_v52 = vmul.f32 %v5431_v12, %v6710_v27 }
 0x2d4   : > { %7946 = vst [vmem:[#allocation42_spill] sm:$0xff] %v7058_v45  ;;  %2920 = vst [vmem:[%s6841_s16 + $0xb8] sm:$0xff] %v7058_v45  ;;  %v7067_v38 = vpack.c.bf16 %v7058_v45, %v7001_v34  ;;  %5442 = vrcp.f32 %v2722_v16 }
 0x2d5   : > { %v5433_v7 = vpop.eup %5432  ;;  %2921 = vst [vmem:[%s6841_s16 + $0xc0] sm:$0xff] %v7061_v52 }
 0x2d6   : > { %v5435_v32 = vpop.eup %5434  ;;  %v2692_v42 = vpop.xlane.xlu1 %2691  ;;  %4739 = vmatprep.subr.bf16.mxu0 %v7067_v38  ;;  %v7073_v61 = vmul.f32 %v5433_v7, %v6715_v36 }
 0x2d7   : > { %v2694_v27 = vpop.xlane.xlu0 %2693  ;;  %5444 = vrcp.f32 %v2692_v42  ;;  %v7076_v12 = vmul.f32 %v5435_v32, %v6719_v21 }
 0x2d8   : > { %7947 = vst [vmem:[#allocation43_spill] sm:$0xff] %v7073_v61  ;;  %2952 = vst [vmem:[%s6841_s16 + $0x1b8] sm:$0xff] %v7073_v61  ;;  %v7082_v48 = vpack.c.bf16 %v7073_v61, %v7016_v55  ;;  %5446 = vrcp.f32 %v2694_v27 }
 0x2d9   : > { %7948 = vst [vmem:[#allocation44_spill] sm:$0xff] %v7076_v12  ;;  %v5437_v16 = vpop.eup %5436  ;;  %2953 = vst [vmem:[%s6841_s16 + $0x1c0] sm:$0xff] %v7076_v12 }
 0x2da   : > { %v5439_v45 = vpop.eup %5438  ;;  %v2756_v36 = vpop.xlane.xlu1 %2755  ;;  %4771 = vmatprep.subr.bf16.mxu1 %v7082_v48  ;;  %v7088_v7 = vmul.f32 %v5437_v16, %v6724_v47 }
 0x2db   : > { %v2758_v21 = vpop.xlane.xlu0 %2757  ;;  %5448 = vrcp.f32 %v2756_v36  ;;  %v7091_v32 = vmul.f32 %v5439_v45, %v6728_v44 }
 0x2dc   : > { %7949 = vst [vmem:[#allocation45_spill] sm:$0xff] %v7088_v7  ;;  %2904 = vst [vmem:[%s6841_s16 + $0x38] sm:$0xff] %v7088_v7  ;;  %v7097_v42 = vpack.c.bf16 %v7088_v7, %v7031_v23  ;;  %5450 = vrcp.f32 %v2758_v21 }
 0x2dd   : > { %7950 = vst [vmem:[#allocation46_spill] sm:$0xff] %v7091_v32  ;;  %v5441_v27 = vpop.eup %5440  ;;  %2905 = vst [vmem:[%s6841_s16 + $0x40] sm:$0xff] %v7091_v32 }
 0x2de   : > { %v5443_v61 = vpop.eup %5442  ;;  %v2660_v47 = vpop.xlane.xlu1 %2659  ;;  %4741 = vmatpush3.bf16.xpose.msra.mxu0 %v7097_v42  ;;  %v7103_v16 = vmul.f32 %v5441_v27, %v6732_v3 }
 0x2df   : > { %v2662_v44 = vpop.xlane.xlu0 %2661  ;;  %5452 = vrcp.f32 %v2660_v47  ;;  %v7106_v45 = vmul.f32 %v5443_v61, %v6736_v35  ;;  %v7954_v61 = vld [vmem:[#allocation12_spill] sm:$0xff] }
 0x2e0   : > { %7951 = vst [vmem:[#allocation47_spill] sm:$0xff] %v7103_v16  ;;  %2936 = vst [vmem:[%s6841_s16 + $0x138] sm:$0xff] %v7103_v16  ;;  %v7112_v36 = vpack.c.bf16 %v7103_v16, %v7046_v28  ;;  %5454 = vrcp.f32 %v2662_v44 }
 0x2e1   : > { %7952 = vst [vmem:[#allocation48_spill] sm:$0xff] %v7106_v45  ;;  %v5445_v21 = vpop.eup %5444  ;;  %2937 = vst [vmem:[%s6841_s16 + $0x140] sm:$0xff] %v7106_v45 }
 0x2e2   : > { %v5447_v7 = vpop.eup %5446  ;;  %v2724_v3 = vpop.xlane.xlu1 %2723  ;;  %4773 = vmatpush3.bf16.xpose.msra.mxu1 %v7112_v36  ;;  %v7118_v27 = vmul.f32 %v5445_v21, %v6740_v20 }
 0x2e3   : > { %v2726_v35 = vpop.xlane.xlu0 %2725  ;;  %5456 = vrcp.f32 %v2724_v3  ;;  %v7121_v47 = vmul.f32 %v5447_v7, %v7954_v61 }
 0x2e4   : > { %7953 = vst [vmem:[#allocation49_spill] sm:$0xff] %v7118_v27  ;;  %2922 = vst [vmem:[%s6841_s16 + $0xc8] sm:$0xff] %v7118_v27  ;;  %v7127_v44 = vpack.c.bf16 %v7118_v27, %v7061_v52  ;;  %5458 = vrcp.f32 %v2726_v35 }
 0x2e5   : > { %7955 = vst [vmem:[#allocation12_spill] sm:$0xff] %v7121_v47  ;;  %v5449_v16 = vpop.eup %5448  ;;  %2923 = vst [vmem:[%s6841_s16 + $0xd0] sm:$0xff] %v7121_v47 }
 0x2e6   : > { %v5451_v28 = vpop.eup %5450  ;;  %v2696_v20 = vpop.xlane.xlu1 %2695  ;;  %4743 = vmatprep.subr.bf16.mxu0 %v7127_v44  ;;  %v7133_v21 = vmul.f32 %v5449_v16, %v6748_v29 }
 0x2e7   : > { %v2698_v7 = vpop.xlane.xlu0 %2697  ;;  %5460 = vrcp.f32 %v2696_v20  ;;  %v7136_v3 = vmul.f32 %v5451_v28, %v6752_v26 }
 0x2e8   : > { %7956 = vst [vmem:[#allocation50_spill] sm:$0xff] %v7133_v21  ;;  %2954 = vst [vmem:[%s6841_s16 + $0x1c8] sm:$0xff] %v7133_v21  ;;  %v7142_v35 = vpack.c.bf16 %v7133_v21, %v7076_v12  ;;  %5462 = vrcp.f32 %v2698_v7 }
 0x2e9   : > { %7957 = vst [vmem:[#allocation51_spill] sm:$0xff] %v7136_v3  ;;  %v5453_v61 = vpop.eup %5452  ;;  %2955 = vst [vmem:[%s6841_s16 + $0x1d0] sm:$0xff] %v7136_v3 }
 0x2ea   : > { %v5455_v27 = vpop.eup %5454  ;;  %v2760_v29 = vpop.xlane.xlu1 %2759  ;;  %4775 = vmatprep.subr.bf16.mxu1 %v7142_v35  ;;  %v7148_v16 = vmul.f32 %v5453_v61, %v6756_v15  ;;  %v7960_v61 = vld [vmem:[#allocation10_spill] sm:$0xff] }
 0x2eb   : > { %v2762_v26 = vpop.xlane.xlu0 %2761  ;;  %5464 = vrcp.f32 %v2760_v29  ;;  %v7151_v28 = vmul.f32 %v5455_v27, %v6760_v39  ;;  %v7962_v27 = vld [vmem:[#allocation14_spill] sm:$0xff] }
 0x2ec   : > { %7958 = vst [vmem:[#allocation52_spill] sm:$0xff] %v7148_v16  ;;  %2906 = vst [vmem:[%s6841_s16 + $0x48] sm:$0xff] %v7148_v16  ;;  %v7157_v20 = vpack.c.bf16 %v7148_v16, %v7091_v32  ;;  %5466 = vrcp.f32 %v2762_v26 }
 0x2ed   : > { %7959 = vst [vmem:[#allocation53_spill] sm:$0xff] %v7151_v28  ;;  %v5457_v7 = vpop.eup %5456  ;;  %2907 = vst [vmem:[%s6841_s16 + $0x50] sm:$0xff] %v7151_v28 }
 0x2ee   : > { %v5459_v21 = vpop.eup %5458  ;;  %v2664_v15 = vpop.xlane.xlu1 %2663  ;;  %4745 = vmatpush3.bf16.xpose.msra.mxu0 %v7157_v20  ;;  %v7163_v29 = vmul.f32 %v5457_v7, %v7960_v61  ;;  %v7964_v61 = vld [vmem:[#allocation11_spill] sm:$0xff] }
 0x2ef   : > { %v2666_v39 = vpop.xlane.xlu0 %2665  ;;  %5468 = vrcp.f32 %v2664_v15  ;;  %v7166_v12 = vmul.f32 %v5459_v21, %v7962_v27 }
 0x2f0   : > { %7961 = vst [vmem:[#allocation10_spill] sm:$0xff] %v7163_v29  ;;  %2938 = vst [vmem:[%s6841_s16 + $0x148] sm:$0xff] %v7163_v29  ;;  %v7172_v26 = vpack.c.bf16 %v7163_v29, %v7106_v45  ;;  %5470 = vrcp.f32 %v2666_v39 }
 0x2f1   : > { %v5461_v16 = vpop.eup %5460  ;;  %2939 = vst [vmem:[%s6841_s16 + $0x150] sm:$0xff] %v7166_v12 }
 0x2f2   : > { %v5463_v32 = vpop.eup %5462  ;;  %v2728_v7 = vpop.xlane.xlu1 %2727  ;;  %4777 = vmatpush3.bf16.xpose.msra.mxu1 %v7172_v26  ;;  %v7178_v15 = vmul.f32 %v5461_v16, %v6771_v57 }
 0x2f3   : > { %v2730_v21 = vpop.xlane.xlu0 %2729  ;;  %5472 = vrcp.f32 %v2728_v7  ;;  %v7181_v27 = vmul.f32 %v5463_v32, %v7964_v61 }
 0x2f4   : > { %7963 = vst [vmem:[#allocation14_spill] sm:$0xff] %v7178_v15  ;;  %2924 = vst [vmem:[%s6841_s16 + $0xd8] sm:$0xff] %v7178_v15  ;;  %v7187_v39 = vpack.c.bf16 %v7178_v15, %v7121_v47  ;;  %5474 = vrcp.f32 %v2730_v21 }
 0x2f5   : > { %v5465_v29 = vpop.eup %5464  ;;  %2925 = vst [vmem:[%s6841_s16 + $0xe0] sm:$0xff] %v7181_v27 }
 0x2f6   : > { %v5467_v45 = vpop.eup %5466  ;;  %v2700_v57 = vpop.xlane.xlu1 %2699  ;;  %4747 = vmatprep.subr.bf16.mxu0 %v7187_v39  ;;  %v7193_v16 = vmul.f32 %v5465_v29, %v6778_v24 }
 0x2f7   : > { %5476 = vrcp.f32 %v2700_v57  ;;  %v2702_v32 = vpop.xlane.xlu0 %2701  ;;  %v7196_v7 = vmul.f32 %v5467_v45, %v6782_v0  ;;  %v7968_v0 = vld [vmem:[#allocation16_spill] sm:$0xff] }
 0x2f8   : > { %7965 = vst [vmem:[#allocation11_spill] sm:$0xff] %v7193_v16  ;;  %2956 = vst [vmem:[%s6841_s16 + $0x1d8] sm:$0xff] %v7193_v16  ;;  %v7202_v21 = vpack.c.bf16 %v7193_v16, %v7136_v3  ;;  %5478 = vrcp.f32 %v2702_v32 }
 0x2f9   : > { %7966 = vst [vmem:[#allocation54_spill] sm:$0xff] %v7196_v7  ;;  %v5469_v61 = vpop.eup %5468  ;;  %2957 = vst [vmem:[%s6841_s16 + $0x1e0] sm:$0xff] %v7196_v7 }
 0x2fa   : > { %v5471_v15 = vpop.eup %5470  ;;  %v2764_v24 = vpop.xlane.xlu1 %2763  ;;  %4779 = vmatprep.subr.bf16.mxu1 %v7202_v21  ;;  %v7208_v29 = vmul.f32 %v5469_v61, %v6786_v8  ;;  %v7969_v8 = vld [vmem:[#allocation13_spill] sm:$0xff] }
 0x2fb   : > { %5480 = vrcp.f32 %v2764_v24  ;;  %v7211_v45 = vmul.f32 %v5471_v15, %v7968_v0  ;;  %v7971_v15 = vld [vmem:[#allocation18_spill] sm:$0xff] }
 0x2fc   : > { %7967 = vst [vmem:[#allocation55_spill] sm:$0xff] %v7208_v29  ;;  %2908 = vst [vmem:[%s6841_s16 + $0x58] sm:$0xff] %v7208_v29  ;;  %v7217_v57 = vpack.c.bf16 %v7208_v29, %v7151_v28 }
 0x2fd   : > { %v5473_v32 = vpop.eup %5472  ;;  %2909 = vst [vmem:[%s6841_s16 + $0x60] sm:$0xff] %v7211_v45 }
 0x2fe   : > { %v5475_v16 = vpop.eup %5474  ;;  %v2668_v3 = vpop.xlane.xlu1 %2667  ;;  %4749 = vmatpush3.bf16.xpose.msra.mxu0 %v7217_v57  ;;  %v7223_v61 = vmul.f32 %v5473_v32, %v7969_v8  ;;  %v7973_v32 = vld [vmem:[#allocation15_spill] sm:$0xff] }
 0x2ff   : > { %5482 = vrcp.f32 %v2668_v3  ;;  %v7226_v24 = vmul.f32 %v5475_v16, %v7971_v15 }
 0x300   : > { %7970 = vst [vmem:[#allocation16_spill] sm:$0xff] %v7223_v61  ;;  %2940 = vst [vmem:[%s6841_s16 + $0x158] sm:$0xff] %v7223_v61  ;;  %v7232_v0 = vpack.c.bf16 %v7223_v61, %v7166_v12 }
 0x301   : > { %7972 = vst [vmem:[#allocation13_spill] sm:$0xff] %v7226_v24  ;;  %v5477_v29 = vpop.eup %5476  ;;  %2941 = vst [vmem:[%s6841_s16 + $0x160] sm:$0xff] %v7226_v24 }
 0x302   : > { %v5479_v28 = vpop.eup %5478  ;;  %v2732_v47 = vpop.xlane.xlu1 %2731  ;;  %4781 = vmatpush3.bf16.xpose.msra.mxu1 %v7232_v0  ;;  %v7238_v8 = vmul.f32 %v5477_v29, %v7973_v32 }
 0x303   : > { %5484 = vrcp.f32 %v2732_v47  ;;  %v7241_v3 = vmul.f32 %v5479_v28, %v6803_v6 }
 0x304   : > { %2926 = vst [vmem:[%s6841_s16 + $0xe8] sm:$0xff] %v7238_v8  ;;  %v7247_v16 = vpack.c.bf16 %v7238_v8, %v7181_v27 }
 0x305   : > { %7974 = vst [vmem:[#allocation18_spill] sm:$0xff] %v7241_v3  ;;  %v5481_v15 = vpop.eup %5480  ;;  %2927 = vst [vmem:[%s6841_s16 + $0xf0] sm:$0xff] %v7241_v3 }
 0x306   : > { %4751 = vmatprep.subr.bf16.mxu0 %v7247_v16  ;;  %v7253_v61 = vmul.f32 %v5481_v15, %v6806_v41 }
 0x308   : > { %7975 = vst [vmem:[#allocation15_spill] sm:$0xff] %v7253_v61  ;;  %v2766_v29 = vpop.xlane.xlu0 %2765  ;;  %2958 = vst [vmem:[%s6841_s16 + $0x1e8] sm:$0xff] %v7253_v61  ;;  %v7259_v6 = vpack.c.bf16 %v7253_v61, %v7196_v7 }
 0x309   : > { %v5483_v47 = vpop.eup %5482  ;;  %5486 = vrcp.f32 %v2766_v29 }
 0x30a   : > { %4783 = vmatprep.subr.bf16.mxu1 %v7259_v6  ;;  %v7263_v28 = vmul.f32 %v5483_v47, %v6811_v53 }
 0x30c   : > { %7976 = vst [vmem:[#allocation56_spill] sm:$0xff] %v7263_v28  ;;  %2910 = vst [vmem:[%s6841_s16 + $0x68] sm:$0xff] %v7263_v28  ;;  %v7269_v41 = vpack.c.bf16 %v7263_v28, %v7211_v45 }
 0x30d   : > { %v5485_v32 = vpop.eup %5484  ;;  %v2704_v15 = vpop.xlane.xlu1 %2703 }
 0x30e   : > { %5488 = vrcp.f32 %v2704_v15  ;;  %4753 = vmatpush3.bf16.xpose.msra.mxu0 %v7269_v41  ;;  %v7273_v29 = vmul.f32 %v5485_v32, %v6816_v62 }
 0x30f   : > { %v2670_v61 = vpop.xlane.xlu0 %2669 }
 0x310   : > { %7977 = vst [vmem:[#allocation57_spill] sm:$0xff] %v7273_v29  ;;  %5490 = vrcp.f32 %v2670_v61  ;;  %2942 = vst [vmem:[%s6841_s16 + $0x168] sm:$0xff] %v7273_v29  ;;  %v7279_v53 = vpack.c.bf16 %v7273_v29, %v7226_v24  ;;  %v7980_v24 = vld [vmem:[#allocation20_spill] sm:$0xff] }
 0x312   : > { %4785 = vmatpush3.bf16.xpose.msra.mxu1 %v7279_v53 }
 0x313   : > { %v5487_v47 = vpop.eup %5486 }
 0x314   : > { %v7283_v15 = vmul.f32 %v5487_v47, %v6819_v17 }
 0x316   : > { %7978 = vst [vmem:[#allocation58_spill] sm:$0xff] %v7283_v15  ;;  %v2768_v28 = vpop.xlane.xlu1 %2767  ;;  %2959 = vst [vmem:[%s6841_s16 + $0x1f0] sm:$0xff] %v7283_v15 }
 0x317   : > { %5492 = vrcp.f32 %v2768_v28 }
 0x318   : > { %v5489_v62 = vpop.eup %5488 }
 0x319   : > { %v7288_v61 = vmul.f32 %v5489_v62, %v6823_v14 }
 0x31a   : > { %v5491_v32 = vpop.eup %5490 }
 0x31b   : > { %7979 = vst [vmem:[#allocation59_spill] sm:$0xff] %v7288_v61  ;;  %2928 = vst [vmem:[%s6841_s16 + $0xf8] sm:$0xff] %v7288_v61  ;;  %v7294_v29 = vpack.c.bf16 %v7288_v61, %v7241_v3  ;;  %v7297_v17 = vmul.f32 %v5491_v32, %v7980_v24  ;;  %v7983_v61 = vld [vmem:[#allocation17_spill] sm:$0xff] }
 0x31d   : > { %7981 = vst [vmem:[#allocation20_spill] sm:$0xff] %v7297_v17  ;;  %4755 = vmatprep.subr.bf16.mxu0 %v7294_v29  ;;  %2911 = vst [vmem:[%s6841_s16 + $0x70] sm:$0xff] %v7297_v17 }
 0x31f   : > { %v2734_v28 = vpop.xlane.xlu0 %2733 }
 0x320   : > { %5494 = vrcp.f32 %v2734_v28 }
 0x321   : > { %v5493_v14 = vpop.eup %5492 }
 0x322   : > { %v7303_v47 = vmul.f32 %v5493_v14, %v6831_v13 }
 0x324   : > { %7982 = vst [vmem:[#allocation60_spill] sm:$0xff] %v7303_v47  ;;  %2960 = vst [vmem:[%s6841_s16 + $0x1f8] sm:$0xff] %v7303_v47  ;;  %v7309_v62 = vpack.c.bf16 %v7303_v47, %v7283_v15 }
 0x326   : > { %4787 = vmatprep.subr.bf16.mxu1 %v7309_v62 }
 0x329   : > { %v2672_v24 = vpop.xlane.xlu1 %2671 }
 0x32a   : > { %v5495_v32 = vpop.eup %5494  ;;  %5496 = vrcp.f32 %v2672_v24 }
 0x32b   : > { %v7313_v3 = vmul.f32 %v5495_v32, %v7983_v61  ;;  %v7986_v61 = vld [vmem:[#allocation26_spill] sm:$0xff] }
 0x32d   : > { %7984 = vst [vmem:[#allocation17_spill] sm:$0xff] %v7313_v3  ;;  %2943 = vst [vmem:[%s6841_s16 + $0x170] sm:$0xff] %v7313_v3 }
 0x32f   : > { %v2736_v13 = vpop.xlane.xlu1 %2735 }
 0x330   : > { %5498 = vrcp.f32 %v2736_v13 }
 0x334   : > { %v5497_v28 = vpop.eup %5496 }
 0x335   : > { %v7318_v14 = vmul.f32 %v5497_v28, %v6857_v54 }
 0x337   : > { %7985 = vst [vmem:[#allocation61_spill] sm:$0xff] %v7318_v14  ;;  %2912 = vst [vmem:[%s6841_s16 + $0x78] sm:$0xff] %v7318_v14  ;;  %v7324_v47 = vpack.c.bf16 %v7318_v14, %v7297_v17 }
 0x339   : > { %4757 = vmatpush3.bf16.xpose.msra.mxu0 %v7324_v47 }
 0x33a   : > { %v5499_v24 = vpop.eup %5498 }
 0x33b   : > { %v7328_v32 = vmul.f32 %v5499_v24, %v7986_v61 }
 0x33d   : > { %7987 = vst [vmem:[#allocation26_spill] sm:$0xff] %v7328_v32  ;;  %2944 = vst [vmem:[%s6841_s16 + $0x178] sm:$0xff] %v7328_v32  ;;  %v7334_v13 = vpack.c.bf16 %v7328_v32, %v7313_v3 }
 0x33f   : > { %4789 = vmatpush3.bf16.xpose.msra.mxu1 %v7334_v13 }
 0x340   : > { %4539 = vmatmul.mubr.f32.vlgmr.msra.gmra.mrb[0].mxu0 %v6984_v5 }
 0x346   : > { %4573 = vmatmul.mubr.f32.vlgmr.msra.gmra.mrb[0].mxu1 %v6984_v5  ;;  %v5727_v5 = vmov (!%p4437_p5), 0.0  }
 0x347   : > { %3118 = vst [vmem:[%s5926_s28] sm:$0xff] (!%p4437_p5), %v5727_v5  ;;  %3120 = vst [vmem:[%s5931_s21] sm:$0xff] (!%p4437_p5), %v5727_v5 }
 0x348   : > { %3122 = vst [vmem:[%s6691_s24] sm:$0xff] (!%p4437_p5), %v5727_v5  ;;  %3119 = vst [vmem:[%s5926_s28 + $0x8] sm:$0xff] (!%p4437_p5), %v5727_v5 }
 0x349   : > { %3121 = vst [vmem:[%s5931_s21 + $0x8] sm:$0xff] (!%p4437_p5), %v5727_v5 }
 0x413   : > { %v3028_v54 = vpop.f32.mrb[0].mxu0 }
 0x414   : > { %v3030_v28 = vpop.f32.mrb[1].mxu0 }
 0x415   : > { %v3108_v24 = vcombine.low %v3028_v54, %v3030_v28 }
 0x417   : > { %3112 = vst [vmem:[%s436_s29] sm:$0xff] %v3108_v24  ;;  %3117 = sbr.rel (%p4437_p5) target bundleno = 1054 (0x41e), region = 63 }
 0x419   : > { %v3099_v61 = vpop.f32.mrb[0].mxu1 }
 0x41a   : > { %v3101_v32 = vpop.f32.mrb[1].mxu1 }
 0x41b   : > { %v3109_v3 = vcombine.low %v3099_v61, %v3101_v32 }
 0x41d   : > { %3113 = vst [vmem:[%s436_s29 + $0x8] sm:$0xff] %v3109_v3 }
 0x41e PF: > { %4791 = vmatprep.subr.bf16.mxu0 %v6880_v18  ;;  %4823 = vmatprep.subr.bf16.mxu1 %v6895_v40  ;;  %v7356_v3 = vld [vmem:[%s7345_s20 + $0x8] sm:$0xff]  ;;  %v7359_v32 = vld [vmem:[%s7345_s20 + $0x18] sm:$0xff]  ;;  %v3303_v54 = vsub.f32 1.0, %v6850_v9  ;;  %v3304_v28 = vsub.f32 1.0, %v6871_v11  ;;  %v3335_v24 = vsub.f32 1.0, %v6855_v25  ;;  %v3336_v61 = vsub.f32 1.0, %v6883_v30 }
 0x41f   : > { %4793 = vmatpush3.bf16.msra.mxu0 %v6910_v1  ;;  %4825 = vmatpush3.bf16.msra.mxu1 %v6925_v59  ;;  %v3287_v18 = vsub.f32 1.0, %v6845_v50  ;;  %v7988_v5 = vld [vmem:[#allocation30_spill] sm:$0xff]  ;;  %v3319_v14 = vsub.f32 1.0, %v6863_v51  ;;  %v7989_v25 = vld [vmem:[#allocation27_spill] sm:$0xff]  ;;  %v3305_v51 = vsub.f32 1.0, %v6874_v43 }
 0x420   : > { %v3288_v40 = vsub.f32 1.0, %v7988_v5  ;;  %4795 = vmatprep.subr.bf16.mxu0 %v6940_v22  ;;  %4827 = vmatprep.subr.bf16.mxu1 %v6955_v63  ;;  %v3367_v9 = vmax.f32 %v3303_v54, 1e-30  ;;  %v3368_v11 = vmax.f32 %v3304_v28, 1e-30  ;;  %v3320_v50 = vsub.f32 1.0, %v7989_v25 }
 0x421   : > { %v3399_v17 = vmax.f32 %v3335_v24, 1e-30  ;;  %3197 = vmatprep.mubr.f32.mxu0 %v7356_v3  ;;  %3272 = vmatprep.mubr.f32.mxu1 %v7359_v32  ;;  %v3400_v1 = vmax.f32 %v3336_v61, 1e-30  ;;  %v3351_v59 = vmax.f32 %v3287_v18, 1e-30 }
 0x422   : > { %v3352_v30 = vmax.f32 %v3288_v40, 1e-30  ;;  %5500 = vlog2.f32 %v3367_v9  ;;  %v3383_v5 = vmax.f32 %v3319_v14, 1e-30  ;;  %v7990_v22 = vld [vmem:[#allocation29_spill] sm:$0xff]  ;;  %v3337_v54 = vsub.f32 1.0, %v6889_v19 }
 0x423   : > { %4797 = vmatpush3.bf16.msra.mxu0 %v6970_v10  ;;  %4829 = vmatpush3.bf16.msra.mxu1 %v6990_v31  ;;  %5502 = vlog2.f32 %v3368_v11  ;;  %v3306_v63 = vsub.f32 1.0, %v7990_v22  ;;  %v7991_v28 = vld [vmem:[#allocation31_spill] sm:$0xff]  ;;  %v3384_v9 = vmax.f32 %v3320_v50, 1e-30  ;;  %v3369_v14 = vmax.f32 %v3305_v51, 1e-30 }
 0x424   : > { %v3338_v24 = vsub.f32 1.0, %v7991_v28  ;;  %4799 = vmatprep.subr.bf16.mxu0 %v7007_v2  ;;  %4831 = vmatprep.subr.bf16.mxu1 %v7022_v56  ;;  %5504 = vlog2.f32 %v3399_v17  ;;  %v3289_v61 = vsub.f32 1.0, %v6904_v60  ;;  %v3401_v18 = vmax.f32 %v3337_v54, 1e-30  ;;  %v7992_v11 = vld [vmem:[#allocation35_spill] sm:$0xff]  ;;  %v7993_v19 = vld [vmem:[#allocation32_spill] sm:$0xff] }
 0x425   : > { %5506 = vlog2.f32 %v3400_v1  ;;  %v3370_v10 = vmax.f32 %v3306_v63, 1e-30  ;;  %v3290_v40 = vsub.f32 1.0, %v7992_v11  ;;  %v3321_v22 = vsub.f32 1.0, %v7993_v19  ;;  %v7994_v2 = vld [vmem:[#allocation34_spill] sm:$0xff]  ;;  %v7995_v56 = vld [vmem:[#allocation36_spill] sm:$0xff] }
 0x426   : > { %v3402_v31 = vmax.f32 %v3338_v24, 1e-30  ;;  %5508 = vlog2.f32 %v3351_v59  ;;  %v3353_v25 = vmax.f32 %v3289_v61, 1e-30  ;;  %v3322_v50 = vsub.f32 1.0, %v7994_v2 }
 0x427   : > { %4801 = vmatpush3.bf16.msra.mxu0 %v7037_v4  ;;  %4833 = vmatpush3.bf16.msra.mxu1 %v7052_v49  ;;  %5510 = vlog2.f32 %v3352_v30  ;;  %v3307_v51 = vsub.f32 1.0, %v6934_v58  ;;  %v3308_v17 = vsub.f32 1.0, %v7995_v56  ;;  %v3354_v1 = vmax.f32 %v3290_v40, 1e-30  ;;  %v7996_v30 = vld [vmem:[#allocation37_spill] sm:$0xff] }
 0x428   : > { %4803 = vmatprep.subr.bf16.mxu0 %v7067_v38  ;;  %4835 = vmatprep.subr.bf16.mxu1 %v7082_v48  ;;  %5512 = vlog2.f32 %v3383_v5  ;;  %v3385_v59 = vmax.f32 %v3321_v22, 1e-30  ;;  %v3339_v63 = vsub.f32 1.0, %v6949_v33  ;;  %v3386_v4 = vmax.f32 %v3322_v50, 1e-30  ;;  %v7997_v38 = vld [vmem:[#allocation39_spill] sm:$0xff] }
 0x429   : > { %5514 = vlog2.f32 %v3384_v9  ;;  %v3371_v54 = vmax.f32 %v3307_v51, 1e-30  ;;  %v3372_v49 = vmax.f32 %v3308_v17, 1e-30  ;;  %v3340_v24 = vsub.f32 1.0, %v7996_v30  ;;  %v7998_v22 = vld [vmem:[#allocation40_spill] sm:$0xff] }
 0x42a   : > { %5516 = vlog2.f32 %v3369_v14  ;;  %v3403_v61 = vmax.f32 %v3339_v63, 1e-30  ;;  %v3291_v28 = vsub.f32 1.0, %v6964_v37  ;;  %v3292_v48 = vsub.f32 1.0, %v7997_v38 }
 0x42b   : > { %4805 = vmatpush3.bf16.msra.mxu0 %v7097_v42  ;;  %4837 = vmatpush3.bf16.msra.mxu1 %v7112_v36  ;;  %5518 = vlog2.f32 %v3370_v10  ;;  %v3323_v5 = vsub.f32 1.0, %v6979_v46  ;;  %v3324_v9 = vsub.f32 1.0, %v7998_v22  ;;  %v3404_v14 = vmax.f32 %v3340_v24, 1e-30 }
 0x42c   : > { %v5501_v40 = vpop.eup %5500  ;;  %4807 = vmatprep.subr.bf16.mxu0 %v7127_v44  ;;  %4839 = vmatprep.subr.bf16.mxu1 %v7142_v35  ;;  %5520 = vlog2.f32 %v3401_v18  ;;  %v3355_v50 = vmax.f32 %v3291_v28, 1e-30  ;;  %v3309_v51 = vsub.f32 1.0, %v7001_v34  ;;  %v3356_v36 = vmax.f32 %v3292_v48, 1e-30  ;;  %v7999_v44 = vld [vmem:[#allocation42_spill] sm:$0xff] }
 0x42d   : > { %v5503_v42 = vpop.eup %5502  ;;  %v7404_v17 = vmul.f32 0.6931472, %v5501_v40  ;;  %5522 = vlog2.f32 %v3402_v31  ;;  %v7406_v10 = vmax.f32 %v3323_v5, 1e-30  ;;  %v7410_v33 = vmax.f32 %v3324_v9, 1e-30 }
 0x42e   : > { %v5505_v63 = vpop.eup %5504  ;;  %v7408_v30 = vmul.f32 0.6931472, %v5503_v42  ;;  %5524 = vlog2.f32 %v3353_v25  ;;  %v3310_v35 = vsub.f32 1.0, %v7999_v44  ;;  %v7417_v31 = vmax.f32 %v3309_v51, 1e-30 }
 0x42f   : > { %v5507_v18 = vpop.eup %5506  ;;  %4809 = vmatpush3.bf16.msra.mxu0 %v7157_v20  ;;  %4841 = vmatpush3.bf16.msra.mxu1 %v7172_v26  ;;  %v7415_v28 = vmul.f32 0.6931472, %v5505_v63  ;;  %5526 = vlog2.f32 %v3354_v1  ;;  %v3341_v24 = vsub.f32 1.0, %v7016_v55  ;;  %v8000_v1 = vld [vmem:[#allocation43_spill] sm:$0xff]  ;;  %v3293_v63 = vsub.f32 1.0, %v7031_v23 }
 0x430   : > { %v5509_v48 = vpop.eup %5508  ;;  %4811 = vmatprep.subr.bf16.mxu0 %v7187_v39  ;;  %4843 = vmatprep.subr.bf16.mxu1 %v7202_v21  ;;  %v7424_v5 = vmul.f32 0.6931472, %v5507_v18  ;;  %5528 = vlog2.f32 %v3385_v59  ;;  %v7426_v20 = vmax.f32 %v3310_v35, 1e-30  ;;  %v3342_v40 = vsub.f32 1.0, %v8000_v1  ;;  %v8001_v18 = vld [vmem:[#allocation45_spill] sm:$0xff] }
 0x431   : > { %v5511_v26 = vpop.eup %5510  ;;  %v7428_v9 = vmul.f32 0.6931472, %v5509_v48  ;;  %5530 = vlog2.f32 %v3386_v4  ;;  %v7431_v51 = vmax.f32 %v3341_v24, 1e-30  ;;  %v3294_v24 = vsub.f32 1.0, %v8001_v18 }
 0x432   : > { %v5513_v42 = vpop.eup %5512  ;;  %v4886_v39 = vpack.c.bf16 %v7424_v5, %v7415_v28  ;;  %v7435_v21 = vmul.f32 0.6931472, %v5511_v26  ;;  %5532 = vlog2.f32 %v3371_v54  ;;  %v3406_v4 = vmax.f32 %v3342_v40, 1e-30  ;;  %v8002_v26 = vld [vmem:[#allocation41_spill] sm:$0xff]  ;;  %v8003_v54 = vld [vmem:[#allocation47_spill] sm:$0xff] }
 0x433   : > { %v5515_v59 = vpop.eup %5514  ;;  %4813 = vmatpush3.bf16.msra.mxu0 %v7217_v57  ;;  %4845 = vmatpush3.bf16.msra.mxu1 %v7232_v0  ;;  %v7440_v35 = vmul.f32 0.6931472, %v5513_v42  ;;  %5534 = vlog2.f32 %v3372_v49  ;;  %v3357_v57 = vmax.f32 %v3293_v63, 1e-30  ;;  %v7451_v49 = vmax.f32 %v3294_v24, 1e-30 }
 0x434   : > { %v5517_v48 = vpop.eup %5516  ;;  %4815 = vmatprep.subr.bf16.mxu0 %v7247_v16  ;;  %4847 = vmatprep.subr.bf16.mxu1 %v7259_v6  ;;  %v7447_v28 = vmul.f32 0.6931472, %v5515_v59  ;;  %5536 = vlog2.f32 %v3403_v61  ;;  %v3325_v40 = vsub.f32 1.0, %v8002_v26  ;;  %v3326_v59 = vsub.f32 1.0, %v8003_v54 }
 0x435   : > { %v5519_v5 = vpop.eup %5518  ;;  %v7449_v0 = vmul.f32 0.6931472, %v5517_v48  ;;  %5538 = vlog2.f32 %v3404_v14  ;;  %v3311_v63 = vsub.f32 1.0, %v7061_v52  ;;  %vm3701_vm2 = vcmp.gt.f32.partialorder %v6904_v60, 0.98 }
 0x436   : > { %v5521_v42 = vpop.eup %5520  ;;  %v4888_v16 = vpack.c.bf16 %v7447_v28, %v7440_v35  ;;  %v7456_v6 = vmul.f32 0.6931472, %v5519_v5  ;;  %5540 = vlog2.f32 %v3355_v50  ;;  %v3389_v14 = vmax.f32 %v3325_v40, 1e-30 }
 0x437   : > { %v5523_v25 = vpop.eup %5522  ;;  %4817 = vmatpush3.bf16.msra.mxu0 %v7269_v41  ;;  %4849 = vmatpush3.bf16.msra.mxu1 %v7279_v53  ;;  %v3516_v61 = vmul.f32 0.6931472, %v5521_v42  ;;  %5542 = vlog2.f32 %v3356_v36  ;;  %v3390_v41 = vmax.f32 %v3326_v59, 1e-30  ;;  %v8004_v36 = vld [vmem:[#allocation49_spill] sm:$0xff] }
 0x438   : > { %v5525_v24 = vpop.eup %5524  ;;  %4819 = vmatprep.subr.bf16.mxu0 %v7294_v29  ;;  %4851 = vmatprep.subr.bf16.mxu1 %v7309_v62  ;;  %v4858_v50 = vpack.c.bf16 %v7456_v6, %v7449_v0  ;;  %v3518_v35 = vmul.f32 0.6931472, %v5523_v25  ;;  %5544 = vlog2.f32 %v7406_v10  ;;  %v3312_v28 = vsub.f32 1.0, %v8004_v36  ;;  %v7472_v29 = vld [vmem:[%s7345_s20] sm:$0xff]  ;;  %v8005_v25 = vld [vmem:[#allocation44_spill] sm:$0xff] }
 0x439   : > { %v5527_v53 = vpop.eup %5526  ;;  %v7467_v48 = vmul.f32 0.6931472, %v5525_v24  ;;  %5546 = vlog2.f32 %v7410_v33  ;;  %v3375_v5 = vmax.f32 %v3311_v63, 1e-30  ;;  %v3343_v10 = vsub.f32 1.0, %v8005_v25  ;;  %v7481_v6 = vld [vmem:[%s7345_s20 + $0x10] sm:$0xff] }
 0x43a   : > { %v5529_v40 = vpop.eup %5528  ;;  %v4890_v62 = vpack.c.bf16 %v3518_v35, %v3516_v61  ;;  %v7474_v42 = vmul.f32 0.6931472, %v5527_v53  ;;  %5548 = vlog2.f32 %v7417_v31  ;;  %v3376_v59 = vmax.f32 %v3312_v28, 1e-30  ;;  %v8006_v63 = vld [vmem:[#allocation50_spill] sm:$0xff] }
 0x43b   : > { %v5531_v0 = vpop.eup %5530  ;;  %4821 = vmatpush3.bf16.msra.mxu0 %v7324_v47  ;;  %4853 = vmatpush3.bf16.msra.mxu1 %v7334_v13  ;;  %v3484_v33 = vmul.f32 0.6931472, %v5529_v40  ;;  %5550 = vlog2.f32 %v7426_v20  ;;  %v3344_v24 = vsub.f32 1.0, %v8006_v63  ;;  %v8007_v35 = vpack.c.bf16 %v7408_v30, %v7404_v17  ;;  %v8008_v40 = vld [vmem:[#allocation46_spill] sm:$0xff] }
 0x43c   : > { %v5533_v61 = vpop.eup %5532  ;;  %4887 = vmatprep.subr.bf16.mxu1 %v4886_v39  ;;  %v4860_v31 = vpack.c.bf16 %v7474_v42, %v7467_v48  ;;  %v3486_v47 = vmul.f32 0.6931472, %v5531_v0  ;;  %5552 = vlog2.f32 %v7431_v51  ;;  %v3407_v13 = vmax.f32 %v3343_v10, 1e-30  ;;  %v8009_v39 = vld [vmem:[#allocation52_spill] sm:$0xff]  ;;  %v7496_v51 = vld [vmem:[%s7345_s20 + $0x28] sm:$0xff] }
 0x43d   : > { %4855 = vmatprep.subr.bf16.mxu0 %v8007_v35  ;;  %v5535_v20 = vpop.eup %5534  ;;  %v3456_v53 = vmul.f32 0.6931472, %v5533_v61  ;;  %5554 = vlog2.f32 %v3406_v4  ;;  %v3408_v28 = vmax.f32 %v3344_v24, 1e-30  ;;  %v3295_v63 = vsub.f32 1.0, %v8008_v40  ;;  %v7499_v42 = vld [vmem:[%s7345_s20 + $0x38] sm:$0xff] }
 0x43e   : > { %v5537_v25 = vpop.eup %5536  ;;  %3198 = vmatmul.mubr.f32.vlgmr.msra.gmra.mrb[2].mxu0 %v7472_v29  ;;  %3273 = vmatmul.mubr.f32.vlgmr.msra.gmra.mrb[2].mxu1 %v7481_v6  ;;  %v4892_v30 = vpack.c.bf16 %v3486_v47, %v3484_v33  ;;  %v3458_v17 = vmul.f32 0.6931472, %v5535_v20  ;;  %5556 = vlog2.f32 %v3357_v57  ;;  %v3296_v48 = vsub.f32 1.0, %v8009_v39  ;;  %v7502_v10 = vld [vmem:[%s7345_s20 + $0x20] sm:$0xff]  ;;  %v8011_v61 = vld [vmem:[#allocation48_spill] sm:$0xff] }
 0x43f   : > { %v5539_v4 = vpop.eup %5538  ;;  %v8010_v0 = vpack.c.bf16 %v7435_v21, %v7428_v9  ;;  %4889 = vmatpush3.bf16.msra.mxu1 %v4888_v16  ;;  %v3520_v24 = vmul.f32 0.6931472, %v5537_v25  ;;  %5558 = vlog2.f32 %v7451_v49  ;;  %v3359_v33 = vmax.f32 %v3295_v63, 1e-30  ;;  %v7510_v35 = vld [vmem:[%s7345_s20 + $0x30] sm:$0xff]  ;;  %v8012_v9 = vld [vmem:[#allocation10_spill] sm:$0xff]  ;;  %3202 = vmatprep.mubr.f32.mxu0 %v7496_v51 }
 0x440   : > { %v3327_v57 = vsub.f32 1.0, %v8011_v61  ;;  %v5541_v47 = vpop.eup %5540  ;;  %4891 = vmatprep.subr.bf16.mxu1 %v4890_v62  ;;  %v4862_v20 = vpack.c.bf16 %v3458_v17, %v3456_v53  ;;  %v3522_v1 = vmul.f32 0.6931472, %v5539_v4  ;;  %5560 = vlog2.f32 %v3389_v14  ;;  %3277 = vmatprep.mubr.f32.mxu1 %v7499_v42  ;;  %v8014_v17 = vld [vmem:[#allocation14_spill] sm:$0xff] }
 0x441   : > { %4857 = vmatpush3.bf16.msra.mxu0 %v8010_v0  ;;  %v3360_v55 = vmax.f32 %v3296_v48, 1e-30  ;;  %v5543_v54 = vpop.eup %5542  ;;  %v3424_v26 = vmul.f32 0.6931472, %v5541_v47  ;;  %5562 = vlog2.f32 %v3390_v41  ;;  %v3328_v21 = vsub.f32 1.0, %v8012_v9  ;;  %v8015_v47 = vld [vmem:[#allocation51_spill] sm:$0xff] }
 0x442   : > { %4859 = vmatprep.subr.bf16.mxu0 %v4858_v50  ;;  %v3391_v16 = vmax.f32 %v3327_v57, 1e-30  ;;  %v5545_v49 = vpop.eup %5544  ;;  %v4894_v25 = vpack.c.bf16 %v3522_v1, %v3520_v24  ;;  %v3426_v63 = vmul.f32 0.6931472, %v5543_v54  ;;  %5564 = vlog2.f32 %v3375_v5  ;;  %v8013_v50 = vld [vmem:[#allocation12_spill] sm:$0xff]  ;;  %3203 = vmatmul.mubr.f32.gmra.mrb[4].mxu0 %v7502_v10 }
 0x443   : > { %v3313_v62 = vsub.f32 1.0, %v8013_v50  ;;  %3278 = vmatmul.mubr.f32.gmra.mrb[4].mxu1 %v7510_v35  ;;  %v5547_v14 = vpop.eup %5546  ;;  %v3488_v41 = vmul.f32 0.6931472, %v5545_v49  ;;  %5566 = vlog2.f32 %v3376_v59  ;;  %v3392_v53 = vmax.f32 %v3328_v21, 1e-30  ;;  %3609 = vmatprep.mubr.f32.mxu0 %v7356_v3 }
 0x444   : > { %4893 = vmatpush3.bf16.msra.mxu1 %v4892_v30  ;;  %v3314_v48 = vsub.f32 1.0, %v8014_v17  ;;  %v5549_v4 = vpop.eup %5548  ;;  %v4864_v1 = vpack.c.bf16 %v3426_v63, %v3424_v26  ;;  %v3490_v54 = vmul.f32 0.6931472, %v5547_v14  ;;  %5568 = vlog2.f32 %v3407_v13  ;;  %3684 = vmatprep.mubr.f32.mxu1 %v7359_v32 }
 0x445   : > { %4861 = vmatpush3.bf16.msra.mxu0 %v4860_v31  ;;  %4895 = vmatprep.subr.bf16.mxu1 %v4894_v25  ;;  %v3377_v5 = vmax.f32 %v3313_v62, 1e-30  ;;  %v5551_v0 = vpop.eup %5550  ;;  %v3460_v24 = vmul.f32 0.6931472, %v5549_v4  ;;  %5570 = vlog2.f32 %v3408_v28  ;;  %v3345_v9 = vsub.f32 1.0, %v8015_v47  ;;  %v8017_v25 = vld [vmem:[#allocation53_spill] sm:$0xff] }
 0x446   : > { %4863 = vmatprep.subr.bf16.mxu0 %v4862_v20  ;;  %v3378_v57 = vmax.f32 %v3314_v48, 1e-30  ;;  %v5553_v59 = vpop.eup %5552  ;;  %v4896_v31 = vpack.c.bf16 %v3490_v54, %v3488_v41  ;;  %v3462_v30 = vmul.f32 0.6931472, %v5551_v0  ;;  %5572 = vlog2.f32 %v3359_v33  ;;  %v8016_v20 = vld [vmem:[#allocation11_spill] sm:$0xff] }
 0x447   : > { %v3346_v21 = vsub.f32 1.0, %v8016_v20  ;;  %v5555_v26 = vpop.eup %5554  ;;  %v3524_v13 = vmul.f32 0.6931472, %v5553_v59  ;;  %5574 = vlog2.f32 %v3360_v55  ;;  %v3409_v49 = vmax.f32 %v3345_v9, 1e-30  ;;  %v8018_v41 = vld [vmem:[#allocation55_spill] sm:$0xff] }
 0x448   : > { %v3297_v28 = vsub.f32 1.0, %v8017_v25  ;;  %v5557_v63 = vpop.eup %5556  ;;  %4897 = vmatpush3.bf16.msra.mxu1 %v4896_v31  ;;  %v4866_v62 = vpack.c.bf16 %v3462_v30, %v3460_v24  ;;  %v3526_v14 = vmul.f32 0.6931472, %v5555_v26  ;;  %5576 = vlog2.f32 %v3391_v16  ;;  %v8019_v31 = vld [vmem:[#allocation16_spill] sm:$0xff] }
 0x449   : > { %4865 = vmatpush3.bf16.msra.mxu0 %v4864_v1  ;;  %v3410_v3 = vmax.f32 %v3346_v21, 1e-30  ;;  %v5559_v32 = vpop.eup %5558  ;;  %v3428_v48 = vmul.f32 0.6931472, %v5557_v63  ;;  %5578 = vlog2.f32 %v3392_v53  ;;  %v3298_v33 = vsub.f32 1.0, %v8018_v41 }
 0x44a   : > { %v3361_v4 = vmax.f32 %v3297_v28, 1e-30  ;;  %v5561_v54 = vpop.eup %5560  ;;  %4867 = vmatprep.subr.bf16.mxu0 %v4866_v62  ;;  %v4898_v1 = vpack.c.bf16 %v3526_v14, %v3524_v13  ;;  %v3430_v0 = vmul.f32 0.6931472, %v5559_v32  ;;  %5580 = vlog2.f32 %v3377_v5 }
 0x44b   : > { %v3329_v55 = vsub.f32 1.0, %v7166_v12  ;;  %v5563_v9 = vpop.eup %5562  ;;  %v3492_v59 = vmul.f32 0.6931472, %v5561_v54  ;;  %5582 = vlog2.f32 %v3378_v57  ;;  %v3362_v24 = vmax.f32 %v3298_v33, 1e-30 }
 0x44c   : > { %v3330_v16 = vsub.f32 1.0, %v8019_v31  ;;  %v5565_v30 = vpop.eup %5564  ;;  %4899 = vmatprep.subr.bf16.mxu1 %v4898_v1  ;;  %v4868_v21 = vpack.c.bf16 %v3430_v0, %v3428_v48  ;;  %v3494_v53 = vmul.f32 0.6931472, %v5563_v9  ;;  %5584 = vlog2.f32 %v3409_v49 }
 0x44d   : > { %v3393_v26 = vmax.f32 %v3329_v55, 1e-30  ;;  %v5567_v28 = vpop.eup %5566  ;;  %v3464_v63 = vmul.f32 0.6931472, %v5565_v30  ;;  %5586 = vlog2.f32 %v3410_v3  ;;  %v3315_v5 = vsub.f32 1.0, %v7181_v27 }
 0x44e   : > { %v3394_v13 = vmax.f32 %v3330_v16, 1e-30  ;;  %v5569_v62 = vpop.eup %5568  ;;  %4869 = vmatpush3.bf16.msra.mxu0 %v4868_v21  ;;  %v4900_v14 = vpack.c.bf16 %v3494_v53, %v3492_v59  ;;  %v3466_v32 = vmul.f32 0.6931472, %v5567_v28  ;;  %5588 = vlog2.f32 %v3361_v4  ;;  %v8020_v59 = vld [vmem:[#allocation15_spill] sm:$0xff] }
 0x44f   : > { %v3316_v57 = vsub.f32 1.0, %v7238_v8  ;;  %v5571_v33 = vpop.eup %5570  ;;  %v3528_v54 = vmul.f32 0.6931472, %v5569_v62  ;;  %5590 = vlog2.f32 %v3362_v24  ;;  %v3379_v48 = vmax.f32 %v3315_v5, 1e-30 }
 0x450   : > { %v3347_v49 = vsub.f32 1.0, %v7196_v7  ;;  %v5573_v1 = vpop.eup %5572  ;;  %4901 = vmatpush3.bf16.msra.mxu1 %v4900_v14  ;;  %v4870_v0 = vpack.c.bf16 %v3466_v32, %v3464_v63  ;;  %v3530_v3 = vmul.f32 0.6931472, %v5571_v33  ;;  %5592 = vlog2.f32 %v3393_v26  ;;  %v8021_v14 = vld [vmem:[#allocation56_spill] sm:$0xff] }
 0x451   : > { %v3380_v55 = vmax.f32 %v3316_v57, 1e-30  ;;  %v5575_v9 = vpop.eup %5574  ;;  %v3432_v16 = vmul.f32 0.6931472, %v5573_v1  ;;  %5594 = vlog2.f32 %v3394_v13  ;;  %v3348_v30 = vsub.f32 1.0, %v8020_v59 }
 0x452   : > { %v3411_v4 = vmax.f32 %v3347_v49, 1e-30  ;;  %v5577_v21 = vpop.eup %5576  ;;  %4871 = vmatprep.subr.bf16.mxu0 %v4870_v0  ;;  %v4902_v53 = vpack.c.bf16 %v3530_v3, %v3528_v54  ;;  %v3434_v28 = vmul.f32 0.6931472, %v5575_v9  ;;  %5596 = vlog2.f32 %v3379_v48  ;;  %v8022_v0 = vld [vmem:[#allocation13_spill] sm:$0xff] }
 0x453   : > { %v3299_v24 = vsub.f32 1.0, %v7211_v45  ;;  %v5579_v5 = vpop.eup %5578  ;;  %v3496_v62 = vmul.f32 0.6931472, %v5577_v21  ;;  %5598 = vlog2.f32 %v3380_v55  ;;  %v3412_v63 = vmax.f32 %v3348_v30, 1e-30  ;;  %v8023_v55 = vld [vmem:[#allocation57_spill] sm:$0xff] }
 0x454   : > { %v3300_v26 = vsub.f32 1.0, %v8021_v14  ;;  %v5581_v32 = vpop.eup %5580  ;;  %4903 = vmatprep.subr.bf16.mxu1 %v4902_v53  ;;  %v4872_v57 = vpack.c.bf16 %v3434_v28, %v3432_v16  ;;  %v3498_v13 = vmul.f32 0.6931472, %v5579_v5  ;;  %5600 = vlog2.f32 %v3411_v4  ;;  %v8024_v53 = vld [vmem:[#allocation18_spill] sm:$0xff] }
 0x455   : > { %v3363_v33 = vmax.f32 %v3299_v24, 1e-30  ;;  %v5583_v49 = vpop.eup %5582  ;;  %v3468_v1 = vmul.f32 0.6931472, %v5581_v32  ;;  %5602 = vlog2.f32 %v3412_v63  ;;  %v3331_v48 = vsub.f32 1.0, %v8022_v0 }
 0x456   : > { %v3364_v54 = vmax.f32 %v3300_v26, 1e-30  ;;  %v5585_v3 = vpop.eup %5584  ;;  %4873 = vmatpush3.bf16.msra.mxu0 %v4872_v57  ;;  %v4904_v9 = vpack.c.bf16 %v3498_v13, %v3496_v62  ;;  %v3470_v21 = vmul.f32 0.6931472, %v5583_v49  ;;  %v3332_v30 = vsub.f32 1.0, %v8023_v55  ;;  %v8025_v26 = vld [vmem:[#allocation59_spill] sm:$0xff] }
 0x457   : > { %5604 = vlog2.f32 %v3363_v33  ;;  %v5587_v59 = vpop.eup %5586  ;;  %v3532_v7 = vmul.f32 0.6931472, %v5585_v3  ;;  %v3395_v16 = vmax.f32 %v3331_v48, 1e-30  ;;  %v3317_v4 = vsub.f32 1.0, %v8024_v53 }
 0x458   : > { %5606 = vlog2.f32 %v3364_v54  ;;  %v5589_v28 = vpop.eup %5588  ;;  %4905 = vmatpush3.bf16.msra.mxu1 %v4904_v9  ;;  %v4874_v24 = vpack.c.bf16 %v3470_v21, %v3468_v1  ;;  %v3534_v5 = vmul.f32 0.6931472, %v5587_v59  ;;  %v3396_v63 = vmax.f32 %v3332_v30, 1e-30  ;;  %v8026_v1 = vld [vmem:[#allocation60_spill] sm:$0xff] }
 0x459   : > { %v3318_v32 = vsub.f32 1.0, %v8025_v26  ;;  %v5591_v20 = vpop.eup %5590  ;;  %v3436_v57 = vmul.f32 0.6931472, %v5589_v28  ;;  %5608 = vlog2.f32 %v3395_v16  ;;  %v3381_v62 = vmax.f32 %v3317_v4, 1e-30  ;;  %v8027_v16 = vld [vmem:[#allocation20_spill] sm:$0xff] }
 0x45a   : > { %v3349_v13 = vsub.f32 1.0, %v7283_v15  ;;  %v5593_v33 = vpop.eup %5592  ;;  %4875 = vmatprep.subr.bf16.mxu0 %v4874_v24  ;;  %v4906_v49 = vpack.c.bf16 %v3534_v5, %v3532_v7  ;;  %v3438_v54 = vmul.f32 0.6931472, %v5591_v20  ;;  %5610 = vlog2.f32 %v3396_v63  ;;  %v8028_v7 = vld [vmem:[#allocation61_spill] sm:$0xff] }
 0x45b   : > { %v3382_v48 = vmax.f32 %v3318_v32, 1e-30  ;;  %v5595_v3 = vpop.eup %5594  ;;  %v3500_v47 = vmul.f32 0.6931472, %v5593_v33  ;;  %5612 = vlog2.f32 %v3381_v62  ;;  %v3350_v59 = vsub.f32 1.0, %v8026_v1  ;;  %v8029_v33 = vld [vmem:[#allocation17_spill] sm:$0xff] }
 0x45c   : > { %v3413_v9 = vmax.f32 %v3349_v13, 1e-30  ;;  %v5597_v21 = vpop.eup %5596  ;;  %4907 = vmatprep.subr.bf16.mxu1 %v4906_v49  ;;  %v4876_v30 = vpack.c.bf16 %v3438_v54, %v3436_v57  ;;  %v3502_v28 = vmul.f32 0.6931472, %v5595_v3  ;;  %v3301_v4 = vsub.f32 1.0, %v8027_v16  ;;  %v8030_v54 = vld [vmem:[#allocation26_spill] sm:$0xff] }
 0x45d   : > { %5614 = vlog2.f32 %v3382_v48  ;;  %v5599_v15 = vpop.eup %5598  ;;  %v3472_v55 = vmul.f32 0.6931472, %v5597_v21  ;;  %v3414_v24 = vmax.f32 %v3350_v59, 1e-30  ;;  %v3302_v20 = vsub.f32 1.0, %v8028_v7 }
 0x45e   : > { %5616 = vlog2.f32 %v3413_v9  ;;  %v5601_v5 = vpop.eup %5600  ;;  %4877 = vmatpush3.bf16.msra.mxu0 %v4876_v30  ;;  %v4908_v63 = vpack.c.bf16 %v3502_v28, %v3500_v47  ;;  %v3474_v32 = vmul.f32 0.6931472, %v5599_v15  ;;  %v3365_v62 = vmax.f32 %v3301_v4, 1e-30 }
 0x45f   : > { %v3333_v13 = vsub.f32 1.0, %v8029_v33  ;;  %v5603_v1 = vpop.eup %5602  ;;  %v3536_v49 = vmul.f32 0.6931472, %v5601_v5  ;;  %5618 = vlog2.f32 %v3414_v24  ;;  %v3366_v57 = vmax.f32 %v3302_v20, 1e-30 }
 0x460   : > { %v3334_v48 = vsub.f32 1.0, %v8030_v54  ;;  %4909 = vmatpush3.bf16.msra.mxu1 %v4908_v63  ;;  %v4878_v21 = vpack.c.bf16 %v3474_v32, %v3472_v55  ;;  %v3538_v59 = vmul.f32 0.6931472, %v5603_v1  ;;  %5620 = vlog2.f32 %v3365_v62 }
 0x461   : > { %v5605_v3 = vpop.eup %5604  ;;  %v3397_v9 = vmax.f32 %v3333_v13, 1e-30  ;;  %5622 = vlog2.f32 %v3366_v57  ;;  %vm3702_vm3 = vcmp.gt.f32.partialorder %v7992_v11, 0.98  ;;  %vm3703_vm4 = vcmp.gt.f32.partialorder %v6964_v37, 0.98 }
 0x462   : > { %v5607_v0 = vpop.eup %5606  ;;  %v3440_v31 = vmul.f32 0.6931472, %v5605_v3  ;;  %v3398_v47 = vmax.f32 %v3334_v48, 1e-30  ;;  %4879 = vmatprep.subr.bf16.mxu0 %v4878_v21  ;;  %v4910_v15 = vpack.c.bf16 %v3538_v59, %v3536_v49  ;;  %vm3704_vm5 = vcmp.gt.f32.partialorder %v7997_v38, 0.98 }
 0x463   : > { %v3442_v30 = vmul.f32 0.6931472, %v5607_v0  ;;  %5624 = vlog2.f32 %v3397_v9  ;;  %v5609_v28 = vpop.eup %5608  ;;  %vm3705_vm6 = vcmp.gt.f32.partialorder %v7031_v23, 0.98  ;;  %vm3706_vm7 = vcmp.gt.f32.partialorder %v8001_v18, 0.98 }
 0x464   : > { %5626 = vlog2.f32 %v3398_v47  ;;  %v5611_v4 = vpop.eup %5610  ;;  %4911 = vmatprep.subr.bf16.mxu1 %v4910_v15  ;;  %v3504_v20 = vmul.f32 0.6931472, %v5609_v28  ;;  %v8031_v28 = vld [vmem:[#allocation22_spill] sm:$0xff]  ;;  %vm3707_vm8 = vcmp.gt.f32.partialorder %v8008_v40, 0.98 }
 0x465   : > { %v4880_v24 = vpack.c.bf16 %v3442_v30, %v3440_v31  ;;  %v5613_v5 = vpop.eup %5612  ;;  %v3506_v63 = vmul.f32 0.6931472, %v5611_v4  ;;  %vm3699_vm0 = vcmp.gt.f32.partialorder %v8031_v28, 0.98  ;;  %vm3708_vm9 = vcmp.gt.f32.partialorder %v8009_v39, 0.98 }
 0x466   : > { %v3476_v1 = vmul.f32 0.6931472, %v5613_v5  ;;  %vm3709_vm10 = vcmp.gt.f32.partialorder %v8017_v25, 0.98  ;;  %vm3710_vm11 = vcmp.gt.f32.partialorder %v8018_v41, 0.98 }
 0x467   : > { %v5615_v55 = vpop.eup %5614  ;;  %4881 = vmatpush3.bf16.msra.mxu0 %v4880_v24  ;;  %v4912_v62 = vpack.c.bf16 %v3506_v63, %v3504_v20  ;;  %v8032_v20 = vld [vmem:[#allocation30_spill] sm:$0xff]  ;;  %v5728_v63 = vmov 0.0   ;;  %vm3711_vm12 = vcmp.gt.f32.partialorder %v7211_v45, 0.98  ;;  %vm3712_vm13 = vcmp.gt.f32.partialorder %v8021_v14, 0.98 }
 0x468   : > { %v5617_v32 = vpop.eup %5616  ;;  %v3478_v13 = vmul.f32 0.6931472, %v5615_v55  ;;  %vm3700_vm1 = vcmp.gt.f32.partialorder %v8032_v20, 0.98  ;;  %v4438_v55 = vsel %vm3699_vm0, 1.0, %v5728_v63  ;;  %v4441_v60 = vsel %vm3702_vm3, 1.0, %v5728_v63 }
 0x469   : > { %v3540_v57 = vmul.f32 0.6931472, %v5617_v32  ;;  %v5619_v48 = vpop.eup %5618  ;;  %4913 = vmatpush3.bf16.msra.mxu1 %v4912_v62  ;;  %v4440_v32 = vsel %vm3701_vm2, 1.0, %v5728_v63  ;;  %v4442_v11 = vsel %vm3703_vm4, 1.0, %v5728_v63  ;;  %v4443_v37 = vsel %vm3704_vm5, 1.0, %v5728_v63 }
 0x46a   : > { %v4882_v49 = vpack.c.bf16 %v3478_v13, %v3476_v1  ;;  %v5621_v0 = vpop.eup %5620  ;;  %v3542_v3 = vmul.f32 0.6931472, %v5619_v48  ;;  %v4439_v1 = vsel %vm3700_vm1, 1.0, %v5728_v63  ;;  %v4446_v23 = vsel %vm3707_vm8, 1.0, %v5728_v63 }
 0x46b   : > { %v5623_v21 = vpop.eup %5622  ;;  %v3444_v59 = vmul.f32 0.6931472, %v5621_v0  ;;  %v3892_v62 = vadd.f32 %v4439_v1, %v4438_v55  ;;  %v4448_v48 = vsel %vm3709_vm10, 1.0, %v5728_v63  ;;  %v4450_v0 = vsel %vm3711_vm12, 1.0, %v5728_v63 }
 0x46c   : > { %4883 = vmatprep.subr.bf16.mxu0 %v4882_v49  ;;  %v4914_v31 = vpack.c.bf16 %v3542_v3, %v3540_v57  ;;  %v3446_v47 = vmul.f32 0.6931472, %v5623_v21  ;;  %v4447_v57 = vsel %vm3708_vm9, 1.0, %v5728_v63  ;;  %v4449_v49 = vsel %vm3710_vm11, 1.0, %v5728_v63 }
 0x46d   : > { %v5625_v9 = vpop.eup %5624  ;;  %v3893_v13 = vadd.f32 %v4440_v32, %v3892_v62  ;;  %vm3713_vm14 = vcmp.gt.f32.partialorder %v8027_v16, 0.98  ;;  %v4451_v3 = vsel %vm3712_vm13, 1.0, %v5728_v63  ;;  %vm3714_vm15 = vcmp.gt.f32.partialorder %v8028_v7, 0.98 }
 0x46e   : > { %v5627_v15 = vpop.eup %5626  ;;  %v3508_v30 = vmul.f32 0.6931472, %v5625_v9  ;;  %4915 = vmatprep.subr.bf16.mxu1 %v4914_v31  ;;  %v4884_v4 = vpack.c.bf16 %v3446_v47, %v3444_v59  ;;  %v4452_v21 = vsel %vm3713_vm14, 1.0, %v5728_v63  ;;  %v8033_v59 = vld [vmem:[#allocation19_spill] sm:$0xff]  ;;  %v4453_v9 = vsel %vm3714_vm15, 1.0, %v5728_v63 }
 0x46f   : > { %v3510_v24 = vmul.f32 0.6931472, %v5627_v15  ;;  %vm3715_vm0 = vcmp.gt.f32.partialorder %v8033_v59, 0.98  ;;  %v8034_v31 = vld [vmem:[#allocation23_spill] sm:$0xff] }
 0x470   : > { %4885 = vmatpush3.bf16.msra.mxu0 %v4884_v4  ;;  %vm3716_vm1 = vcmp.gt.f32.partialorder %v8034_v31, 0.98  ;;  %v4454_v47 = vsel %vm3715_vm0, 1.0, %v5728_v63  ;;  %vm3717_vm2 = vcmp.gt.f32.partialorder %v6874_v43, 0.98  ;;  %v8041_v31 = vld [vmem:[#allocation16_spill] sm:$0xff] }
 0x471   : > { %v4916_v5 = vpack.c.bf16 %v3510_v24, %v3508_v30  ;;  %v4455_v15 = vsel %vm3716_vm1, 1.0, %v5728_v63  ;;  %v8035_v30 = vld [vmem:[#allocation29_spill] sm:$0xff]  ;;  %v4456_v28 = vsel %vm3717_vm2, 1.0, %v5728_v63  ;;  %vm3719_vm4 = vcmp.gt.f32.partialorder %v6934_v58, 0.98 }
 0x472   : > { %vm3718_vm3 = vcmp.gt.f32.partialorder %v8035_v30, 0.98  ;;  %vm3720_vm5 = vcmp.gt.f32.partialorder %v7995_v56, 0.98  ;;  %vm3723_vm8 = vcmp.gt.f32.partialorder %v7061_v52, 0.98 }
 0x473   : > { %4917 = vmatpush3.bf16.msra.mxu1 %v4916_v5  ;;  %3610 = vmatmul.mubr.f32.vlgmr.msra.gmra.mrb[6].mxu0 %v7472_v29  ;;  %v3894_v29 = vadd.f32 %v4441_v60, %v3893_v13  ;;  %v4457_v24 = vsel %vm3718_vm3, 1.0, %v5728_v63  ;;  %v4458_v5 = vsel %vm3719_vm4, 1.0, %v5728_v63  ;;  %v4459_v55 = vsel %vm3720_vm5, 1.0, %v5728_v63  ;;  %v8043_v30 = vld [vmem:[#allocation57_spill] sm:$0xff] }
 0x474   : > { %3614 = vmatprep.mubr.f32.mxu0 %v7496_v51  ;;  %v4444_v51 = vsel %vm3705_vm6, 1.0, %v5728_v63  ;;  %vm3721_vm6 = vcmp.gt.f32.partialorder %v7001_v34, 0.98  ;;  %vm3724_vm9 = vcmp.gt.f32.partialorder %v8004_v36, 0.98  ;;  %v4462_v60 = vsel %vm3723_vm8, 1.0, %v5728_v63 }
 0x475   : > { %v4460_v32 = vsel %vm3721_vm6, 1.0, %v5728_v63  ;;  %vm3725_vm10 = vcmp.gt.f32.partialorder %v8013_v50, 0.98  ;;  %v4463_v13 = vsel %vm3724_vm9, 1.0, %v5728_v63  ;;  %vm3726_vm11 = vcmp.gt.f32.partialorder %v8014_v17, 0.98 }
 0x476   : > { %3685 = vmatmul.mubr.f32.vlgmr.msra.gmra.mrb[6].mxu1 %v7481_v6  ;;  %v3895_v6 = vadd.f32 %v4442_v11, %v3894_v29  ;;  %v4464_v11 = vsel %vm3725_vm10, 1.0, %v5728_v63  ;;  %vm3727_vm12 = vcmp.gt.f32.partialorder %v7181_v27, 0.98  ;;  %v4465_v29 = vsel %vm3726_vm11, 1.0, %v5728_v63 }
 0x477   : > { %3689 = vmatprep.mubr.f32.mxu1 %v7499_v42  ;;  %3615 = vmatmul.mubr.f32.gmra.mrb[8].mxu0 %v7502_v10  ;;  %v4445_v42 = vsel %vm3706_vm7, 1.0, %v5728_v63  ;;  %vm3722_vm7 = vcmp.gt.f32.partialorder %v7999_v44, 0.98  ;;  %vm3728_vm13 = vcmp.gt.f32.partialorder %v7238_v8, 0.98 }
 0x478   : > { %v3896_v38 = vadd.f32 %v4443_v37, %v3895_v6  ;;  %v4461_v62 = vsel %vm3722_vm7, 1.0, %v5728_v63  ;;  %v4466_v37 = vsel %vm3727_vm12, 1.0, %v5728_v63  ;;  %vm3729_vm14 = vcmp.gt.f32.partialorder %v8024_v53, 0.98 }
 0x479   : > { %v4467_v6 = vsel %vm3728_vm13, 1.0, %v5728_v63  ;;  %vm3730_vm15 = vcmp.gt.f32.partialorder %v8025_v26, 0.98  ;;  %vm3733_vm2 = vcmp.gt.f32.partialorder %v7993_v19, 0.98 }
 0x47a   : > { %3690 = vmatmul.mubr.f32.gmra.mrb[8].mxu1 %v7510_v35  ;;  %v3897_v10 = vadd.f32 %v4444_v51, %v3896_v38  ;;  %v4468_v51 = vsel %vm3729_vm14, 1.0, %v5728_v63  ;;  %v8036_v38 = vld [vmem:[#allocation21_spill] sm:$0xff]  ;;  %vm3734_vm3 = vcmp.gt.f32.partialorder %v7994_v2, 0.98  ;;  %vm3735_vm4 = vcmp.gt.f32.partialorder %v6979_v46, 0.98 }
 0x47b   : > { %vm3731_vm0 = vcmp.gt.f32.partialorder %v8036_v38, 0.98  ;;  %vm3736_vm5 = vcmp.gt.f32.partialorder %v7998_v22, 0.98  ;;  %vm3739_vm8 = vcmp.gt.f32.partialorder %v8011_v61, 0.98 }
 0x47c   : > { %v3898_v35 = vadd.f32 %v4445_v42, %v3897_v10  ;;  %v4469_v42 = vsel %vm3730_vm15, 1.0, %v5728_v63  ;;  %v8037_v10 = vld [vmem:[#allocation27_spill] sm:$0xff]  ;;  %v4478_v59 = vsel %vm3739_vm8, 1.0, %v5728_v63  ;;  %vm3741_vm10 = vcmp.gt.f32.partialorder %v7166_v12, 0.98 }
 0x47d   : > { %vm3732_vm1 = vcmp.gt.f32.partialorder %v8037_v10, 0.98  ;;  %vm3742_vm11 = vcmp.gt.f32.partialorder %v8041_v31, 0.98  ;;  %vm3744_vm13 = vcmp.gt.f32.partialorder %v8043_v30, 0.98 }
 0x47e   : > { %v3899_v18 = vadd.f32 %v4446_v23, %v3898_v35  ;;  %v4470_v23 = vsel %vm3731_vm0, 1.0, %v5728_v63  ;;  %v4471_v35 = vsel %vm3732_vm1, 1.0, %v5728_v63  ;;  %vm3745_vm14 = vcmp.gt.f32.partialorder %v8029_v33, 0.98 }
 0x47f   : > { %vm3746_vm15 = vcmp.gt.f32.partialorder %v8030_v54, 0.98 }
 0x480   : > { %v3900_v40 = vadd.f32 %v4447_v57, %v3899_v18  ;;  %v4472_v57 = vsel %vm3733_vm2, 1.0, %v5728_v63 }
 0x482   : > { %v3901_v39 = vadd.f32 %v4448_v48, %v3900_v40  ;;  %v4473_v48 = vsel %vm3734_vm3, 1.0, %v5728_v63 }
 0x484   : > { %v3902_v25 = vadd.f32 %v4449_v49, %v3901_v39  ;;  %v4474_v49 = vsel %vm3735_vm4, 1.0, %v5728_v63  ;;  %v8038_v39 = vld [vmem:[#allocation41_spill] sm:$0xff] }
 0x485   : > { %vm3737_vm6 = vcmp.gt.f32.partialorder %v8038_v39, 0.98 }
 0x486   : > { %v3903_v41 = vadd.f32 %v4450_v0, %v3902_v25  ;;  %v4475_v0 = vsel %vm3736_vm5, 1.0, %v5728_v63  ;;  %v8039_v25 = vld [vmem:[#allocation47_spill] sm:$0xff] }
 0x487   : > { %vm3738_vm7 = vcmp.gt.f32.partialorder %v8039_v25, 0.98 }
 0x488   : > { %v3904_v45 = vadd.f32 %v4451_v3, %v3903_v41  ;;  %v4476_v3 = vsel %vm3737_vm6, 1.0, %v5728_v63  ;;  %v4477_v41 = vsel %vm3738_vm7, 1.0, %v5728_v63 }
 0x48a   : > { %v3905_v14 = vadd.f32 %v4452_v21, %v3904_v45  ;;  %v8040_v21 = vld [vmem:[#allocation10_spill] sm:$0xff] }
 0x48b   : > { %vm3740_vm9 = vcmp.gt.f32.partialorder %v8040_v21, 0.98  ;;  %v8059_v21 = vld [vmem:[#allocation60_spill] sm:$0xff] }
 0x48c   : > { %v3906_v16 = vadd.f32 %v4453_v9, %v3905_v14  ;;  %v4479_v9 = vsel %vm3740_vm9, 1.0, %v5728_v63 }
 0x48e   : > { %v3907_v7 = vadd.f32 %v4454_v47, %v3906_v16  ;;  %v4480_v47 = vsel %vm3741_vm10, 1.0, %v5728_v63  ;;  %v8042_v16 = vld [vmem:[#allocation13_spill] sm:$0xff] }
 0x48f   : > { %vm3743_vm12 = vcmp.gt.f32.partialorder %v8042_v16, 0.98 }
 0x490   : > { %v3908_v4 = vadd.f32 %v4455_v15, %v3907_v7  ;;  %v4481_v15 = vsel %vm3742_vm11, 1.0, %v5728_v63 }
 0x492   : > { %v3909_v20 = vadd.f32 %v4456_v28, %v3908_v4  ;;  %v4482_v28 = vsel %vm3743_vm12, 1.0, %v5728_v63  ;;  %v4483_v4 = vsel %vm3744_vm13, 1.0, %v5728_v63 }
 0x494   : > { %v3910_v43 = vadd.f32 %v4457_v24, %v3909_v20  ;;  %v4484_v20 = vsel %vm3745_vm14, 1.0, %v5728_v63 }
 0x496   : > { %v3911_v1 = vadd.f32 %v4458_v5, %v3910_v43  ;;  %v8044_v5 = vld [vmem:[#allocation24_spill] sm:$0xff] }
 0x497   : > { %vm3747_vm0 = vcmp.gt.f32.partialorder %v8044_v5, 0.98 }
 0x498   : > { %v3912_v58 = vadd.f32 %v4459_v55, %v3911_v1  ;;  %v4485_v55 = vsel %vm3746_vm15, 1.0, %v5728_v63  ;;  %v8045_v1 = vld [vmem:[#allocation28_spill] sm:$0xff]  ;;  %vm3762_vm15 = vcmp.gt.f32.partialorder %v8059_v21, 0.98 }
 0x499   : > { %vm3748_vm1 = vcmp.gt.f32.partialorder %v8045_v1, 0.98 }
 0x49a   : > { %v3913_v56 = vadd.f32 %v4460_v32, %v3912_v58  ;;  %v4486_v58 = vsel %vm3747_vm0, 1.0, %v5728_v63 }
 0x49c   : > { %v3914_v34 = vadd.f32 %v4461_v62, %v3913_v56  ;;  %v8046_v62 = vld [vmem:[#allocation25_spill] sm:$0xff]  ;;  %v4487_v56 = vsel %vm3748_vm1, 1.0, %v5728_v63 }
 0x49d   : > { %vm3749_vm2 = vcmp.gt.f32.partialorder %v8046_v62, 0.98 }
 0x49e   : > { %v3915_v44 = vadd.f32 %v4462_v60, %v3914_v34  ;;  %v8047_v60 = vld [vmem:[#allocation31_spill] sm:$0xff]  ;;  %v4488_v34 = vsel %vm3749_vm2, 1.0, %v5728_v63 }
 0x49f   : > { %vm3750_vm3 = vcmp.gt.f32.partialorder %v8047_v60, 0.98 }
 0x4a0   : > { %v3916_v52 = vadd.f32 %v4463_v13, %v3915_v44  ;;  %v8048_v13 = vld [vmem:[#allocation33_spill] sm:$0xff] }
 0x4a1   : > { %vm3751_vm4 = vcmp.gt.f32.partialorder %v8048_v13, 0.98 }
 0x4a2   : > { %v3917_v36 = vadd.f32 %v4464_v11, %v3916_v52  ;;  %v4489_v11 = vsel %vm3750_vm3, 1.0, %v5728_v63  ;;  %v8049_v52 = vld [vmem:[#allocation37_spill] sm:$0xff] }
 0x4a3   : > { %vm3752_vm5 = vcmp.gt.f32.partialorder %v8049_v52, 0.98 }
 0x4a4   : > { %v3918_v50 = vadd.f32 %v4465_v29, %v3917_v36  ;;  %v4490_v36 = vsel %vm3751_vm4, 1.0, %v5728_v63 }
 0x4a6   : > { %v3919_v17 = vadd.f32 %v4466_v37, %v3918_v50  ;;  %v8050_v37 = vld [vmem:[#allocation38_spill] sm:$0xff] }
 0x4a7   : > { %vm3753_vm6 = vcmp.gt.f32.partialorder %v8050_v37, 0.98 }
 0x4a8   : > { %v3920_v27 = vadd.f32 %v4467_v6, %v3919_v17  ;;  %v4491_v6 = vsel %vm3752_vm5, 1.0, %v5728_v63  ;;  %v8051_v17 = vld [vmem:[#allocation43_spill] sm:$0xff]  ;;  %v4492_v38 = vsel %vm3753_vm6, 1.0, %v5728_v63 }
 0x4a9   : > { %vm3754_vm7 = vcmp.gt.f32.partialorder %v8051_v17, 0.98  ;;  %v3543_v17 = vld [vmem:[%s5931_s21] sm:$0xff] }
 0x4aa   : > { %v3921_v8 = vadd.f32 %v4468_v51, %v3920_v27  ;;  %v8052_v27 = vld [vmem:[#allocation44_spill] sm:$0xff]  ;;  %v4493_v10 = vsel %vm3754_vm7, 1.0, %v5728_v63 }
 0x4ab   : > { %vm3755_vm8 = vcmp.gt.f32.partialorder %v8052_v27, 0.98 }
 0x4ac   : > { %v3922_v53 = vadd.f32 %v4469_v42, %v3921_v8  ;;  %v8053_v8 = vld [vmem:[#allocation50_spill] sm:$0xff] }
 0x4ad   : > { %vm3756_vm9 = vcmp.gt.f32.partialorder %v8053_v8, 0.98 }
 0x4ae   : > { %v3923_v26 = vadd.f32 %v4470_v23, %v3922_v53  ;;  %v4494_v53 = vsel %vm3755_vm8, 1.0, %v5728_v63 }
 0x4b0   : > { %v3924_v18 = vadd.f32 %v4471_v35, %v3923_v26  ;;  %v8054_v35 = vld [vmem:[#allocation51_spill] sm:$0xff] }
 0x4b1   : > { %vm3757_vm10 = vcmp.gt.f32.partialorder %v8054_v35, 0.98 }
 0x4b2   : > { %v3925_v40 = vadd.f32 %v4472_v57, %v3924_v18  ;;  %v4495_v57 = vsel %vm3756_vm9, 1.0, %v5728_v63  ;;  %v8055_v18 = vld [vmem:[#allocation11_spill] sm:$0xff] }
 0x4b3   : > { %vm3758_vm11 = vcmp.gt.f32.partialorder %v8055_v18, 0.98 }
 0x4b4   : > { %v3926_v19 = vadd.f32 %v4473_v48, %v3925_v40  ;;  %v4496_v40 = vsel %vm3757_vm10, 1.0, %v5728_v63 }
 0x4b6   : > { %v3927_v2 = vadd.f32 %v4474_v49, %v3926_v19  ;;  %v8056_v49 = vld [vmem:[#allocation54_spill] sm:$0xff]  ;;  %v4497_v19 = vsel %vm3758_vm11, 1.0, %v5728_v63 }
 0x4b7   : > { %vm3759_vm12 = vcmp.gt.f32.partialorder %v8056_v49, 0.98 }
 0x4b8   : > { %v3928_v46 = vadd.f32 %v4475_v0, %v3927_v2  ;;  %v8057_v0 = vld [vmem:[#allocation15_spill] sm:$0xff]  ;;  %v4498_v2 = vsel %vm3759_vm12, 1.0, %v5728_v63 }
 0x4b9   : > { %vm3760_vm13 = vcmp.gt.f32.partialorder %v8057_v0, 0.98 }
 0x4ba   : > { %v3929_v22 = vadd.f32 %v4476_v3, %v3928_v46  ;;  %v8058_v3 = vld [vmem:[#allocation58_spill] sm:$0xff] }
 0x4bb   : > { %vm3761_vm14 = vcmp.gt.f32.partialorder %v8058_v3, 0.98 }
 0x4bc   : > { %v3930_v45 = vadd.f32 %v4477_v41, %v3929_v22  ;;  %v4499_v41 = vsel %vm3760_vm13, 1.0, %v5728_v63 }
 0x4be   : > { %v3931_v14 = vadd.f32 %v4478_v59, %v3930_v45  ;;  %v4500_v59 = vsel %vm3761_vm14, 1.0, %v5728_v63 }
 0x4c0   : > { %v3932_v61 = vadd.f32 %v4479_v9, %v3931_v14  ;;  %v4501_v9 = vsel %vm3762_vm15, 1.0, %v5728_v63 }
 0x4c2   : > { %v3933_v7 = vadd.f32 %v4480_v47, %v3932_v61 }
 0x4c4   : > { %v3934_v12 = vadd.f32 %v4481_v15, %v3933_v7  ;;  %v3891_v7 = vld [vmem:[%s6691_s24] sm:$0x1] }
 0x4c6   : > { %v3935_v24 = vadd.f32 %v4482_v28, %v3934_v12 }
 0x4c8   : > { %v3936_v43 = vadd.f32 %v4483_v4, %v3935_v24 }
 0x4ca   : > { %v3937_v32 = vadd.f32 %v4484_v20, %v3936_v43 }
 0x4cc   : > { %v3938_v33 = vadd.f32 %v4485_v55, %v3937_v32  ;;  %v3131_v55 = vld [vmem:[%s5926_s28] sm:$0xff] }
 0x4ce   : > { %v3939_v54 = vadd.f32 %v4486_v58, %v3938_v33  ;;  %v3132_v33 = vld [vmem:[%s5926_s28 + $0x8] sm:$0xff] }
 0x4d0   : > { %v3940_v44 = vadd.f32 %v4487_v56, %v3939_v54 }
 0x4d2   : > { %v3941_v29 = vadd.f32 %v4488_v34, %v3940_v44 }
 0x4d4   : > { %v3942_v50 = vadd.f32 %v4489_v11, %v3941_v29 }
 0x4d6   : > { %v3943_v51 = vadd.f32 %v4490_v36, %v3942_v50 }
 0x4d8   : > { %v3944_v42 = vadd.f32 %v4491_v6, %v3943_v51 }
 0x4da   : > { %v3945_v23 = vadd.f32 %v4492_v38, %v3944_v42 }
 0x4dc   : > { %v3946_v26 = vadd.f32 %v4493_v10, %v3945_v23  ;;  %v3544_v10 = vld [vmem:[%s5931_s21 + $0x8] sm:$0xff] }
 0x4de   : > { %v3947_v48 = vadd.f32 %v4494_v53, %v3946_v26 }
 0x4e0   : > { %v3948_v39 = vadd.f32 %v4495_v57, %v3947_v48 }
 0x4e2   : > { %v3949_v25 = vadd.f32 %v4496_v40, %v3948_v39 }
 0x4e4   : > { %v3950_v46 = vadd.f32 %v4497_v19, %v3949_v25 }
 0x4e6   : > { %v3951_v22 = vadd.f32 %v4498_v2, %v3950_v46 }
 0x4e8   : > { %v3952_v45 = vadd.f32 %v4499_v41, %v3951_v22 }
 0x4ea   : > { %v3953_v31 = vadd.f32 %v4500_v59, %v3952_v45 }
 0x4ec   : > { %v3954_v14 = vadd.f32 %v4501_v9, %v3953_v31 }
 0x4ee   : > { %v3955_v47 = vrot.slane %v3954_v14, 4 }
 0x4f0   : > { %v3956_v16 = vadd.f32 %v3955_v47, %v3954_v14 }
 0x4f2   : > { %v3957_v61 = vrot.slane %v3956_v16, 2 }
 0x4f4   : > { %v3958_v15 = vadd.f32 %v3957_v61, %v3956_v16 }
 0x4f6   : > { %v3959_v30 = vrot.slane %v3958_v15, 1 }
 0x4f8   : > { %v3960_v28 = vadd.f32 %v3959_v30, %v3958_v15 }
 0x4fa   : > { %v3961_v12 = vadd.f32 %v3960_v28, %v3891_v7 }
 0x4fc   : > { %3962 = vst [vmem:[%s6691_s24] sm:$0x1] %v3961_v12 }
 0x511   : > { %v4606_v4 = vpop.f32.mrb[2].mxu0  ;;  %v4644_v24 = vpop.f32.mrb[2].mxu1 }
 0x512   : > { %v4607_v20 = vpop.f32.mrb[3].mxu0  ;;  %v4645_v5 = vpop.f32.mrb[3].mxu1 }
 0x513   : > { %v4608_v63 = vadd.f32 %v4607_v20, %v4606_v4  ;;  %v4646_v43 = vadd.f32 %v4645_v5, %v4644_v24 }
 0x515   : > { %v3275_v1 = vadd.f32 %v4646_v43, %v4608_v63  ;;  %v4609_v32 = vpop.f32.mrb[4].mxu0 }
 0x516   : > { %v4647_v58 = vpop.f32.mrb[4].mxu1  ;;  %v4610_v62 = vpop.f32.mrb[5].mxu0 }
 0x517   : > { %v4648_v56 = vpop.f32.mrb[5].mxu1  ;;  %v3283_v60 = vadd.f32 %v3275_v1, %v3131_v55  ;;  %v4611_v54 = vadd.f32 %v4610_v62, %v4609_v32 }
 0x518   : > { %v4649_v34 = vadd.f32 %v4648_v56, %v4647_v58 }
 0x519   : > { %3285 = vst [vmem:[%s5926_s28] sm:$0xff] %v3283_v60 }
 0x51a   : > { %v3280_v13 = vadd.f32 %v4649_v34, %v4611_v54 }
 0x51c   : > { %v3284_v44 = vadd.f32 %v3280_v13, %v3132_v33 }
 0x51e   : > { %3286 = vst [vmem:[%s5926_s28 + $0x8] sm:$0xff] %v3284_v44 }
 0x546   : > { %v4682_v11 = vpop.f32.mrb[6].mxu0 }
 0x547   : > { %v4683_v52 = vpop.f32.mrb[7].mxu0 }
 0x548   : > { %v4684_v36 = vadd.f32 %v4683_v52, %v4682_v11 }
 0x549   : > { %v4720_v29 = vpop.f32.mrb[6].mxu1 }
 0x54a   : > { %v4721_v37 = vpop.f32.mrb[7].mxu1  ;;  %v4685_v6 = vpop.f32.mrb[8].mxu0 }
 0x54b   : > { %v4722_v50 = vadd.f32 %v4721_v37, %v4720_v29  ;;  %v4686_v51 = vpop.f32.mrb[9].mxu0 }
 0x54c   : > { %v4687_v42 = vadd.f32 %v4686_v51, %v4685_v6 }
 0x54d   : > { %v3687_v38 = vadd.f32 %v4722_v50, %v4684_v36  ;;  %v4723_v27 = vpop.f32.mrb[8].mxu1 }
 0x54e   : > { %v4724_v8 = vpop.f32.mrb[9].mxu1 }
 0x54f   : > { %v3695_v23 = vadd.f32 %v3687_v38, %v3543_v17  ;;  %v4725_v53 = vadd.f32 %v4724_v8, %v4723_v27 }
 0x551   : > { %v3692_v35 = vadd.f32 %v4725_v53, %v4687_v42  ;;  %3697 = vst [vmem:[%s5931_s21] sm:$0xff] %v3695_v23 }
 0x553   : > { %v3696_v26 = vadd.f32 %v3692_v35, %v3544_v10 }
 0x555   : > { %3698 = vst [vmem:[%s5931_s21 + $0x8] sm:$0xff] %v3696_v26 }
 0x556 PF: > { %s23_s14 = sadd.s32 1, %s5722_s14   ;;  %s8060_s18 = sld [smem:[#allocation8_spill]] }
 0x557   : > { %p20_p8 = scmp.ge.s32.totalorder %s23_s14, 6   ;;  %s8061_s23 = sld [smem:[#allocation9_spill]] }
 0x558   : > { %s8062_s29 = smov %s5698_s30  ;;  %s8063_s30 = smov %s5702_s9 }
 0x559   : > { %s8064_s9 = smov %s5844_s25  ;;  %s8065_s10 = smov %s5714_s12 }
 0x55a   : > { %s8066_s11 = smov %s5718_s13  ;;  %22 = sbr.rel (!%p20_p8) target bundleno = 7 (0x7), region = 155 }
 0x55c   : > { %s8067_s12 = smov %s8060_s18 }
 0x55d   : > { %s8068_s13 = smov %s8061_s23 }
 0x561   :  { %4062 = vsyncpa [#allocation5], 1 }
 0x562   :  { %4064 = vsyncpa [#allocation5 + $0x1], 1 }

</bundles_post_ra>
